<compile_context>
chip_gen: v7x
topology: tpu7x:2x2x1
jax: 0.10.0
libtpu: 0.0.40
codegen_flags: <defaults>
</compile_context>

<pallas_src>
import functools
import math

import jax
import jax.numpy as jnp
from jax import lax
from jax.experimental import pallas as pl
from jax.experimental.pallas import tpu as pltpu

# AdaptiveLIF constants (module defaults)
B0, BETA, RM, DT = 0.01, 1.8, 1.0, 1.0

LANE = 128
SUBLANE = 8


def _round_up(n, m):
    return ((n + m - 1) // m) * m


def _eidrsnn_kernel(n_layers, steps, x_ref, *refs):
    """One grid step == `steps` timesteps of the recurrent network.

    refs layout:
      per rsnn layer l: (w_ih_eff, b_ih, w_hh_eff, b_hh, alpha, rho, sign)
      fc_out          : (w_eff, b, alpha, rho)
      outputs         : (spikes_out, psp_out)          # (steps, B, C_pad)
      scratch         : per layer (u, eta, h_last), then (u_out, eta_out)
    """
    idx = 0
    layer_refs = []
    for _ in range(n_layers):
        layer_refs.append(refs[idx:idx + 7])
        idx += 7
    w_out_ref, b_out_ref, alpha_o_ref, rho_o_ref = refs[idx:idx + 4]
    idx += 4
    out_ref, psp_ref = refs[idx:idx + 2]
    idx += 2
    scratch = refs[idx:]

    chunk = pl.program_id(0)

    # all_reset(): zero membrane potential, adaptation and h_last at t == 0.
    @pl.when(chunk == 0)
    def _():
        for r in scratch:
            r[...] = jnp.zeros_like(r)

    # Hoist loop-invariant (1, N) loads and derived constants out of the
    # unrolled time loop (JAX does not CSE these across unrolled iterations).
    layer_consts = []
    for l in range(n_layers):
        _, b_ih, _, b_hh, alpha, rho, sign = layer_refs[l]
        a = alpha[...]
        r = rho[...]
        layer_consts.append((b_ih[...], b_hh[...], a, (1.0 - a) * RM,
                             r, 1.0 - r, sign[...]))
    a_o = alpha_o_ref[...]
    r_o = rho_o_ref[...]
    b_o = b_out_ref[...]
    gain_o = (1.0 - a_o) * RM
    omr_o = 1.0 - r_o

    def step(u_idx, carry):
        t = chunk * steps + u_idx
        # At t == 0, PyTorch skips synapse_hh entirely (h_last is the int 0).
        # h_last scratch is zero at t == 0 so the recurrent matmul term is
        # exactly 0; only the hh bias needs gating (a (1, N)-sized multiply).
        rec_bias_gate = (t > 0).astype(jnp.float32)

        inp = x_ref[u_idx]                                   # (B, D_in)
        for l in range(n_layers):
            w_ih, _, w_hh, _, _, _, _ = layer_refs[l]
            b_ih, b_hh, a, gain, r, omr, sign = layer_consts[l]
            u_ref, eta_ref, hlast_ref = scratch[3 * l:3 * l + 3]

            # NonNegSLinear with pre-fused |W|*mask weights. Rows >= n_exc of
            # the presynaptic layer are zeroed in the wrapper, so feeding the
            # full signed spike vector (no lane slice) is exact.
            h = (jnp.dot(inp.astype(w_ih.dtype), w_ih[...],
                         preferred_element_type=jnp.float32) + b_ih)
            h = h + jnp.dot(hlast_ref[...].astype(w_hh.dtype), w_hh[...],
                            preferred_element_type=jnp.float32)
            h = h + rec_bias_gate * b_hh

            # AdaptiveLIF
            u = u_ref[...] * a + gain * h                        # neuron_charge
            eta = eta_ref[...]
            vth = B0 + BETA * eta                                # neuron_fire
            spikes = ((u - vth) >= 0.0).astype(jnp.float32)      # heaviside fwd
            u_ref[...] = u - spikes * vth                        # reset (vth reused)
            eta_ref[...] = r * eta + omr * spikes

            signed = spikes * sign                               # excit./inhib. sign
            hlast_ref[...] = signed                              # h_last for t+1
            inp = signed                                         # full width forward

        # fc_out (NonNegSLinear, fused weights) + output AdaptiveLIF
        h = (jnp.dot(inp.astype(w_out_ref.dtype), w_out_ref[...],
                     preferred_element_type=jnp.float32) + b_o)
        u_ref, eta_ref = scratch[3 * n_layers:3 * n_layers + 2]
        u = u_ref[...] * a_o + gain_o * h
        eta = eta_ref[...]
        vth = B0 + BETA * eta
        s = ((u - vth) >= 0.0).astype(jnp.float32)
        u_ref[...] = u - s * vth
        eta_ref[...] = r_o * eta + omr_o * s

        out_ref[u_idx] = s    # out.append(s)   — lane-dense (C padded to 128)
        psp_ref[u_idx] = h    # psps.append(h)
        return carry

    lax.fori_loop(0, steps, step, 0, unroll=True)


def _pad2(a, rows, cols):
    return jnp.pad(a, ((0, rows - a.shape[0]), (0, cols - a.shape[1])))


def eidrsnn_forward(x_btd, params, *, steps_per_block=8, matmul_dtype=jnp.float32):
    """x_btd: (B, T, D_in) float32 (PyTorch convention).

    Returns (out, psps), each (B, T, num_classes).
    matmul_dtype: set to jnp.bfloat16 on v6e/v7x to halve weight VMEM/DMA and
    hit the full-rate bf16 MXU path (LIF state math always stays f32).
    """
    B, T, D = x_btd.shape
    layer_params = params["layers"]
    fc = params["fc"]
    n_layers = len(layer_params)
    C = fc["w"].shape[1]
    C_pad = _round_up(C, LANE)
    B_pad = _round_up(B, SUBLANE)

    # ---- time-major input, padded to a multiple of steps_per_block ----------
    U = max(1, min(T, steps_per_block))
    T_pad = _round_up(T, U)
    x = jnp.transpose(x_btd, (1, 0, 2))                        # (T, B, D)
    if T_pad != T or B_pad != B:
        x = jnp.pad(x, ((0, T_pad - T), (0, B_pad - B), (0, 0)))
    num_chunks = T_pad // U

    flat_inputs = [x]
    in_specs = [pl.BlockSpec((U, B_pad, D), lambda c: (c, 0, 0))]

    def full_spec(arr):
        nd = arr.ndim
        return pl.BlockSpec(arr.shape, lambda c, nd=nd: (0,) * nd)

    def add(arr):
        flat_inputs.append(arr)
        in_specs.append(full_spec(arr))

    # ---- hoisted, loop-invariant |W| * mask fusion + lane padding -----------
    flops_per_step = 0
    prev_width = D              # lane width fed forward by the previous stage
    padded_widths = []
    for p in layer_params:
        in_f, n_h = p["w_ih"].shape
        n_h_pad = _round_up(n_h, LANE)
        padded_widths.append(n_h_pad)

        w_ih = jnp.abs(p["w_ih"]) * p["m_ih"]                  # (in_f, n_h)
        # For layers > 0, in_f == n_exc of the previous layer: padding the rows
        # up to prev_width with zeros makes the full-width spike feed exact.
        w_ih = _pad2(w_ih, prev_width, n_h_pad).astype(matmul_dtype)
        w_hh = _pad2(jnp.abs(p["w_hh"]) * p["m_hh"],
                     n_h_pad, n_h_pad).astype(matmul_dtype)
        b_ih = _pad2(p["b_ih"], 1, n_h_pad)
        b_hh = _pad2(p["b_hh"], 1, n_h_pad)
        alpha = _pad2(p["alpha"], 1, n_h_pad)
        rho = _pad2(p["rho"], 1, n_h_pad)
        sign = _pad2(p["sign"], 1, n_h_pad)
        for a in (w_ih, b_ih, w_hh, b_hh, alpha, rho, sign):
            add(a)

        flops_per_step += 2 * B_pad * (prev_width * n_h_pad + n_h_pad * n_h_pad)
        prev_width = n_h_pad

    w_out = _pad2(jnp.abs(fc["w"]) * fc["m"], prev_width, C_pad).astype(matmul_dtype)
    b_out = _pad2(fc["b"], 1, C_pad)
    alpha_o = _pad2(fc["alpha"], 1, C_pad)
    rho_o = _pad2(fc["rho"], 1, C_pad)
    for a in (w_out, b_out, alpha_o, rho_o):
        add(a)
    flops_per_step += 2 * B_pad * prev_width * C_pad

    # ---- scratch: per-layer (u, eta, h_last) + output (u, eta) --------------
    scratch_shapes = []
    for n_h_pad in padded_widths:
        scratch_shapes += [pltpu.VMEM((B_pad, n_h_pad), jnp.float32)] * 3
    scratch_shapes += [pltpu.VMEM((B_pad, C_pad), jnp.float32)] * 2

    out_shape = (jax.ShapeDtypeStruct((T_pad, B_pad, C_pad), jnp.float32),
                 jax.ShapeDtypeStruct((T_pad, B_pad, C_pad), jnp.float32))
    out_specs = [pl.BlockSpec((U, B_pad, C_pad), lambda c: (c, 0, 0)),
                 pl.BlockSpec((U, B_pad, C_pad), lambda c: (c, 0, 0))]

    # ---- cost estimate + explicit VMEM budget --------------------------------
    weight_bytes = sum(int(a.size) * a.dtype.itemsize for a in flat_inputs[1:])
    io_bytes = int(x.size) * 4 + 2 * T_pad * B_pad * C_pad * 4
    cost = pl.CostEstimate(flops=int(flops_per_step) * T_pad,
                           transcendentals=0,
                           bytes_accessed=int(weight_bytes + io_bytes))

    scratch_bytes = sum(12 * B_pad * w for w in padded_widths) + 8 * B_pad * C_pad
    block_bytes = (U * B_pad * D + 2 * U * B_pad * C_pad) * 4
    vmem_needed = 2 * (weight_bytes + block_bytes) + scratch_bytes  # 2x: double-buffering
    vmem_limit = int(min(64 * 1024 * 1024, max(4 * vmem_needed, 16 * 1024 * 1024)))

    kernel = functools.partial(_eidrsnn_kernel, n_layers, U)

    out, psps = pl.pallas_call(
        kernel,
        out_shape=out_shape,
        grid_spec=pltpu.PrefetchScalarGridSpec(
            num_scalar_prefetch=0,
            grid=(num_chunks,),
            in_specs=in_specs,
            out_specs=out_specs,
            scratch_shapes=scratch_shapes),
        compiler_params=pltpu.CompilerParams(
            dimension_semantics=("arbitrary",),   # recurrence -> sequential grid
            vmem_limit_bytes=vmem_limit),
        cost_estimate=cost,
    )(*flat_inputs)

    out = jnp.transpose(out[:T, :B, :C], (1, 0, 2))
    psps = jnp.transpose(psps[:T, :B, :C], (1, 0, 2))
    return out, psps


# ----------------------- deterministic parameter init -----------------------

def _sparse_linear_params(key, in_f, out_f, sparsity):
    """NonNegSLinear: mask from one (stand-in orthogonal) init, weights from a
    xavier-uniform re-init, default nn.Linear bias init."""
    k1, k2, k3 = jax.random.split(key, 3)
    w_for_mask = jax.random.normal(k1, (out_f, in_f), jnp.float32)
    pcnt = jnp.percentile(jnp.abs(w_for_mask), 100.0 * (1.0 - sparsity))
    mask = (jnp.abs(w_for_mask) >= pcnt).astype(jnp.float32)
    limit = math.sqrt(6.0 / (in_f + out_f))
    w = jax.random.uniform(k2, (out_f, in_f), jnp.float32, -limit, limit)
    bb = 1.0 / math.sqrt(in_f)
    b = jax.random.uniform(k3, (out_f,), jnp.float32, -bb, bb)
    # pre-transpose for the kernel's x @ W convention; bias kept 2D (1, out)
    return w.T, mask.T, b[None, :]


def _lif_params(key, n):
    k1, k2 = jax.random.split(key)
    tau_m = 200.0 + 25.0 * jax.random.normal(k1, (n,), jnp.float32)
    tau_adp = 20.0 + 5.0 * jax.random.normal(k2, (n,), jnp.float32)
    alpha = jnp.exp(-DT / tau_m)[None, :]
    rho = jnp.exp(-DT / tau_adp)[None, :]
    return alpha, rho


def init_eidrsnn_params(key, layers, percent, num_classes, sparsity):
    layer_params = []
    for i in range(1, len(layers)):
        n_pre = int(layers[i - 1] * percent[i - 1])
        n_h = layers[i]
        n_exc = int(n_h * percent[i])
        key, k_ih, k_hh, k_lif = jax.random.split(key, 4)
        w_ih, m_ih, b_ih = _sparse_linear_params(k_ih, n_pre, n_h, sparsity)
        w_hh, m_hh, b_hh = _sparse_linear_params(k_hh, n_h, n_h, sparsity)
        alpha, rho = _lif_params(k_lif, n_h)
        sign = jnp.ones((1, n_h), jnp.float32).at[:, n_exc:].set(-1.0)
        layer_params.append(dict(w_ih=w_ih, m_ih=m_ih, b_ih=b_ih,
                                 w_hh=w_hh, m_hh=m_hh, b_hh=b_hh,
                                 alpha=alpha, rho=rho, sign=sign, n_exc=n_exc))
    n_in_fc = int(layers[-1] * percent[-1])
    key, k_fc, k_lif = jax.random.split(key, 3)
    w, m, b = _sparse_linear_params(k_fc, n_in_fc, num_classes, sparsity)
    alpha_o, rho_o = _lif_params(k_lif, num_classes)
    fc = dict(w=w, m=m, b=b, alpha=alpha_o, rho=rho_o)
    return dict(layers=layer_params, fc=fc)


if __name__ == "__main__":
    # Small config consistent with eiDRSNN(T, t_max=1, layers, percent, num_classes, sparsity)
    B = 2
    T = 8
    layers = [16, 32, 32]
    percent = [1.0, 0.5, 0.5]
    num_classes = 8
    sparsity = 0.3

    key = jax.random.PRNGKey(0)
    k_param, k_x = jax.random.split(key)
    params = init_eidrsnn_params(k_param, layers, percent, num_classes, sparsity)

    d_in = int(layers[0] * percent[0])
    # Scale input so membrane potentials cross the adaptive threshold and spike.
    x = 4.0 * jax.random.uniform(k_x, (B, T, d_in), jnp.float32)

    out, psps = eidrsnn_forward(x, params)
    out, psps = jax.block_until_ready((out, psps))

    assert out.shape == (B, T, num_classes), out.shape
    assert psps.shape == (B, T, num_classes), psps.shape
    assert bool(jnp.all(jnp.isfinite(out))) and bool(jnp.all(jnp.isfinite(psps)))
    assert bool(jnp.all((out == 0.0) | (out == 1.0)))  # output neuron emits spikes

    print("KERNEL_OK")
</pallas_src>

<mosaic_0001>
module attributes {stable_mosaic.version = 11 : i64} {
  func.func @_eidrsnn_kernel(%arg0: i32, %arg1: memref<8x8x16xf32, #tpu.memory_space<vmem>>, %arg2: memref<16x128xf32, #tpu.memory_space<vmem>>, %arg3: memref<1x128xf32, #tpu.memory_space<vmem>>, %arg4: memref<128x128xf32, #tpu.memory_space<vmem>>, %arg5: memref<1x128xf32, #tpu.memory_space<vmem>>, %arg6: memref<1x128xf32, #tpu.memory_space<vmem>>, %arg7: memref<1x128xf32, #tpu.memory_space<vmem>>, %arg8: memref<1x128xf32, #tpu.memory_space<vmem>>, %arg9: memref<128x128xf32, #tpu.memory_space<vmem>>, %arg10: memref<1x128xf32, #tpu.memory_space<vmem>>, %arg11: memref<128x128xf32, #tpu.memory_space<vmem>>, %arg12: memref<1x128xf32, #tpu.memory_space<vmem>>, %arg13: memref<1x128xf32, #tpu.memory_space<vmem>>, %arg14: memref<1x128xf32, #tpu.memory_space<vmem>>, %arg15: memref<1x128xf32, #tpu.memory_space<vmem>>, %arg16: memref<128x128xf32, #tpu.memory_space<vmem>>, %arg17: memref<1x128xf32, #tpu.memory_space<vmem>>, %arg18: memref<1x128xf32, #tpu.memory_space<vmem>>, %arg19: memref<1x128xf32, #tpu.memory_space<vmem>>, %arg20: memref<8x8x128xf32, #tpu.memory_space<vmem>>, %arg21: memref<8x8x128xf32, #tpu.memory_space<vmem>>, %arg22: memref<8x128xf32, #tpu.memory_space<vmem>>, %arg23: memref<8x128xf32, #tpu.memory_space<vmem>>, %arg24: memref<8x128xf32, #tpu.memory_space<vmem>>, %arg25: memref<8x128xf32, #tpu.memory_space<vmem>>, %arg26: memref<8x128xf32, #tpu.memory_space<vmem>>, %arg27: memref<8x128xf32, #tpu.memory_space<vmem>>, %arg28: memref<8x128xf32, #tpu.memory_space<vmem>>, %arg29: memref<8x128xf32, #tpu.memory_space<vmem>>) attributes {dimension_semantics = [#tpu.dimension_semantics<arbitrary>], iteration_bounds = array<i64: 1>, scalar_prefetch = 0 : i64, scratch_operands = 8 : i64, tpu.core_type = #tpu.core_type<tc>, window_params = [{transform_indices = @transform_0, window_bounds = array<i64: 8, 8, 16>}, {pipeline_mode = #tpu.pipeline_mode<synchronous>, transform_indices = @transform_1, window_bounds = array<i64: 16, 128>}, {pipeline_mode = #tpu.pipeline_mode<synchronous>, transform_indices = @transform_2, window_bounds = array<i64: 1, 128>}, {pipeline_mode = #tpu.pipeline_mode<synchronous>, transform_indices = @transform_3, window_bounds = array<i64: 128, 128>}, {pipeline_mode = #tpu.pipeline_mode<synchronous>, transform_indices = @transform_4, window_bounds = array<i64: 1, 128>}, {pipeline_mode = #tpu.pipeline_mode<synchronous>, transform_indices = @transform_5, window_bounds = array<i64: 1, 128>}, {pipeline_mode = #tpu.pipeline_mode<synchronous>, transform_indices = @transform_6, window_bounds = array<i64: 1, 128>}, {pipeline_mode = #tpu.pipeline_mode<synchronous>, transform_indices = @transform_7, window_bounds = array<i64: 1, 128>}, {pipeline_mode = #tpu.pipeline_mode<synchronous>, transform_indices = @transform_8, window_bounds = array<i64: 128, 128>}, {pipeline_mode = #tpu.pipeline_mode<synchronous>, transform_indices = @transform_9, window_bounds = array<i64: 1, 128>}, {pipeline_mode = #tpu.pipeline_mode<synchronous>, transform_indices = @transform_10, window_bounds = array<i64: 128, 128>}, {pipeline_mode = #tpu.pipeline_mode<synchronous>, transform_indices = @transform_11, window_bounds = array<i64: 1, 128>}, {pipeline_mode = #tpu.pipeline_mode<synchronous>, transform_indices = @transform_12, window_bounds = array<i64: 1, 128>}, {pipeline_mode = #tpu.pipeline_mode<synchronous>, transform_indices = @transform_13, window_bounds = array<i64: 1, 128>}, {pipeline_mode = #tpu.pipeline_mode<synchronous>, transform_indices = @transform_14, window_bounds = array<i64: 1, 128>}, {pipeline_mode = #tpu.pipeline_mode<synchronous>, transform_indices = @transform_15, window_bounds = array<i64: 128, 128>}, {pipeline_mode = #tpu.pipeline_mode<synchronous>, transform_indices = @transform_16, window_bounds = array<i64: 1, 128>}, {pipeline_mode = #tpu.pipeline_mode<synchronous>, transform_indices = @transform_17, window_bounds = array<i64: 1, 128>}, {pipeline_mode = #tpu.pipeline_mode<synchronous>, transform_indices = @transform_18, window_bounds = array<i64: 1, 128>}, {transform_indices = @transform_19, window_bounds = array<i64: 8, 8, 128>}, {transform_indices = @transform_20, window_bounds = array<i64: 8, 8, 128>}]} {
    %c0_i32 = arith.constant 0 : i32
    %0 = arith.cmpi eq, %arg0, %c0_i32 : i32
    %1 = arith.extui %0 : i1 to i32
    %c0_i32_0 = arith.constant 0 : i32
    %2 = arith.cmpi ne, %1, %c0_i32_0 : i32
    scf.if %2 {
      %cst_547 = arith.constant 0.000000e+00 : f32
      %1034 = vector.broadcast %cst_547 : f32 to vector<8x128xf32>
      %c0_548 = arith.constant 0 : index
      %c0_549 = arith.constant 0 : index
      %1035 = vector.load %arg22[%c0_548, %c0_549] : memref<8x128xf32, #tpu.memory_space<vmem>>, vector<8x128xf32>
      tpu.vector_store %arg22[%c0_548, %c0_549], %1034 {strides = array<i32>} : memref<8x128xf32, #tpu.memory_space<vmem>>, vector<8x128xf32>,
      %cst_550 = arith.constant 0.000000e+00 : f32
      %1036 = vector.broadcast %cst_550 : f32 to vector<8x128xf32>
      %c0_551 = arith.constant 0 : index
      %c0_552 = arith.constant 0 : index
      %1037 = vector.load %arg23[%c0_551, %c0_552] : memref<8x128xf32, #tpu.memory_space<vmem>>, vector<8x128xf32>
      tpu.vector_store %arg23[%c0_551, %c0_552], %1036 {strides = array<i32>} : memref<8x128xf32, #tpu.memory_space<vmem>>, vector<8x128xf32>,
      %cst_553 = arith.constant 0.000000e+00 : f32
      %1038 = vector.broadcast %cst_553 : f32 to vector<8x128xf32>
      %c0_554 = arith.constant 0 : index
      %c0_555 = arith.constant 0 : index
      %1039 = vector.load %arg24[%c0_554, %c0_555] : memref<8x128xf32, #tpu.memory_space<vmem>>, vector<8x128xf32>
      tpu.vector_store %arg24[%c0_554, %c0_555], %1038 {strides = array<i32>} : memref<8x128xf32, #tpu.memory_space<vmem>>, vector<8x128xf32>,
      %cst_556 = arith.constant 0.000000e+00 : f32
      %1040 = vector.broadcast %cst_556 : f32 to vector<8x128xf32>
      %c0_557 = arith.constant 0 : index
      %c0_558 = arith.constant 0 : index
      %1041 = vector.load %arg25[%c0_557, %c0_558] : memref<8x128xf32, #tpu.memory_space<vmem>>, vector<8x128xf32>
      tpu.vector_store %arg25[%c0_557, %c0_558], %1040 {strides = array<i32>} : memref<8x128xf32, #tpu.memory_space<vmem>>, vector<8x128xf32>,
      %cst_559 = arith.constant 0.000000e+00 : f32
      %1042 = vector.broadcast %cst_559 : f32 to vector<8x128xf32>
      %c0_560 = arith.constant 0 : index
      %c0_561 = arith.constant 0 : index
      %1043 = vector.load %arg26[%c0_560, %c0_561] : memref<8x128xf32, #tpu.memory_space<vmem>>, vector<8x128xf32>
      tpu.vector_store %arg26[%c0_560, %c0_561], %1042 {strides = array<i32>} : memref<8x128xf32, #tpu.memory_space<vmem>>, vector<8x128xf32>,
      %cst_562 = arith.constant 0.000000e+00 : f32
      %1044 = vector.broadcast %cst_562 : f32 to vector<8x128xf32>
      %c0_563 = arith.constant 0 : index
      %c0_564 = arith.constant 0 : index
      %1045 = vector.load %arg27[%c0_563, %c0_564] : memref<8x128xf32, #tpu.memory_space<vmem>>, vector<8x128xf32>
      tpu.vector_store %arg27[%c0_563, %c0_564], %1044 {strides = array<i32>} : memref<8x128xf32, #tpu.memory_space<vmem>>, vector<8x128xf32>,
      %cst_565 = arith.constant 0.000000e+00 : f32
      %1046 = vector.broadcast %cst_565 : f32 to vector<8x128xf32>
      %c0_566 = arith.constant 0 : index
      %c0_567 = arith.constant 0 : index
      %1047 = vector.load %arg28[%c0_566, %c0_567] : memref<8x128xf32, #tpu.memory_space<vmem>>, vector<8x128xf32>
      tpu.vector_store %arg28[%c0_566, %c0_567], %1046 {strides = array<i32>} : memref<8x128xf32, #tpu.memory_space<vmem>>, vector<8x128xf32>,
      %cst_568 = arith.constant 0.000000e+00 : f32
      %1048 = vector.broadcast %cst_568 : f32 to vector<8x128xf32>
      %c0_569 = arith.constant 0 : index
      %c0_570 = arith.constant 0 : index
      %1049 = vector.load %arg29[%c0_569, %c0_570] : memref<8x128xf32, #tpu.memory_space<vmem>>, vector<8x128xf32>
      tpu.vector_store %arg29[%c0_569, %c0_570], %1048 {strides = array<i32>} : memref<8x128xf32, #tpu.memory_space<vmem>>, vector<8x128xf32>,
    } else {
    }
    %c0 = arith.constant 0 : index
    %c0_1 = arith.constant 0 : index
    %3 = vector.load %arg6[%c0, %c0_1] : memref<1x128xf32, #tpu.memory_space<vmem>>, vector<1x128xf32>
    %c0_2 = arith.constant 0 : index
    %c0_3 = arith.constant 0 : index
    %4 = vector.load %arg7[%c0_2, %c0_3] : memref<1x128xf32, #tpu.memory_space<vmem>>, vector<1x128xf32>
    %c0_4 = arith.constant 0 : index
    %c0_5 = arith.constant 0 : index
    %5 = vector.load %arg3[%c0_4, %c0_5] : memref<1x128xf32, #tpu.memory_space<vmem>>, vector<1x128xf32>
    %c0_6 = arith.constant 0 : index
    %c0_7 = arith.constant 0 : index
    %6 = vector.load %arg5[%c0_6, %c0_7] : memref<1x128xf32, #tpu.memory_space<vmem>>, vector<1x128xf32>
    %cst = arith.constant 1.000000e+00 : f32
    %7 = vector.broadcast %cst : f32 to vector<1x128xf32>
    %8 = arith.subf %7, %3 : vector<1x128xf32>
    %cst_8 = arith.constant 1.000000e+00 : f32
    %9 = vector.broadcast %cst_8 : f32 to vector<1x128xf32>
    %10 = arith.mulf %8, %9 : vector<1x128xf32>
    %cst_9 = arith.constant 1.000000e+00 : f32
    %11 = vector.broadcast %cst_9 : f32 to vector<1x128xf32>
    %12 = arith.subf %11, %4 : vector<1x128xf32>
    %c0_10 = arith.constant 0 : index
    %c0_11 = arith.constant 0 : index
    %13 = vector.load %arg8[%c0_10, %c0_11] : memref<1x128xf32, #tpu.memory_space<vmem>>, vector<1x128xf32>
    %c0_12 = arith.constant 0 : index
    %c0_13 = arith.constant 0 : index
    %14 = vector.load %arg13[%c0_12, %c0_13] : memref<1x128xf32, #tpu.memory_space<vmem>>, vector<1x128xf32>
    %c0_14 = arith.constant 0 : index
    %c0_15 = arith.constant 0 : index
    %15 = vector.load %arg14[%c0_14, %c0_15] : memref<1x128xf32, #tpu.memory_space<vmem>>, vector<1x128xf32>
    %c0_16 = arith.constant 0 : index
    %c0_17 = arith.constant 0 : index
    %16 = vector.load %arg10[%c0_16, %c0_17] : memref<1x128xf32, #tpu.memory_space<vmem>>, vector<1x128xf32>
    %c0_18 = arith.constant 0 : index
    %c0_19 = arith.constant 0 : index
    %17 = vector.load %arg12[%c0_18, %c0_19] : memref<1x128xf32, #tpu.memory_space<vmem>>, vector<1x128xf32>
    %cst_20 = arith.constant 1.000000e+00 : f32
    %18 = vector.broadcast %cst_20 : f32 to vector<1x128xf32>
    %19 = arith.subf %18, %14 : vector<1x128xf32>
    %cst_21 = arith.constant 1.000000e+00 : f32
    %20 = vector.broadcast %cst_21 : f32 to vector<1x128xf32>
    %21 = arith.mulf %19, %20 : vector<1x128xf32>
    %cst_22 = arith.constant 1.000000e+00 : f32
    %22 = vector.broadcast %cst_22 : f32 to vector<1x128xf32>
    %23 = arith.subf %22, %15 : vector<1x128xf32>
    %c0_23 = arith.constant 0 : index
    %c0_24 = arith.constant 0 : index
    %24 = vector.load %arg15[%c0_23, %c0_24] : memref<1x128xf32, #tpu.memory_space<vmem>>, vector<1x128xf32>
    %c0_25 = arith.constant 0 : index
    %c0_26 = arith.constant 0 : index
    %25 = vector.load %arg18[%c0_25, %c0_26] : memref<1x128xf32, #tpu.memory_space<vmem>>, vector<1x128xf32>
    %c0_27 = arith.constant 0 : index
    %c0_28 = arith.constant 0 : index
    %26 = vector.load %arg19[%c0_27, %c0_28] : memref<1x128xf32, #tpu.memory_space<vmem>>, vector<1x128xf32>
    %c0_29 = arith.constant 0 : index
    %c0_30 = arith.constant 0 : index
    %27 = vector.load %arg17[%c0_29, %c0_30] : memref<1x128xf32, #tpu.memory_space<vmem>>, vector<1x128xf32>
    %cst_31 = arith.constant 1.000000e+00 : f32
    %28 = vector.broadcast %cst_31 : f32 to vector<1x128xf32>
    %29 = arith.subf %28, %25 : vector<1x128xf32>
    %cst_32 = arith.constant 1.000000e+00 : f32
    %30 = vector.broadcast %cst_32 : f32 to vector<1x128xf32>
    %31 = arith.mulf %29, %30 : vector<1x128xf32>
    %cst_33 = arith.constant 1.000000e+00 : f32
    %32 = vector.broadcast %cst_33 : f32 to vector<1x128xf32>
    %33 = arith.subf %32, %26 : vector<1x128xf32>
    %c0_i32_34 = arith.constant 0 : i32
    %c8_i32 = arith.constant 8 : i32
    %34 = arith.muli %arg0, %c8_i32 : i32
    %35 = arith.addi %34, %c0_i32_34 : i32
    %c0_i32_35 = arith.constant 0 : i32
    %36 = arith.cmpi sgt, %35, %c0_i32_35 : i32
    %37 = arith.extui %36 : i1 to i32
    %38 = arith.sitofp %37 : i32 to f32
    %39 = arith.index_cast %c0_i32_34 : i32 to index
    %c0_36 = arith.constant 0 : index
    %c0_37 = arith.constant 0 : index
    %40 = vector.load %arg1[%39, %c0_36, %c0_37] : memref<8x8x16xf32, #tpu.memory_space<vmem>>, vector<1x8x16xf32>
    %41 = vector.shape_cast %40 : vector<1x8x16xf32> to vector<8x16xf32>
    %c0_38 = arith.constant 0 : index
    %c0_39 = arith.constant 0 : index
    %42 = vector.load %arg2[%c0_38, %c0_39] : memref<16x128xf32, #tpu.memory_space<vmem>>, vector<16x128xf32>
    %cst_40 = arith.constant dense<0.000000e+00> : vector<8x128xf32>
    %43 = tpu.matmul %41, %42, %cst_40 {dimension_numbers = #tpu.dot_dimension_numbers<[1], [0], [0], [1], [0, 0, 1, 1], [], []>} : vector<8x16xf32>, vector<16x128xf32>, vector<8x128xf32> -> vector<8x128xf32>
    %44 = vector.broadcast %5 : vector<1x128xf32> to vector<8x128xf32>
    %45 = arith.addf %43, %44 : vector<8x128xf32>
    %c0_41 = arith.constant 0 : index
    %c0_42 = arith.constant 0 : index
    %46 = vector.load %arg24[%c0_41, %c0_42] : memref<8x128xf32, #tpu.memory_space<vmem>>, vector<8x128xf32>
    %c0_43 = arith.constant 0 : index
    %c0_44 = arith.constant 0 : index
    %47 = vector.load %arg4[%c0_43, %c0_44] : memref<128x128xf32, #tpu.memory_space<vmem>>, vector<128x128xf32>
    %cst_45 = arith.constant dense<0.000000e+00> : vector<8x128xf32>
    %48 = tpu.matmul %46, %47, %cst_45 {dimension_numbers = #tpu.dot_dimension_numbers<[1], [0], [0], [1], [0, 0, 1, 1], [], []>} : vector<8x128xf32>, vector<128x128xf32>, vector<8x128xf32> -> vector<8x128xf32>
    %49 = arith.addf %45, %48 : vector<8x128xf32>
    %50 = vector.broadcast %38 : f32 to vector<1x128xf32>
    %51 = arith.mulf %50, %6 : vector<1x128xf32>
    %52 = vector.broadcast %51 : vector<1x128xf32> to vector<8x128xf32>
    %53 = arith.addf %49, %52 : vector<8x128xf32>
    %c0_46 = arith.constant 0 : index
    %c0_47 = arith.constant 0 : index
    %54 = vector.load %arg22[%c0_46, %c0_47] : memref<8x128xf32, #tpu.memory_space<vmem>>, vector<8x128xf32>
    %55 = vector.broadcast %3 : vector<1x128xf32> to vector<8x128xf32>
    %56 = arith.mulf %54, %55 : vector<8x128xf32>
    %57 = vector.broadcast %10 : vector<1x128xf32> to vector<8x128xf32>
    %58 = arith.mulf %57, %53 : vector<8x128xf32>
    %59 = arith.addf %56, %58 : vector<8x128xf32>
    %c0_48 = arith.constant 0 : index
    %c0_49 = arith.constant 0 : index
    %60 = vector.load %arg23[%c0_48, %c0_49] : memref<8x128xf32, #tpu.memory_space<vmem>>, vector<8x128xf32>
    %cst_50 = arith.constant 1.800000e+00 : f32
    %61 = vector.broadcast %cst_50 : f32 to vector<8x128xf32>
    %62 = arith.mulf %61, %60 : vector<8x128xf32>
    %cst_51 = arith.constant 0.00999999977 : f32
    %63 = vector.broadcast %cst_51 : f32 to vector<8x128xf32>
    %64 = arith.addf %63, %62 : vector<8x128xf32>
    %65 = arith.subf %59, %64 : vector<8x128xf32>
    %cst_52 = arith.constant 0.000000e+00 : f32
    %66 = vector.broadcast %cst_52 : f32 to vector<8x128xf32>
    %67 = arith.cmpf oge, %65, %66 : vector<8x128xf32>
    %68 = arith.extui %67 : vector<8x128xi1> to vector<8x128xi32>
    %69 = arith.sitofp %68 : vector<8x128xi32> to vector<8x128xf32>
    %70 = arith.mulf %69, %64 : vector<8x128xf32>
    %71 = arith.subf %59, %70 : vector<8x128xf32>
    %c0_53 = arith.constant 0 : index
    %c0_54 = arith.constant 0 : index
    %72 = vector.load %arg22[%c0_53, %c0_54] : memref<8x128xf32, #tpu.memory_space<vmem>>, vector<8x128xf32>
    tpu.vector_store %arg22[%c0_53, %c0_54], %71 {strides = array<i32>} : memref<8x128xf32, #tpu.memory_space<vmem>>, vector<8x128xf32>,
    %73 = vector.broadcast %4 : vector<1x128xf32> to vector<8x128xf32>
    %74 = arith.mulf %73, %60 : vector<8x128xf32>
    %75 = vector.broadcast %12 : vector<1x128xf32> to vector<8x128xf32>
    %76 = arith.mulf %75, %69 : vector<8x128xf32>
    %77 = arith.addf %74, %76 : vector<8x128xf32>
    %c0_55 = arith.constant 0 : index
    %c0_56 = arith.constant 0 : index
    %78 = vector.load %arg23[%c0_55, %c0_56] : memref<8x128xf32, #tpu.memory_space<vmem>>, vector<8x128xf32>
    tpu.vector_store %arg23[%c0_55, %c0_56], %77 {strides = array<i32>} : memref<8x128xf32, #tpu.memory_space<vmem>>, vector<8x128xf32>,
    %79 = vector.broadcast %13 : vector<1x128xf32> to vector<8x128xf32>
    %80 = arith.mulf %69, %79 : vector<8x128xf32>
    %c0_57 = arith.constant 0 : index
    %c0_58 = arith.constant 0 : index
    %81 = vector.load %arg24[%c0_57, %c0_58] : memref<8x128xf32, #tpu.memory_space<vmem>>, vector<8x128xf32>
    tpu.vector_store %arg24[%c0_57, %c0_58], %80 {strides = array<i32>} : memref<8x128xf32, #tpu.memory_space<vmem>>, vector<8x128xf32>,
    %c0_59 = arith.constant 0 : index
    %c0_60 = arith.constant 0 : index
    %82 = vector.load %arg9[%c0_59, %c0_60] : memref<128x128xf32, #tpu.memory_space<vmem>>, vector<128x128xf32>
    %cst_61 = arith.constant dense<0.000000e+00> : vector<8x128xf32>
    %83 = tpu.matmul %80, %82, %cst_61 {dimension_numbers = #tpu.dot_dimension_numbers<[1], [0], [0], [1], [0, 0, 1, 1], [], []>} : vector<8x128xf32>, vector<128x128xf32>, vector<8x128xf32> -> vector<8x128xf32>
    %84 = vector.broadcast %16 : vector<1x128xf32> to vector<8x128xf32>
    %85 = arith.addf %83, %84 : vector<8x128xf32>
    %c0_62 = arith.constant 0 : index
    %c0_63 = arith.constant 0 : index
    %86 = vector.load %arg27[%c0_62, %c0_63] : memref<8x128xf32, #tpu.memory_space<vmem>>, vector<8x128xf32>
    %c0_64 = arith.constant 0 : index
    %c0_65 = arith.constant 0 : index
    %87 = vector.load %arg11[%c0_64, %c0_65] : memref<128x128xf32, #tpu.memory_space<vmem>>, vector<128x128xf32>
    %cst_66 = arith.constant dense<0.000000e+00> : vector<8x128xf32>
    %88 = tpu.matmul %86, %87, %cst_66 {dimension_numbers = #tpu.dot_dimension_numbers<[1], [0], [0], [1], [0, 0, 1, 1], [], []>} : vector<8x128xf32>, vector<128x128xf32>, vector<8x128xf32> -> vector<8x128xf32>
    %89 = arith.addf %85, %88 : vector<8x128xf32>
    %90 = vector.broadcast %38 : f32 to vector<1x128xf32>
    %91 = arith.mulf %90, %17 : vector<1x128xf32>
    %92 = vector.broadcast %91 : vector<1x128xf32> to vector<8x128xf32>
    %93 = arith.addf %89, %92 : vector<8x128xf32>
    %c0_67 = arith.constant 0 : index
    %c0_68 = arith.constant 0 : index
    %94 = vector.load %arg25[%c0_67, %c0_68] : memref<8x128xf32, #tpu.memory_space<vmem>>, vector<8x128xf32>
    %95 = vector.broadcast %14 : vector<1x128xf32> to vector<8x128xf32>
    %96 = arith.mulf %94, %95 : vector<8x128xf32>
    %97 = vector.broadcast %21 : vector<1x128xf32> to vector<8x128xf32>
    %98 = arith.mulf %97, %93 : vector<8x128xf32>
    %99 = arith.addf %96, %98 : vector<8x128xf32>
    %c0_69 = arith.constant 0 : index
    %c0_70 = arith.constant 0 : index
    %100 = vector.load %arg26[%c0_69, %c0_70] : memref<8x128xf32, #tpu.memory_space<vmem>>, vector<8x128xf32>
    %cst_71 = arith.constant 1.800000e+00 : f32
    %101 = vector.broadcast %cst_71 : f32 to vector<8x128xf32>
    %102 = arith.mulf %101, %100 : vector<8x128xf32>
    %cst_72 = arith.constant 0.00999999977 : f32
    %103 = vector.broadcast %cst_72 : f32 to vector<8x128xf32>
    %104 = arith.addf %103, %102 : vector<8x128xf32>
    %105 = arith.subf %99, %104 : vector<8x128xf32>
    %cst_73 = arith.constant 0.000000e+00 : f32
    %106 = vector.broadcast %cst_73 : f32 to vector<8x128xf32>
    %107 = arith.cmpf oge, %105, %106 : vector<8x128xf32>
    %108 = arith.extui %107 : vector<8x128xi1> to vector<8x128xi32>
    %109 = arith.sitofp %108 : vector<8x128xi32> to vector<8x128xf32>
    %110 = arith.mulf %109, %104 : vector<8x128xf32>
    %111 = arith.subf %99, %110 : vector<8x128xf32>
    %c0_74 = arith.constant 0 : index
    %c0_75 = arith.constant 0 : index
    %112 = vector.load %arg25[%c0_74, %c0_75] : memref<8x128xf32, #tpu.memory_space<vmem>>, vector<8x128xf32>
    tpu.vector_store %arg25[%c0_74, %c0_75], %111 {strides = array<i32>} : memref<8x128xf32, #tpu.memory_space<vmem>>, vector<8x128xf32>,
    %113 = vector.broadcast %15 : vector<1x128xf32> to vector<8x128xf32>
    %114 = arith.mulf %113, %100 : vector<8x128xf32>
    %115 = vector.broadcast %23 : vector<1x128xf32> to vector<8x128xf32>
    %116 = arith.mulf %115, %109 : vector<8x128xf32>
    %117 = arith.addf %114, %116 : vector<8x128xf32>
    %c0_76 = arith.constant 0 : index
    %c0_77 = arith.constant 0 : index
    %118 = vector.load %arg26[%c0_76, %c0_77] : memref<8x128xf32, #tpu.memory_space<vmem>>, vector<8x128xf32>
    tpu.vector_store %arg26[%c0_76, %c0_77], %117 {strides = array<i32>} : memref<8x128xf32, #tpu.memory_space<vmem>>, vector<8x128xf32>,
    %119 = vector.broadcast %24 : vector<1x128xf32> to vector<8x128xf32>
    %120 = arith.mulf %109, %119 : vector<8x128xf32>
    %c0_78 = arith.constant 0 : index
    %c0_79 = arith.constant 0 : index
    %121 = vector.load %arg27[%c0_78, %c0_79] : memref<8x128xf32, #tpu.memory_space<vmem>>, vector<8x128xf32>
    tpu.vector_store %arg27[%c0_78, %c0_79], %120 {strides = array<i32>} : memref<8x128xf32, #tpu.memory_space<vmem>>, vector<8x128xf32>,
    %c0_80 = arith.constant 0 : index
    %c0_81 = arith.constant 0 : index
    %122 = vector.load %arg16[%c0_80, %c0_81] : memref<128x128xf32, #tpu.memory_space<vmem>>, vector<128x128xf32>
    %cst_82 = arith.constant dense<0.000000e+00> : vector<8x128xf32>
    %123 = tpu.matmul %120, %122, %cst_82 {dimension_numbers = #tpu.dot_dimension_numbers<[1], [0], [0], [1], [0, 0, 1, 1], [], []>} : vector<8x128xf32>, vector<128x128xf32>, vector<8x128xf32> -> vector<8x128xf32>
    %124 = vector.broadcast %27 : vector<1x128xf32> to vector<8x128xf32>
    %125 = arith.addf %123, %124 : vector<8x128xf32>
    %c0_83 = arith.constant 0 : index
    %c0_84 = arith.constant 0 : index
    %126 = vector.load %arg28[%c0_83, %c0_84] : memref<8x128xf32, #tpu.memory_space<vmem>>, vector<8x128xf32>
    %127 = vector.broadcast %25 : vector<1x128xf32> to vector<8x128xf32>
    %128 = arith.mulf %126, %127 : vector<8x128xf32>
    %129 = vector.broadcast %31 : vector<1x128xf32> to vector<8x128xf32>
    %130 = arith.mulf %129, %125 : vector<8x128xf32>
    %131 = arith.addf %128, %130 : vector<8x128xf32>
    %c0_85 = arith.constant 0 : index
    %c0_86 = arith.constant 0 : index
    %132 = vector.load %arg29[%c0_85, %c0_86] : memref<8x128xf32, #tpu.memory_space<vmem>>, vector<8x128xf32>
    %cst_87 = arith.constant 1.800000e+00 : f32
    %133 = vector.broadcast %cst_87 : f32 to vector<8x128xf32>
    %134 = arith.mulf %133, %132 : vector<8x128xf32>
    %cst_88 = arith.constant 0.00999999977 : f32
    %135 = vector.broadcast %cst_88 : f32 to vector<8x128xf32>
    %136 = arith.addf %135, %134 : vector<8x128xf32>
    %137 = arith.subf %131, %136 : vector<8x128xf32>
    %cst_89 = arith.constant 0.000000e+00 : f32
    %138 = vector.broadcast %cst_89 : f32 to vector<8x128xf32>
    %139 = arith.cmpf oge, %137, %138 : vector<8x128xf32>
    %140 = arith.extui %139 : vector<8x128xi1> to vector<8x128xi32>
    %141 = arith.sitofp %140 : vector<8x128xi32> to vector<8x128xf32>
    %142 = arith.mulf %141, %136 : vector<8x128xf32>
    %143 = arith.subf %131, %142 : vector<8x128xf32>
    %c0_90 = arith.constant 0 : index
    %c0_91 = arith.constant 0 : index
    %144 = vector.load %arg28[%c0_90, %c0_91] : memref<8x128xf32, #tpu.memory_space<vmem>>, vector<8x128xf32>
    tpu.vector_store %arg28[%c0_90, %c0_91], %143 {strides = array<i32>} : memref<8x128xf32, #tpu.memory_space<vmem>>, vector<8x128xf32>,
    %145 = vector.broadcast %26 : vector<1x128xf32> to vector<8x128xf32>
    %146 = arith.mulf %145, %132 : vector<8x128xf32>
    %147 = vector.broadcast %33 : vector<1x128xf32> to vector<8x128xf32>
    %148 = arith.mulf %147, %141 : vector<8x128xf32>
    %149 = arith.addf %146, %148 : vector<8x128xf32>
    %c0_92 = arith.constant 0 : index
    %c0_93 = arith.constant 0 : index
    %150 = vector.load %arg29[%c0_92, %c0_93] : memref<8x128xf32, #tpu.memory_space<vmem>>, vector<8x128xf32>
    tpu.vector_store %arg29[%c0_92, %c0_93], %149 {strides = array<i32>} : memref<8x128xf32, #tpu.memory_space<vmem>>, vector<8x128xf32>,
    %151 = arith.index_cast %c0_i32_34 : i32 to index
    %c0_94 = arith.constant 0 : index
    %c0_95 = arith.constant 0 : index
    %152 = vector.load %arg20[%151, %c0_94, %c0_95] : memref<8x8x128xf32, #tpu.memory_space<vmem>>, vector<1x8x128xf32>
    %153 = vector.shape_cast %152 : vector<1x8x128xf32> to vector<8x128xf32>
    %154 = vector.shape_cast %141 : vector<8x128xf32> to vector<1x8x128xf32>
    tpu.vector_store %arg20[%151, %c0_94, %c0_95], %154 {strides = array<i32>} : memref<8x8x128xf32, #tpu.memory_space<vmem>>, vector<1x8x128xf32>,
    %155 = arith.index_cast %c0_i32_34 : i32 to index
    %c0_96 = arith.constant 0 : index
    %c0_97 = arith.constant 0 : index
    %156 = vector.load %arg21[%155, %c0_96, %c0_97] : memref<8x8x128xf32, #tpu.memory_space<vmem>>, vector<1x8x128xf32>
    %157 = vector.shape_cast %156 : vector<1x8x128xf32> to vector<8x128xf32>
    %158 = vector.shape_cast %125 : vector<8x128xf32> to vector<1x8x128xf32>
    tpu.vector_store %arg21[%155, %c0_96, %c0_97], %158 {strides = array<i32>} : memref<8x8x128xf32, #tpu.memory_space<vmem>>, vector<1x8x128xf32>,
    %c1_i32 = arith.constant 1 : i32
    %c8_i32_98 = arith.constant 8 : i32
    %159 = arith.muli %arg0, %c8_i32_98 : i32
    %160 = arith.addi %159, %c1_i32 : i32
    %c0_i32_99 = arith.constant 0 : i32
    %161 = arith.cmpi sgt, %160, %c0_i32_99 : i32
    %162 = arith.extui %161 : i1 to i32
    %163 = arith.sitofp %162 : i32 to f32
    %164 = arith.index_cast %c1_i32 : i32 to index
    %c0_100 = arith.constant 0 : index
    %c0_101 = arith.constant 0 : index
    %165 = vector.load %arg1[%164, %c0_100, %c0_101] : memref<8x8x16xf32, #tpu.memory_space<vmem>>, vector<1x8x16xf32>
    %166 = vector.shape_cast %165 : vector<1x8x16xf32> to vector<8x16xf32>
    %c0_102 = arith.constant 0 : index
    %c0_103 = arith.constant 0 : index
    %167 = vector.load %arg2[%c0_102, %c0_103] : memref<16x128xf32, #tpu.memory_space<vmem>>, vector<16x128xf32>
    %cst_104 = arith.constant dense<0.000000e+00> : vector<8x128xf32>
    %168 = tpu.matmul %166, %167, %cst_104 {dimension_numbers = #tpu.dot_dimension_numbers<[1], [0], [0], [1], [0, 0, 1, 1], [], []>} : vector<8x16xf32>, vector<16x128xf32>, vector<8x128xf32> -> vector<8x128xf32>
    %169 = vector.broadcast %5 : vector<1x128xf32> to vector<8x128xf32>
    %170 = arith.addf %168, %169 : vector<8x128xf32>
    %c0_105 = arith.constant 0 : index
    %c0_106 = arith.constant 0 : index
    %171 = vector.load %arg24[%c0_105, %c0_106] : memref<8x128xf32, #tpu.memory_space<vmem>>, vector<8x128xf32>
    %c0_107 = arith.constant 0 : index
    %c0_108 = arith.constant 0 : index
    %172 = vector.load %arg4[%c0_107, %c0_108] : memref<128x128xf32, #tpu.memory_space<vmem>>, vector<128x128xf32>
    %cst_109 = arith.constant dense<0.000000e+00> : vector<8x128xf32>
    %173 = tpu.matmul %171, %172, %cst_109 {dimension_numbers = #tpu.dot_dimension_numbers<[1], [0], [0], [1], [0, 0, 1, 1], [], []>} : vector<8x128xf32>, vector<128x128xf32>, vector<8x128xf32> -> vector<8x128xf32>
    %174 = arith.addf %170, %173 : vector<8x128xf32>
    %175 = vector.broadcast %163 : f32 to vector<1x128xf32>
    %176 = arith.mulf %175, %6 : vector<1x128xf32>
    %177 = vector.broadcast %176 : vector<1x128xf32> to vector<8x128xf32>
    %178 = arith.addf %174, %177 : vector<8x128xf32>
    %c0_110 = arith.constant 0 : index
    %c0_111 = arith.constant 0 : index
    %179 = vector.load %arg22[%c0_110, %c0_111] : memref<8x128xf32, #tpu.memory_space<vmem>>, vector<8x128xf32>
    %180 = vector.broadcast %3 : vector<1x128xf32> to vector<8x128xf32>
    %181 = arith.mulf %179, %180 : vector<8x128xf32>
    %182 = vector.broadcast %10 : vector<1x128xf32> to vector<8x128xf32>
    %183 = arith.mulf %182, %178 : vector<8x128xf32>
    %184 = arith.addf %181, %183 : vector<8x128xf32>
    %c0_112 = arith.constant 0 : index
    %c0_113 = arith.constant 0 : index
    %185 = vector.load %arg23[%c0_112, %c0_113] : memref<8x128xf32, #tpu.memory_space<vmem>>, vector<8x128xf32>
    %cst_114 = arith.constant 1.800000e+00 : f32
    %186 = vector.broadcast %cst_114 : f32 to vector<8x128xf32>
    %187 = arith.mulf %186, %185 : vector<8x128xf32>
    %cst_115 = arith.constant 0.00999999977 : f32
    %188 = vector.broadcast %cst_115 : f32 to vector<8x128xf32>
    %189 = arith.addf %188, %187 : vector<8x128xf32>
    %190 = arith.subf %184, %189 : vector<8x128xf32>
    %cst_116 = arith.constant 0.000000e+00 : f32
    %191 = vector.broadcast %cst_116 : f32 to vector<8x128xf32>
    %192 = arith.cmpf oge, %190, %191 : vector<8x128xf32>
    %193 = arith.extui %192 : vector<8x128xi1> to vector<8x128xi32>
    %194 = arith.sitofp %193 : vector<8x128xi32> to vector<8x128xf32>
    %195 = arith.mulf %194, %189 : vector<8x128xf32>
    %196 = arith.subf %184, %195 : vector<8x128xf32>
    %c0_117 = arith.constant 0 : index
    %c0_118 = arith.constant 0 : index
    %197 = vector.load %arg22[%c0_117, %c0_118] : memref<8x128xf32, #tpu.memory_space<vmem>>, vector<8x128xf32>
    tpu.vector_store %arg22[%c0_117, %c0_118], %196 {strides = array<i32>} : memref<8x128xf32, #tpu.memory_space<vmem>>, vector<8x128xf32>,
    %198 = vector.broadcast %4 : vector<1x128xf32> to vector<8x128xf32>
    %199 = arith.mulf %198, %185 : vector<8x128xf32>
    %200 = vector.broadcast %12 : vector<1x128xf32> to vector<8x128xf32>
    %201 = arith.mulf %200, %194 : vector<8x128xf32>
    %202 = arith.addf %199, %201 : vector<8x128xf32>
    %c0_119 = arith.constant 0 : index
    %c0_120 = arith.constant 0 : index
    %203 = vector.load %arg23[%c0_119, %c0_120] : memref<8x128xf32, #tpu.memory_space<vmem>>, vector<8x128xf32>
    tpu.vector_store %arg23[%c0_119, %c0_120], %202 {strides = array<i32>} : memref<8x128xf32, #tpu.memory_space<vmem>>, vector<8x128xf32>,
    %204 = vector.broadcast %13 : vector<1x128xf32> to vector<8x128xf32>
    %205 = arith.mulf %194, %204 : vector<8x128xf32>
    %c0_121 = arith.constant 0 : index
    %c0_122 = arith.constant 0 : index
    %206 = vector.load %arg24[%c0_121, %c0_122] : memref<8x128xf32, #tpu.memory_space<vmem>>, vector<8x128xf32>
    tpu.vector_store %arg24[%c0_121, %c0_122], %205 {strides = array<i32>} : memref<8x128xf32, #tpu.memory_space<vmem>>, vector<8x128xf32>,
    %c0_123 = arith.constant 0 : index
    %c0_124 = arith.constant 0 : index
    %207 = vector.load %arg9[%c0_123, %c0_124] : memref<128x128xf32, #tpu.memory_space<vmem>>, vector<128x128xf32>
    %cst_125 = arith.constant dense<0.000000e+00> : vector<8x128xf32>
    %208 = tpu.matmul %205, %207, %cst_125 {dimension_numbers = #tpu.dot_dimension_numbers<[1], [0], [0], [1], [0, 0, 1, 1], [], []>} : vector<8x128xf32>, vector<128x128xf32>, vector<8x128xf32> -> vector<8x128xf32>
    %209 = vector.broadcast %16 : vector<1x128xf32> to vector<8x128xf32>
    %210 = arith.addf %208, %209 : vector<8x128xf32>
    %c0_126 = arith.constant 0 : index
    %c0_127 = arith.constant 0 : index
    %211 = vector.load %arg27[%c0_126, %c0_127] : memref<8x128xf32, #tpu.memory_space<vmem>>, vector<8x128xf32>
    %c0_128 = arith.constant 0 : index
    %c0_129 = arith.constant 0 : index
    %212 = vector.load %arg11[%c0_128, %c0_129] : memref<128x128xf32, #tpu.memory_space<vmem>>, vector<128x128xf32>
    %cst_130 = arith.constant dense<0.000000e+00> : vector<8x128xf32>
    %213 = tpu.matmul %211, %212, %cst_130 {dimension_numbers = #tpu.dot_dimension_numbers<[1], [0], [0], [1], [0, 0, 1, 1], [], []>} : vector<8x128xf32>, vector<128x128xf32>, vector<8x128xf32> -> vector<8x128xf32>
    %214 = arith.addf %210, %213 : vector<8x128xf32>
    %215 = vector.broadcast %163 : f32 to vector<1x128xf32>
    %216 = arith.mulf %215, %17 : vector<1x128xf32>
    %217 = vector.broadcast %216 : vector<1x128xf32> to vector<8x128xf32>
    %218 = arith.addf %214, %217 : vector<8x128xf32>
    %c0_131 = arith.constant 0 : index
    %c0_132 = arith.constant 0 : index
    %219 = vector.load %arg25[%c0_131, %c0_132] : memref<8x128xf32, #tpu.memory_space<vmem>>, vector<8x128xf32>
    %220 = vector.broadcast %14 : vector<1x128xf32> to vector<8x128xf32>
    %221 = arith.mulf %219, %220 : vector<8x128xf32>
    %222 = vector.broadcast %21 : vector<1x128xf32> to vector<8x128xf32>
    %223 = arith.mulf %222, %218 : vector<8x128xf32>
    %224 = arith.addf %221, %223 : vector<8x128xf32>
    %c0_133 = arith.constant 0 : index
    %c0_134 = arith.constant 0 : index
    %225 = vector.load %arg26[%c0_133, %c0_134] : memref<8x128xf32, #tpu.memory_space<vmem>>, vector<8x128xf32>
    %cst_135 = arith.constant 1.800000e+00 : f32
    %226 = vector.broadcast %cst_135 : f32 to vector<8x128xf32>
    %227 = arith.mulf %226, %225 : vector<8x128xf32>
    %cst_136 = arith.constant 0.00999999977 : f32
    %228 = vector.broadcast %cst_136 : f32 to vector<8x128xf32>
    %229 = arith.addf %228, %227 : vector<8x128xf32>
    %230 = arith.subf %224, %229 : vector<8x128xf32>
    %cst_137 = arith.constant 0.000000e+00 : f32
    %231 = vector.broadcast %cst_137 : f32 to vector<8x128xf32>
    %232 = arith.cmpf oge, %230, %231 : vector<8x128xf32>
    %233 = arith.extui %232 : vector<8x128xi1> to vector<8x128xi32>
    %234 = arith.sitofp %233 : vector<8x128xi32> to vector<8x128xf32>
    %235 = arith.mulf %234, %229 : vector<8x128xf32>
    %236 = arith.subf %224, %235 : vector<8x128xf32>
    %c0_138 = arith.constant 0 : index
    %c0_139 = arith.constant 0 : index
    %237 = vector.load %arg25[%c0_138, %c0_139] : memref<8x128xf32, #tpu.memory_space<vmem>>, vector<8x128xf32>
    tpu.vector_store %arg25[%c0_138, %c0_139], %236 {strides = array<i32>} : memref<8x128xf32, #tpu.memory_space<vmem>>, vector<8x128xf32>,
    %238 = vector.broadcast %15 : vector<1x128xf32> to vector<8x128xf32>
    %239 = arith.mulf %238, %225 : vector<8x128xf32>
    %240 = vector.broadcast %23 : vector<1x128xf32> to vector<8x128xf32>
    %241 = arith.mulf %240, %234 : vector<8x128xf32>
    %242 = arith.addf %239, %241 : vector<8x128xf32>
    %c0_140 = arith.constant 0 : index
    %c0_141 = arith.constant 0 : index
    %243 = vector.load %arg26[%c0_140, %c0_141] : memref<8x128xf32, #tpu.memory_space<vmem>>, vector<8x128xf32>
    tpu.vector_store %arg26[%c0_140, %c0_141], %242 {strides = array<i32>} : memref<8x128xf32, #tpu.memory_space<vmem>>, vector<8x128xf32>,
    %244 = vector.broadcast %24 : vector<1x128xf32> to vector<8x128xf32>
    %245 = arith.mulf %234, %244 : vector<8x128xf32>
    %c0_142 = arith.constant 0 : index
    %c0_143 = arith.constant 0 : index
    %246 = vector.load %arg27[%c0_142, %c0_143] : memref<8x128xf32, #tpu.memory_space<vmem>>, vector<8x128xf32>
    tpu.vector_store %arg27[%c0_142, %c0_143], %245 {strides = array<i32>} : memref<8x128xf32, #tpu.memory_space<vmem>>, vector<8x128xf32>,
    %c0_144 = arith.constant 0 : index
    %c0_145 = arith.constant 0 : index
    %247 = vector.load %arg16[%c0_144, %c0_145] : memref<128x128xf32, #tpu.memory_space<vmem>>, vector<128x128xf32>
    %cst_146 = arith.constant dense<0.000000e+00> : vector<8x128xf32>
    %248 = tpu.matmul %245, %247, %cst_146 {dimension_numbers = #tpu.dot_dimension_numbers<[1], [0], [0], [1], [0, 0, 1, 1], [], []>} : vector<8x128xf32>, vector<128x128xf32>, vector<8x128xf32> -> vector<8x128xf32>
    %249 = vector.broadcast %27 : vector<1x128xf32> to vector<8x128xf32>
    %250 = arith.addf %248, %249 : vector<8x128xf32>
    %c0_147 = arith.constant 0 : index
    %c0_148 = arith.constant 0 : index
    %251 = vector.load %arg28[%c0_147, %c0_148] : memref<8x128xf32, #tpu.memory_space<vmem>>, vector<8x128xf32>
    %252 = vector.broadcast %25 : vector<1x128xf32> to vector<8x128xf32>
    %253 = arith.mulf %251, %252 : vector<8x128xf32>
    %254 = vector.broadcast %31 : vector<1x128xf32> to vector<8x128xf32>
    %255 = arith.mulf %254, %250 : vector<8x128xf32>
    %256 = arith.addf %253, %255 : vector<8x128xf32>
    %c0_149 = arith.constant 0 : index
    %c0_150 = arith.constant 0 : index
    %257 = vector.load %arg29[%c0_149, %c0_150] : memref<8x128xf32, #tpu.memory_space<vmem>>, vector<8x128xf32>
    %cst_151 = arith.constant 1.800000e+00 : f32
    %258 = vector.broadcast %cst_151 : f32 to vector<8x128xf32>
    %259 = arith.mulf %258, %257 : vector<8x128xf32>
    %cst_152 = arith.constant 0.00999999977 : f32
    %260 = vector.broadcast %cst_152 : f32 to vector<8x128xf32>
    %261 = arith.addf %260, %259 : vector<8x128xf32>
    %262 = arith.subf %256, %261 : vector<8x128xf32>
    %cst_153 = arith.constant 0.000000e+00 : f32
    %263 = vector.broadcast %cst_153 : f32 to vector<8x128xf32>
    %264 = arith.cmpf oge, %262, %263 : vector<8x128xf32>
    %265 = arith.extui %264 : vector<8x128xi1> to vector<8x128xi32>
    %266 = arith.sitofp %265 : vector<8x128xi32> to vector<8x128xf32>
    %267 = arith.mulf %266, %261 : vector<8x128xf32>
    %268 = arith.subf %256, %267 : vector<8x128xf32>
    %c0_154 = arith.constant 0 : index
    %c0_155 = arith.constant 0 : index
    %269 = vector.load %arg28[%c0_154, %c0_155] : memref<8x128xf32, #tpu.memory_space<vmem>>, vector<8x128xf32>
    tpu.vector_store %arg28[%c0_154, %c0_155], %268 {strides = array<i32>} : memref<8x128xf32, #tpu.memory_space<vmem>>, vector<8x128xf32>,
    %270 = vector.broadcast %26 : vector<1x128xf32> to vector<8x128xf32>
    %271 = arith.mulf %270, %257 : vector<8x128xf32>
    %272 = vector.broadcast %33 : vector<1x128xf32> to vector<8x128xf32>
    %273 = arith.mulf %272, %266 : vector<8x128xf32>
    %274 = arith.addf %271, %273 : vector<8x128xf32>
    %c0_156 = arith.constant 0 : index
    %c0_157 = arith.constant 0 : index
    %275 = vector.load %arg29[%c0_156, %c0_157] : memref<8x128xf32, #tpu.memory_space<vmem>>, vector<8x128xf32>
    tpu.vector_store %arg29[%c0_156, %c0_157], %274 {strides = array<i32>} : memref<8x128xf32, #tpu.memory_space<vmem>>, vector<8x128xf32>,
    %276 = arith.index_cast %c1_i32 : i32 to index
    %c0_158 = arith.constant 0 : index
    %c0_159 = arith.constant 0 : index
    %277 = vector.load %arg20[%276, %c0_158, %c0_159] : memref<8x8x128xf32, #tpu.memory_space<vmem>>, vector<1x8x128xf32>
    %278 = vector.shape_cast %277 : vector<1x8x128xf32> to vector<8x128xf32>
    %279 = vector.shape_cast %266 : vector<8x128xf32> to vector<1x8x128xf32>
    tpu.vector_store %arg20[%276, %c0_158, %c0_159], %279 {strides = array<i32>} : memref<8x8x128xf32, #tpu.memory_space<vmem>>, vector<1x8x128xf32>,
    %280 = arith.index_cast %c1_i32 : i32 to index
    %c0_160 = arith.constant 0 : index
    %c0_161 = arith.constant 0 : index
    %281 = vector.load %arg21[%280, %c0_160, %c0_161] : memref<8x8x128xf32, #tpu.memory_space<vmem>>, vector<1x8x128xf32>
    %282 = vector.shape_cast %281 : vector<1x8x128xf32> to vector<8x128xf32>
    %283 = vector.shape_cast %250 : vector<8x128xf32> to vector<1x8x128xf32>
    tpu.vector_store %arg21[%280, %c0_160, %c0_161], %283 {strides = array<i32>} : memref<8x8x128xf32, #tpu.memory_space<vmem>>, vector<1x8x128xf32>,
    %c2_i32 = arith.constant 2 : i32
    %c8_i32_162 = arith.constant 8 : i32
    %284 = arith.muli %arg0, %c8_i32_162 : i32
    %285 = arith.addi %284, %c2_i32 : i32
    %c0_i32_163 = arith.constant 0 : i32
    %286 = arith.cmpi sgt, %285, %c0_i32_163 : i32
    %287 = arith.extui %286 : i1 to i32
    %288 = arith.sitofp %287 : i32 to f32
    %289 = arith.index_cast %c2_i32 : i32 to index
    %c0_164 = arith.constant 0 : index
    %c0_165 = arith.constant 0 : index
    %290 = vector.load %arg1[%289, %c0_164, %c0_165] : memref<8x8x16xf32, #tpu.memory_space<vmem>>, vector<1x8x16xf32>
    %291 = vector.shape_cast %290 : vector<1x8x16xf32> to vector<8x16xf32>
    %c0_166 = arith.constant 0 : index
    %c0_167 = arith.constant 0 : index
    %292 = vector.load %arg2[%c0_166, %c0_167] : memref<16x128xf32, #tpu.memory_space<vmem>>, vector<16x128xf32>
    %cst_168 = arith.constant dense<0.000000e+00> : vector<8x128xf32>
    %293 = tpu.matmul %291, %292, %cst_168 {dimension_numbers = #tpu.dot_dimension_numbers<[1], [0], [0], [1], [0, 0, 1, 1], [], []>} : vector<8x16xf32>, vector<16x128xf32>, vector<8x128xf32> -> vector<8x128xf32>
    %294 = vector.broadcast %5 : vector<1x128xf32> to vector<8x128xf32>
    %295 = arith.addf %293, %294 : vector<8x128xf32>
    %c0_169 = arith.constant 0 : index
    %c0_170 = arith.constant 0 : index
    %296 = vector.load %arg24[%c0_169, %c0_170] : memref<8x128xf32, #tpu.memory_space<vmem>>, vector<8x128xf32>
    %c0_171 = arith.constant 0 : index
    %c0_172 = arith.constant 0 : index
    %297 = vector.load %arg4[%c0_171, %c0_172] : memref<128x128xf32, #tpu.memory_space<vmem>>, vector<128x128xf32>
    %cst_173 = arith.constant dense<0.000000e+00> : vector<8x128xf32>
    %298 = tpu.matmul %296, %297, %cst_173 {dimension_numbers = #tpu.dot_dimension_numbers<[1], [0], [0], [1], [0, 0, 1, 1], [], []>} : vector<8x128xf32>, vector<128x128xf32>, vector<8x128xf32> -> vector<8x128xf32>
    %299 = arith.addf %295, %298 : vector<8x128xf32>
    %300 = vector.broadcast %288 : f32 to vector<1x128xf32>
    %301 = arith.mulf %300, %6 : vector<1x128xf32>
    %302 = vector.broadcast %301 : vector<1x128xf32> to vector<8x128xf32>
    %303 = arith.addf %299, %302 : vector<8x128xf32>
    %c0_174 = arith.constant 0 : index
    %c0_175 = arith.constant 0 : index
    %304 = vector.load %arg22[%c0_174, %c0_175] : memref<8x128xf32, #tpu.memory_space<vmem>>, vector<8x128xf32>
    %305 = vector.broadcast %3 : vector<1x128xf32> to vector<8x128xf32>
    %306 = arith.mulf %304, %305 : vector<8x128xf32>
    %307 = vector.broadcast %10 : vector<1x128xf32> to vector<8x128xf32>
    %308 = arith.mulf %307, %303 : vector<8x128xf32>
    %309 = arith.addf %306, %308 : vector<8x128xf32>
    %c0_176 = arith.constant 0 : index
    %c0_177 = arith.constant 0 : index
    %310 = vector.load %arg23[%c0_176, %c0_177] : memref<8x128xf32, #tpu.memory_space<vmem>>, vector<8x128xf32>
    %cst_178 = arith.constant 1.800000e+00 : f32
    %311 = vector.broadcast %cst_178 : f32 to vector<8x128xf32>
    %312 = arith.mulf %311, %310 : vector<8x128xf32>
    %cst_179 = arith.constant 0.00999999977 : f32
    %313 = vector.broadcast %cst_179 : f32 to vector<8x128xf32>
    %314 = arith.addf %313, %312 : vector<8x128xf32>
    %315 = arith.subf %309, %314 : vector<8x128xf32>
    %cst_180 = arith.constant 0.000000e+00 : f32
    %316 = vector.broadcast %cst_180 : f32 to vector<8x128xf32>
    %317 = arith.cmpf oge, %315, %316 : vector<8x128xf32>
    %318 = arith.extui %317 : vector<8x128xi1> to vector<8x128xi32>
    %319 = arith.sitofp %318 : vector<8x128xi32> to vector<8x128xf32>
    %320 = arith.mulf %319, %314 : vector<8x128xf32>
    %321 = arith.subf %309, %320 : vector<8x128xf32>
    %c0_181 = arith.constant 0 : index
    %c0_182 = arith.constant 0 : index
    %322 = vector.load %arg22[%c0_181, %c0_182] : memref<8x128xf32, #tpu.memory_space<vmem>>, vector<8x128xf32>
    tpu.vector_store %arg22[%c0_181, %c0_182], %321 {strides = array<i32>} : memref<8x128xf32, #tpu.memory_space<vmem>>, vector<8x128xf32>,
    %323 = vector.broadcast %4 : vector<1x128xf32> to vector<8x128xf32>
    %324 = arith.mulf %323, %310 : vector<8x128xf32>
    %325 = vector.broadcast %12 : vector<1x128xf32> to vector<8x128xf32>
    %326 = arith.mulf %325, %319 : vector<8x128xf32>
    %327 = arith.addf %324, %326 : vector<8x128xf32>
    %c0_183 = arith.constant 0 : index
    %c0_184 = arith.constant 0 : index
    %328 = vector.load %arg23[%c0_183, %c0_184] : memref<8x128xf32, #tpu.memory_space<vmem>>, vector<8x128xf32>
    tpu.vector_store %arg23[%c0_183, %c0_184], %327 {strides = array<i32>} : memref<8x128xf32, #tpu.memory_space<vmem>>, vector<8x128xf32>,
    %329 = vector.broadcast %13 : vector<1x128xf32> to vector<8x128xf32>
    %330 = arith.mulf %319, %329 : vector<8x128xf32>
    %c0_185 = arith.constant 0 : index
    %c0_186 = arith.constant 0 : index
    %331 = vector.load %arg24[%c0_185, %c0_186] : memref<8x128xf32, #tpu.memory_space<vmem>>, vector<8x128xf32>
    tpu.vector_store %arg24[%c0_185, %c0_186], %330 {strides = array<i32>} : memref<8x128xf32, #tpu.memory_space<vmem>>, vector<8x128xf32>,
    %c0_187 = arith.constant 0 : index
    %c0_188 = arith.constant 0 : index
    %332 = vector.load %arg9[%c0_187, %c0_188] : memref<128x128xf32, #tpu.memory_space<vmem>>, vector<128x128xf32>
    %cst_189 = arith.constant dense<0.000000e+00> : vector<8x128xf32>
    %333 = tpu.matmul %330, %332, %cst_189 {dimension_numbers = #tpu.dot_dimension_numbers<[1], [0], [0], [1], [0, 0, 1, 1], [], []>} : vector<8x128xf32>, vector<128x128xf32>, vector<8x128xf32> -> vector<8x128xf32>
    %334 = vector.broadcast %16 : vector<1x128xf32> to vector<8x128xf32>
    %335 = arith.addf %333, %334 : vector<8x128xf32>
    %c0_190 = arith.constant 0 : index
    %c0_191 = arith.constant 0 : index
    %336 = vector.load %arg27[%c0_190, %c0_191] : memref<8x128xf32, #tpu.memory_space<vmem>>, vector<8x128xf32>
    %c0_192 = arith.constant 0 : index
    %c0_193 = arith.constant 0 : index
    %337 = vector.load %arg11[%c0_192, %c0_193] : memref<128x128xf32, #tpu.memory_space<vmem>>, vector<128x128xf32>
    %cst_194 = arith.constant dense<0.000000e+00> : vector<8x128xf32>
    %338 = tpu.matmul %336, %337, %cst_194 {dimension_numbers = #tpu.dot_dimension_numbers<[1], [0], [0], [1], [0, 0, 1, 1], [], []>} : vector<8x128xf32>, vector<128x128xf32>, vector<8x128xf32> -> vector<8x128xf32>
    %339 = arith.addf %335, %338 : vector<8x128xf32>
    %340 = vector.broadcast %288 : f32 to vector<1x128xf32>
    %341 = arith.mulf %340, %17 : vector<1x128xf32>
    %342 = vector.broadcast %341 : vector<1x128xf32> to vector<8x128xf32>
    %343 = arith.addf %339, %342 : vector<8x128xf32>
    %c0_195 = arith.constant 0 : index
    %c0_196 = arith.constant 0 : index
    %344 = vector.load %arg25[%c0_195, %c0_196] : memref<8x128xf32, #tpu.memory_space<vmem>>, vector<8x128xf32>
    %345 = vector.broadcast %14 : vector<1x128xf32> to vector<8x128xf32>
    %346 = arith.mulf %344, %345 : vector<8x128xf32>
    %347 = vector.broadcast %21 : vector<1x128xf32> to vector<8x128xf32>
    %348 = arith.mulf %347, %343 : vector<8x128xf32>
    %349 = arith.addf %346, %348 : vector<8x128xf32>
    %c0_197 = arith.constant 0 : index
    %c0_198 = arith.constant 0 : index
    %350 = vector.load %arg26[%c0_197, %c0_198] : memref<8x128xf32, #tpu.memory_space<vmem>>, vector<8x128xf32>
    %cst_199 = arith.constant 1.800000e+00 : f32
    %351 = vector.broadcast %cst_199 : f32 to vector<8x128xf32>
    %352 = arith.mulf %351, %350 : vector<8x128xf32>
    %cst_200 = arith.constant 0.00999999977 : f32
    %353 = vector.broadcast %cst_200 : f32 to vector<8x128xf32>
    %354 = arith.addf %353, %352 : vector<8x128xf32>
    %355 = arith.subf %349, %354 : vector<8x128xf32>
    %cst_201 = arith.constant 0.000000e+00 : f32
    %356 = vector.broadcast %cst_201 : f32 to vector<8x128xf32>
    %357 = arith.cmpf oge, %355, %356 : vector<8x128xf32>
    %358 = arith.extui %357 : vector<8x128xi1> to vector<8x128xi32>
    %359 = arith.sitofp %358 : vector<8x128xi32> to vector<8x128xf32>
    %360 = arith.mulf %359, %354 : vector<8x128xf32>
    %361 = arith.subf %349, %360 : vector<8x128xf32>
    %c0_202 = arith.constant 0 : index
    %c0_203 = arith.constant 0 : index
    %362 = vector.load %arg25[%c0_202, %c0_203] : memref<8x128xf32, #tpu.memory_space<vmem>>, vector<8x128xf32>
    tpu.vector_store %arg25[%c0_202, %c0_203], %361 {strides = array<i32>} : memref<8x128xf32, #tpu.memory_space<vmem>>, vector<8x128xf32>,
    %363 = vector.broadcast %15 : vector<1x128xf32> to vector<8x128xf32>
    %364 = arith.mulf %363, %350 : vector<8x128xf32>
    %365 = vector.broadcast %23 : vector<1x128xf32> to vector<8x128xf32>
    %366 = arith.mulf %365, %359 : vector<8x128xf32>
    %367 = arith.addf %364, %366 : vector<8x128xf32>
    %c0_204 = arith.constant 0 : index
    %c0_205 = arith.constant 0 : index
    %368 = vector.load %arg26[%c0_204, %c0_205] : memref<8x128xf32, #tpu.memory_space<vmem>>, vector<8x128xf32>
    tpu.vector_store %arg26[%c0_204, %c0_205], %367 {strides = array<i32>} : memref<8x128xf32, #tpu.memory_space<vmem>>, vector<8x128xf32>,
    %369 = vector.broadcast %24 : vector<1x128xf32> to vector<8x128xf32>
    %370 = arith.mulf %359, %369 : vector<8x128xf32>
    %c0_206 = arith.constant 0 : index
    %c0_207 = arith.constant 0 : index
    %371 = vector.load %arg27[%c0_206, %c0_207] : memref<8x128xf32, #tpu.memory_space<vmem>>, vector<8x128xf32>
    tpu.vector_store %arg27[%c0_206, %c0_207], %370 {strides = array<i32>} : memref<8x128xf32, #tpu.memory_space<vmem>>, vector<8x128xf32>,
    %c0_208 = arith.constant 0 : index
    %c0_209 = arith.constant 0 : index
    %372 = vector.load %arg16[%c0_208, %c0_209] : memref<128x128xf32, #tpu.memory_space<vmem>>, vector<128x128xf32>
    %cst_210 = arith.constant dense<0.000000e+00> : vector<8x128xf32>
    %373 = tpu.matmul %370, %372, %cst_210 {dimension_numbers = #tpu.dot_dimension_numbers<[1], [0], [0], [1], [0, 0, 1, 1], [], []>} : vector<8x128xf32>, vector<128x128xf32>, vector<8x128xf32> -> vector<8x128xf32>
    %374 = vector.broadcast %27 : vector<1x128xf32> to vector<8x128xf32>
    %375 = arith.addf %373, %374 : vector<8x128xf32>
    %c0_211 = arith.constant 0 : index
    %c0_212 = arith.constant 0 : index
    %376 = vector.load %arg28[%c0_211, %c0_212] : memref<8x128xf32, #tpu.memory_space<vmem>>, vector<8x128xf32>
    %377 = vector.broadcast %25 : vector<1x128xf32> to vector<8x128xf32>
    %378 = arith.mulf %376, %377 : vector<8x128xf32>
    %379 = vector.broadcast %31 : vector<1x128xf32> to vector<8x128xf32>
    %380 = arith.mulf %379, %375 : vector<8x128xf32>
    %381 = arith.addf %378, %380 : vector<8x128xf32>
    %c0_213 = arith.constant 0 : index
    %c0_214 = arith.constant 0 : index
    %382 = vector.load %arg29[%c0_213, %c0_214] : memref<8x128xf32, #tpu.memory_space<vmem>>, vector<8x128xf32>
    %cst_215 = arith.constant 1.800000e+00 : f32
    %383 = vector.broadcast %cst_215 : f32 to vector<8x128xf32>
    %384 = arith.mulf %383, %382 : vector<8x128xf32>
    %cst_216 = arith.constant 0.00999999977 : f32
    %385 = vector.broadcast %cst_216 : f32 to vector<8x128xf32>
    %386 = arith.addf %385, %384 : vector<8x128xf32>
    %387 = arith.subf %381, %386 : vector<8x128xf32>
    %cst_217 = arith.constant 0.000000e+00 : f32
    %388 = vector.broadcast %cst_217 : f32 to vector<8x128xf32>
    %389 = arith.cmpf oge, %387, %388 : vector<8x128xf32>
    %390 = arith.extui %389 : vector<8x128xi1> to vector<8x128xi32>
    %391 = arith.sitofp %390 : vector<8x128xi32> to vector<8x128xf32>
    %392 = arith.mulf %391, %386 : vector<8x128xf32>
    %393 = arith.subf %381, %392 : vector<8x128xf32>
    %c0_218 = arith.constant 0 : index
    %c0_219 = arith.constant 0 : index
    %394 = vector.load %arg28[%c0_218, %c0_219] : memref<8x128xf32, #tpu.memory_space<vmem>>, vector<8x128xf32>
    tpu.vector_store %arg28[%c0_218, %c0_219], %393 {strides = array<i32>} : memref<8x128xf32, #tpu.memory_space<vmem>>, vector<8x128xf32>,
    %395 = vector.broadcast %26 : vector<1x128xf32> to vector<8x128xf32>
    %396 = arith.mulf %395, %382 : vector<8x128xf32>
    %397 = vector.broadcast %33 : vector<1x128xf32> to vector<8x128xf32>
    %398 = arith.mulf %397, %391 : vector<8x128xf32>
    %399 = arith.addf %396, %398 : vector<8x128xf32>
    %c0_220 = arith.constant 0 : index
    %c0_221 = arith.constant 0 : index
    %400 = vector.load %arg29[%c0_220, %c0_221] : memref<8x128xf32, #tpu.memory_space<vmem>>, vector<8x128xf32>
    tpu.vector_store %arg29[%c0_220, %c0_221], %399 {strides = array<i32>} : memref<8x128xf32, #tpu.memory_space<vmem>>, vector<8x128xf32>,
    %401 = arith.index_cast %c2_i32 : i32 to index
    %c0_222 = arith.constant 0 : index
    %c0_223 = arith.constant 0 : index
    %402 = vector.load %arg20[%401, %c0_222, %c0_223] : memref<8x8x128xf32, #tpu.memory_space<vmem>>, vector<1x8x128xf32>
    %403 = vector.shape_cast %402 : vector<1x8x128xf32> to vector<8x128xf32>
    %404 = vector.shape_cast %391 : vector<8x128xf32> to vector<1x8x128xf32>
    tpu.vector_store %arg20[%401, %c0_222, %c0_223], %404 {strides = array<i32>} : memref<8x8x128xf32, #tpu.memory_space<vmem>>, vector<1x8x128xf32>,
    %405 = arith.index_cast %c2_i32 : i32 to index
    %c0_224 = arith.constant 0 : index
    %c0_225 = arith.constant 0 : index
    %406 = vector.load %arg21[%405, %c0_224, %c0_225] : memref<8x8x128xf32, #tpu.memory_space<vmem>>, vector<1x8x128xf32>
    %407 = vector.shape_cast %406 : vector<1x8x128xf32> to vector<8x128xf32>
    %408 = vector.shape_cast %375 : vector<8x128xf32> to vector<1x8x128xf32>
    tpu.vector_store %arg21[%405, %c0_224, %c0_225], %408 {strides = array<i32>} : memref<8x8x128xf32, #tpu.memory_space<vmem>>, vector<1x8x128xf32>,
    %c3_i32 = arith.constant 3 : i32
    %c8_i32_226 = arith.constant 8 : i32
    %409 = arith.muli %arg0, %c8_i32_226 : i32
    %410 = arith.addi %409, %c3_i32 : i32
    %c0_i32_227 = arith.constant 0 : i32
    %411 = arith.cmpi sgt, %410, %c0_i32_227 : i32
    %412 = arith.extui %411 : i1 to i32
    %413 = arith.sitofp %412 : i32 to f32
    %414 = arith.index_cast %c3_i32 : i32 to index
    %c0_228 = arith.constant 0 : index
    %c0_229 = arith.constant 0 : index
    %415 = vector.load %arg1[%414, %c0_228, %c0_229] : memref<8x8x16xf32, #tpu.memory_space<vmem>>, vector<1x8x16xf32>
    %416 = vector.shape_cast %415 : vector<1x8x16xf32> to vector<8x16xf32>
    %c0_230 = arith.constant 0 : index
    %c0_231 = arith.constant 0 : index
    %417 = vector.load %arg2[%c0_230, %c0_231] : memref<16x128xf32, #tpu.memory_space<vmem>>, vector<16x128xf32>
    %cst_232 = arith.constant dense<0.000000e+00> : vector<8x128xf32>
    %418 = tpu.matmul %416, %417, %cst_232 {dimension_numbers = #tpu.dot_dimension_numbers<[1], [0], [0], [1], [0, 0, 1, 1], [], []>} : vector<8x16xf32>, vector<16x128xf32>, vector<8x128xf32> -> vector<8x128xf32>
    %419 = vector.broadcast %5 : vector<1x128xf32> to vector<8x128xf32>
    %420 = arith.addf %418, %419 : vector<8x128xf32>
    %c0_233 = arith.constant 0 : index
    %c0_234 = arith.constant 0 : index
    %421 = vector.load %arg24[%c0_233, %c0_234] : memref<8x128xf32, #tpu.memory_space<vmem>>, vector<8x128xf32>
    %c0_235 = arith.constant 0 : index
    %c0_236 = arith.constant 0 : index
    %422 = vector.load %arg4[%c0_235, %c0_236] : memref<128x128xf32, #tpu.memory_space<vmem>>, vector<128x128xf32>
    %cst_237 = arith.constant dense<0.000000e+00> : vector<8x128xf32>
    %423 = tpu.matmul %421, %422, %cst_237 {dimension_numbers = #tpu.dot_dimension_numbers<[1], [0], [0], [1], [0, 0, 1, 1], [], []>} : vector<8x128xf32>, vector<128x128xf32>, vector<8x128xf32> -> vector<8x128xf32>
    %424 = arith.addf %420, %423 : vector<8x128xf32>
    %425 = vector.broadcast %413 : f32 to vector<1x128xf32>
    %426 = arith.mulf %425, %6 : vector<1x128xf32>
    %427 = vector.broadcast %426 : vector<1x128xf32> to vector<8x128xf32>
    %428 = arith.addf %424, %427 : vector<8x128xf32>
    %c0_238 = arith.constant 0 : index
    %c0_239 = arith.constant 0 : index
    %429 = vector.load %arg22[%c0_238, %c0_239] : memref<8x128xf32, #tpu.memory_space<vmem>>, vector<8x128xf32>
    %430 = vector.broadcast %3 : vector<1x128xf32> to vector<8x128xf32>
    %431 = arith.mulf %429, %430 : vector<8x128xf32>
    %432 = vector.broadcast %10 : vector<1x128xf32> to vector<8x128xf32>
    %433 = arith.mulf %432, %428 : vector<8x128xf32>
    %434 = arith.addf %431, %433 : vector<8x128xf32>
    %c0_240 = arith.constant 0 : index
    %c0_241 = arith.constant 0 : index
    %435 = vector.load %arg23[%c0_240, %c0_241] : memref<8x128xf32, #tpu.memory_space<vmem>>, vector<8x128xf32>
    %cst_242 = arith.constant 1.800000e+00 : f32
    %436 = vector.broadcast %cst_242 : f32 to vector<8x128xf32>
    %437 = arith.mulf %436, %435 : vector<8x128xf32>
    %cst_243 = arith.constant 0.00999999977 : f32
    %438 = vector.broadcast %cst_243 : f32 to vector<8x128xf32>
    %439 = arith.addf %438, %437 : vector<8x128xf32>
    %440 = arith.subf %434, %439 : vector<8x128xf32>
    %cst_244 = arith.constant 0.000000e+00 : f32
    %441 = vector.broadcast %cst_244 : f32 to vector<8x128xf32>
    %442 = arith.cmpf oge, %440, %441 : vector<8x128xf32>
    %443 = arith.extui %442 : vector<8x128xi1> to vector<8x128xi32>
    %444 = arith.sitofp %443 : vector<8x128xi32> to vector<8x128xf32>
    %445 = arith.mulf %444, %439 : vector<8x128xf32>
    %446 = arith.subf %434, %445 : vector<8x128xf32>
    %c0_245 = arith.constant 0 : index
    %c0_246 = arith.constant 0 : index
    %447 = vector.load %arg22[%c0_245, %c0_246] : memref<8x128xf32, #tpu.memory_space<vmem>>, vector<8x128xf32>
    tpu.vector_store %arg22[%c0_245, %c0_246], %446 {strides = array<i32>} : memref<8x128xf32, #tpu.memory_space<vmem>>, vector<8x128xf32>,
    %448 = vector.broadcast %4 : vector<1x128xf32> to vector<8x128xf32>
    %449 = arith.mulf %448, %435 : vector<8x128xf32>
    %450 = vector.broadcast %12 : vector<1x128xf32> to vector<8x128xf32>
    %451 = arith.mulf %450, %444 : vector<8x128xf32>
    %452 = arith.addf %449, %451 : vector<8x128xf32>
    %c0_247 = arith.constant 0 : index
    %c0_248 = arith.constant 0 : index
    %453 = vector.load %arg23[%c0_247, %c0_248] : memref<8x128xf32, #tpu.memory_space<vmem>>, vector<8x128xf32>
    tpu.vector_store %arg23[%c0_247, %c0_248], %452 {strides = array<i32>} : memref<8x128xf32, #tpu.memory_space<vmem>>, vector<8x128xf32>,
    %454 = vector.broadcast %13 : vector<1x128xf32> to vector<8x128xf32>
    %455 = arith.mulf %444, %454 : vector<8x128xf32>
    %c0_249 = arith.constant 0 : index
    %c0_250 = arith.constant 0 : index
    %456 = vector.load %arg24[%c0_249, %c0_250] : memref<8x128xf32, #tpu.memory_space<vmem>>, vector<8x128xf32>
    tpu.vector_store %arg24[%c0_249, %c0_250], %455 {strides = array<i32>} : memref<8x128xf32, #tpu.memory_space<vmem>>, vector<8x128xf32>,
    %c0_251 = arith.constant 0 : index
    %c0_252 = arith.constant 0 : index
    %457 = vector.load %arg9[%c0_251, %c0_252] : memref<128x128xf32, #tpu.memory_space<vmem>>, vector<128x128xf32>
    %cst_253 = arith.constant dense<0.000000e+00> : vector<8x128xf32>
    %458 = tpu.matmul %455, %457, %cst_253 {dimension_numbers = #tpu.dot_dimension_numbers<[1], [0], [0], [1], [0, 0, 1, 1], [], []>} : vector<8x128xf32>, vector<128x128xf32>, vector<8x128xf32> -> vector<8x128xf32>
    %459 = vector.broadcast %16 : vector<1x128xf32> to vector<8x128xf32>
    %460 = arith.addf %458, %459 : vector<8x128xf32>
    %c0_254 = arith.constant 0 : index
    %c0_255 = arith.constant 0 : index
    %461 = vector.load %arg27[%c0_254, %c0_255] : memref<8x128xf32, #tpu.memory_space<vmem>>, vector<8x128xf32>
    %c0_256 = arith.constant 0 : index
    %c0_257 = arith.constant 0 : index
    %462 = vector.load %arg11[%c0_256, %c0_257] : memref<128x128xf32, #tpu.memory_space<vmem>>, vector<128x128xf32>
    %cst_258 = arith.constant dense<0.000000e+00> : vector<8x128xf32>
    %463 = tpu.matmul %461, %462, %cst_258 {dimension_numbers = #tpu.dot_dimension_numbers<[1], [0], [0], [1], [0, 0, 1, 1], [], []>} : vector<8x128xf32>, vector<128x128xf32>, vector<8x128xf32> -> vector<8x128xf32>
    %464 = arith.addf %460, %463 : vector<8x128xf32>
    %465 = vector.broadcast %413 : f32 to vector<1x128xf32>
    %466 = arith.mulf %465, %17 : vector<1x128xf32>
    %467 = vector.broadcast %466 : vector<1x128xf32> to vector<8x128xf32>
    %468 = arith.addf %464, %467 : vector<8x128xf32>
    %c0_259 = arith.constant 0 : index
    %c0_260 = arith.constant 0 : index
    %469 = vector.load %arg25[%c0_259, %c0_260] : memref<8x128xf32, #tpu.memory_space<vmem>>, vector<8x128xf32>
    %470 = vector.broadcast %14 : vector<1x128xf32> to vector<8x128xf32>
    %471 = arith.mulf %469, %470 : vector<8x128xf32>
    %472 = vector.broadcast %21 : vector<1x128xf32> to vector<8x128xf32>
    %473 = arith.mulf %472, %468 : vector<8x128xf32>
    %474 = arith.addf %471, %473 : vector<8x128xf32>
    %c0_261 = arith.constant 0 : index
    %c0_262 = arith.constant 0 : index
    %475 = vector.load %arg26[%c0_261, %c0_262] : memref<8x128xf32, #tpu.memory_space<vmem>>, vector<8x128xf32>
    %cst_263 = arith.constant 1.800000e+00 : f32
    %476 = vector.broadcast %cst_263 : f32 to vector<8x128xf32>
    %477 = arith.mulf %476, %475 : vector<8x128xf32>
    %cst_264 = arith.constant 0.00999999977 : f32
    %478 = vector.broadcast %cst_264 : f32 to vector<8x128xf32>
    %479 = arith.addf %478, %477 : vector<8x128xf32>
    %480 = arith.subf %474, %479 : vector<8x128xf32>
    %cst_265 = arith.constant 0.000000e+00 : f32
    %481 = vector.broadcast %cst_265 : f32 to vector<8x128xf32>
    %482 = arith.cmpf oge, %480, %481 : vector<8x128xf32>
    %483 = arith.extui %482 : vector<8x128xi1> to vector<8x128xi32>
    %484 = arith.sitofp %483 : vector<8x128xi32> to vector<8x128xf32>
    %485 = arith.mulf %484, %479 : vector<8x128xf32>
    %486 = arith.subf %474, %485 : vector<8x128xf32>
    %c0_266 = arith.constant 0 : index
    %c0_267 = arith.constant 0 : index
    %487 = vector.load %arg25[%c0_266, %c0_267] : memref<8x128xf32, #tpu.memory_space<vmem>>, vector<8x128xf32>
    tpu.vector_store %arg25[%c0_266, %c0_267], %486 {strides = array<i32>} : memref<8x128xf32, #tpu.memory_space<vmem>>, vector<8x128xf32>,
    %488 = vector.broadcast %15 : vector<1x128xf32> to vector<8x128xf32>
    %489 = arith.mulf %488, %475 : vector<8x128xf32>
    %490 = vector.broadcast %23 : vector<1x128xf32> to vector<8x128xf32>
    %491 = arith.mulf %490, %484 : vector<8x128xf32>
    %492 = arith.addf %489, %491 : vector<8x128xf32>
    %c0_268 = arith.constant 0 : index
    %c0_269 = arith.constant 0 : index
    %493 = vector.load %arg26[%c0_268, %c0_269] : memref<8x128xf32, #tpu.memory_space<vmem>>, vector<8x128xf32>
    tpu.vector_store %arg26[%c0_268, %c0_269], %492 {strides = array<i32>} : memref<8x128xf32, #tpu.memory_space<vmem>>, vector<8x128xf32>,
    %494 = vector.broadcast %24 : vector<1x128xf32> to vector<8x128xf32>
    %495 = arith.mulf %484, %494 : vector<8x128xf32>
    %c0_270 = arith.constant 0 : index
    %c0_271 = arith.constant 0 : index
    %496 = vector.load %arg27[%c0_270, %c0_271] : memref<8x128xf32, #tpu.memory_space<vmem>>, vector<8x128xf32>
    tpu.vector_store %arg27[%c0_270, %c0_271], %495 {strides = array<i32>} : memref<8x128xf32, #tpu.memory_space<vmem>>, vector<8x128xf32>,
    %c0_272 = arith.constant 0 : index
    %c0_273 = arith.constant 0 : index
    %497 = vector.load %arg16[%c0_272, %c0_273] : memref<128x128xf32, #tpu.memory_space<vmem>>, vector<128x128xf32>
    %cst_274 = arith.constant dense<0.000000e+00> : vector<8x128xf32>
    %498 = tpu.matmul %495, %497, %cst_274 {dimension_numbers = #tpu.dot_dimension_numbers<[1], [0], [0], [1], [0, 0, 1, 1], [], []>} : vector<8x128xf32>, vector<128x128xf32>, vector<8x128xf32> -> vector<8x128xf32>
    %499 = vector.broadcast %27 : vector<1x128xf32> to vector<8x128xf32>
    %500 = arith.addf %498, %499 : vector<8x128xf32>
    %c0_275 = arith.constant 0 : index
    %c0_276 = arith.constant 0 : index
    %501 = vector.load %arg28[%c0_275, %c0_276] : memref<8x128xf32, #tpu.memory_space<vmem>>, vector<8x128xf32>
    %502 = vector.broadcast %25 : vector<1x128xf32> to vector<8x128xf32>
    %503 = arith.mulf %501, %502 : vector<8x128xf32>
    %504 = vector.broadcast %31 : vector<1x128xf32> to vector<8x128xf32>
    %505 = arith.mulf %504, %500 : vector<8x128xf32>
    %506 = arith.addf %503, %505 : vector<8x128xf32>
    %c0_277 = arith.constant 0 : index
    %c0_278 = arith.constant 0 : index
    %507 = vector.load %arg29[%c0_277, %c0_278] : memref<8x128xf32, #tpu.memory_space<vmem>>, vector<8x128xf32>
    %cst_279 = arith.constant 1.800000e+00 : f32
    %508 = vector.broadcast %cst_279 : f32 to vector<8x128xf32>
    %509 = arith.mulf %508, %507 : vector<8x128xf32>
    %cst_280 = arith.constant 0.00999999977 : f32
    %510 = vector.broadcast %cst_280 : f32 to vector<8x128xf32>
    %511 = arith.addf %510, %509 : vector<8x128xf32>
    %512 = arith.subf %506, %511 : vector<8x128xf32>
    %cst_281 = arith.constant 0.000000e+00 : f32
    %513 = vector.broadcast %cst_281 : f32 to vector<8x128xf32>
    %514 = arith.cmpf oge, %512, %513 : vector<8x128xf32>
    %515 = arith.extui %514 : vector<8x128xi1> to vector<8x128xi32>
    %516 = arith.sitofp %515 : vector<8x128xi32> to vector<8x128xf32>
    %517 = arith.mulf %516, %511 : vector<8x128xf32>
    %518 = arith.subf %506, %517 : vector<8x128xf32>
    %c0_282 = arith.constant 0 : index
    %c0_283 = arith.constant 0 : index
    %519 = vector.load %arg28[%c0_282, %c0_283] : memref<8x128xf32, #tpu.memory_space<vmem>>, vector<8x128xf32>
    tpu.vector_store %arg28[%c0_282, %c0_283], %518 {strides = array<i32>} : memref<8x128xf32, #tpu.memory_space<vmem>>, vector<8x128xf32>,
    %520 = vector.broadcast %26 : vector<1x128xf32> to vector<8x128xf32>
    %521 = arith.mulf %520, %507 : vector<8x128xf32>
    %522 = vector.broadcast %33 : vector<1x128xf32> to vector<8x128xf32>
    %523 = arith.mulf %522, %516 : vector<8x128xf32>
    %524 = arith.addf %521, %523 : vector<8x128xf32>
    %c0_284 = arith.constant 0 : index
    %c0_285 = arith.constant 0 : index
    %525 = vector.load %arg29[%c0_284, %c0_285] : memref<8x128xf32, #tpu.memory_space<vmem>>, vector<8x128xf32>
    tpu.vector_store %arg29[%c0_284, %c0_285], %524 {strides = array<i32>} : memref<8x128xf32, #tpu.memory_space<vmem>>, vector<8x128xf32>,
    %526 = arith.index_cast %c3_i32 : i32 to index
    %c0_286 = arith.constant 0 : index
    %c0_287 = arith.constant 0 : index
    %527 = vector.load %arg20[%526, %c0_286, %c0_287] : memref<8x8x128xf32, #tpu.memory_space<vmem>>, vector<1x8x128xf32>
    %528 = vector.shape_cast %527 : vector<1x8x128xf32> to vector<8x128xf32>
    %529 = vector.shape_cast %516 : vector<8x128xf32> to vector<1x8x128xf32>
    tpu.vector_store %arg20[%526, %c0_286, %c0_287], %529 {strides = array<i32>} : memref<8x8x128xf32, #tpu.memory_space<vmem>>, vector<1x8x128xf32>,
    %530 = arith.index_cast %c3_i32 : i32 to index
    %c0_288 = arith.constant 0 : index
    %c0_289 = arith.constant 0 : index
    %531 = vector.load %arg21[%530, %c0_288, %c0_289] : memref<8x8x128xf32, #tpu.memory_space<vmem>>, vector<1x8x128xf32>
    %532 = vector.shape_cast %531 : vector<1x8x128xf32> to vector<8x128xf32>
    %533 = vector.shape_cast %500 : vector<8x128xf32> to vector<1x8x128xf32>
    tpu.vector_store %arg21[%530, %c0_288, %c0_289], %533 {strides = array<i32>} : memref<8x8x128xf32, #tpu.memory_space<vmem>>, vector<1x8x128xf32>,
    %c4_i32 = arith.constant 4 : i32
    %c8_i32_290 = arith.constant 8 : i32
    %534 = arith.muli %arg0, %c8_i32_290 : i32
    %535 = arith.addi %534, %c4_i32 : i32
    %c0_i32_291 = arith.constant 0 : i32
    %536 = arith.cmpi sgt, %535, %c0_i32_291 : i32
    %537 = arith.extui %536 : i1 to i32
    %538 = arith.sitofp %537 : i32 to f32
    %539 = arith.index_cast %c4_i32 : i32 to index
    %c0_292 = arith.constant 0 : index
    %c0_293 = arith.constant 0 : index
    %540 = vector.load %arg1[%539, %c0_292, %c0_293] : memref<8x8x16xf32, #tpu.memory_space<vmem>>, vector<1x8x16xf32>
    %541 = vector.shape_cast %540 : vector<1x8x16xf32> to vector<8x16xf32>
    %c0_294 = arith.constant 0 : index
    %c0_295 = arith.constant 0 : index
    %542 = vector.load %arg2[%c0_294, %c0_295] : memref<16x128xf32, #tpu.memory_space<vmem>>, vector<16x128xf32>
    %cst_296 = arith.constant dense<0.000000e+00> : vector<8x128xf32>
    %543 = tpu.matmul %541, %542, %cst_296 {dimension_numbers = #tpu.dot_dimension_numbers<[1], [0], [0], [1], [0, 0, 1, 1], [], []>} : vector<8x16xf32>, vector<16x128xf32>, vector<8x128xf32> -> vector<8x128xf32>
    %544 = vector.broadcast %5 : vector<1x128xf32> to vector<8x128xf32>
    %545 = arith.addf %543, %544 : vector<8x128xf32>
    %c0_297 = arith.constant 0 : index
    %c0_298 = arith.constant 0 : index
    %546 = vector.load %arg24[%c0_297, %c0_298] : memref<8x128xf32, #tpu.memory_space<vmem>>, vector<8x128xf32>
    %c0_299 = arith.constant 0 : index
    %c0_300 = arith.constant 0 : index
    %547 = vector.load %arg4[%c0_299, %c0_300] : memref<128x128xf32, #tpu.memory_space<vmem>>, vector<128x128xf32>
    %cst_301 = arith.constant dense<0.000000e+00> : vector<8x128xf32>
    %548 = tpu.matmul %546, %547, %cst_301 {dimension_numbers = #tpu.dot_dimension_numbers<[1], [0], [0], [1], [0, 0, 1, 1], [], []>} : vector<8x128xf32>, vector<128x128xf32>, vector<8x128xf32> -> vector<8x128xf32>
    %549 = arith.addf %545, %548 : vector<8x128xf32>
    %550 = vector.broadcast %538 : f32 to vector<1x128xf32>
    %551 = arith.mulf %550, %6 : vector<1x128xf32>
    %552 = vector.broadcast %551 : vector<1x128xf32> to vector<8x128xf32>
    %553 = arith.addf %549, %552 : vector<8x128xf32>
    %c0_302 = arith.constant 0 : index
    %c0_303 = arith.constant 0 : index
    %554 = vector.load %arg22[%c0_302, %c0_303] : memref<8x128xf32, #tpu.memory_space<vmem>>, vector<8x128xf32>
    %555 = vector.broadcast %3 : vector<1x128xf32> to vector<8x128xf32>
    %556 = arith.mulf %554, %555 : vector<8x128xf32>
    %557 = vector.broadcast %10 : vector<1x128xf32> to vector<8x128xf32>
    %558 = arith.mulf %557, %553 : vector<8x128xf32>
    %559 = arith.addf %556, %558 : vector<8x128xf32>
    %c0_304 = arith.constant 0 : index
    %c0_305 = arith.constant 0 : index
    %560 = vector.load %arg23[%c0_304, %c0_305] : memref<8x128xf32, #tpu.memory_space<vmem>>, vector<8x128xf32>
    %cst_306 = arith.constant 1.800000e+00 : f32
    %561 = vector.broadcast %cst_306 : f32 to vector<8x128xf32>
    %562 = arith.mulf %561, %560 : vector<8x128xf32>
    %cst_307 = arith.constant 0.00999999977 : f32
    %563 = vector.broadcast %cst_307 : f32 to vector<8x128xf32>
    %564 = arith.addf %563, %562 : vector<8x128xf32>
    %565 = arith.subf %559, %564 : vector<8x128xf32>
    %cst_308 = arith.constant 0.000000e+00 : f32
    %566 = vector.broadcast %cst_308 : f32 to vector<8x128xf32>
    %567 = arith.cmpf oge, %565, %566 : vector<8x128xf32>
    %568 = arith.extui %567 : vector<8x128xi1> to vector<8x128xi32>
    %569 = arith.sitofp %568 : vector<8x128xi32> to vector<8x128xf32>
    %570 = arith.mulf %569, %564 : vector<8x128xf32>
    %571 = arith.subf %559, %570 : vector<8x128xf32>
    %c0_309 = arith.constant 0 : index
    %c0_310 = arith.constant 0 : index
    %572 = vector.load %arg22[%c0_309, %c0_310] : memref<8x128xf32, #tpu.memory_space<vmem>>, vector<8x128xf32>
    tpu.vector_store %arg22[%c0_309, %c0_310], %571 {strides = array<i32>} : memref<8x128xf32, #tpu.memory_space<vmem>>, vector<8x128xf32>,
    %573 = vector.broadcast %4 : vector<1x128xf32> to vector<8x128xf32>
    %574 = arith.mulf %573, %560 : vector<8x128xf32>
    %575 = vector.broadcast %12 : vector<1x128xf32> to vector<8x128xf32>
    %576 = arith.mulf %575, %569 : vector<8x128xf32>
    %577 = arith.addf %574, %576 : vector<8x128xf32>
    %c0_311 = arith.constant 0 : index
    %c0_312 = arith.constant 0 : index
    %578 = vector.load %arg23[%c0_311, %c0_312] : memref<8x128xf32, #tpu.memory_space<vmem>>, vector<8x128xf32>
    tpu.vector_store %arg23[%c0_311, %c0_312], %577 {strides = array<i32>} : memref<8x128xf32, #tpu.memory_space<vmem>>, vector<8x128xf32>,
    %579 = vector.broadcast %13 : vector<1x128xf32> to vector<8x128xf32>
    %580 = arith.mulf %569, %579 : vector<8x128xf32>
    %c0_313 = arith.constant 0 : index
    %c0_314 = arith.constant 0 : index
    %581 = vector.load %arg24[%c0_313, %c0_314] : memref<8x128xf32, #tpu.memory_space<vmem>>, vector<8x128xf32>
    tpu.vector_store %arg24[%c0_313, %c0_314], %580 {strides = array<i32>} : memref<8x128xf32, #tpu.memory_space<vmem>>, vector<8x128xf32>,
    %c0_315 = arith.constant 0 : index
    %c0_316 = arith.constant 0 : index
    %582 = vector.load %arg9[%c0_315, %c0_316] : memref<128x128xf32, #tpu.memory_space<vmem>>, vector<128x128xf32>
    %cst_317 = arith.constant dense<0.000000e+00> : vector<8x128xf32>
    %583 = tpu.matmul %580, %582, %cst_317 {dimension_numbers = #tpu.dot_dimension_numbers<[1], [0], [0], [1], [0, 0, 1, 1], [], []>} : vector<8x128xf32>, vector<128x128xf32>, vector<8x128xf32> -> vector<8x128xf32>
    %584 = vector.broadcast %16 : vector<1x128xf32> to vector<8x128xf32>
    %585 = arith.addf %583, %584 : vector<8x128xf32>
    %c0_318 = arith.constant 0 : index
    %c0_319 = arith.constant 0 : index
    %586 = vector.load %arg27[%c0_318, %c0_319] : memref<8x128xf32, #tpu.memory_space<vmem>>, vector<8x128xf32>
    %c0_320 = arith.constant 0 : index
    %c0_321 = arith.constant 0 : index
    %587 = vector.load %arg11[%c0_320, %c0_321] : memref<128x128xf32, #tpu.memory_space<vmem>>, vector<128x128xf32>
    %cst_322 = arith.constant dense<0.000000e+00> : vector<8x128xf32>
    %588 = tpu.matmul %586, %587, %cst_322 {dimension_numbers = #tpu.dot_dimension_numbers<[1], [0], [0], [1], [0, 0, 1, 1], [], []>} : vector<8x128xf32>, vector<128x128xf32>, vector<8x128xf32> -> vector<8x128xf32>
    %589 = arith.addf %585, %588 : vector<8x128xf32>
    %590 = vector.broadcast %538 : f32 to vector<1x128xf32>
    %591 = arith.mulf %590, %17 : vector<1x128xf32>
    %592 = vector.broadcast %591 : vector<1x128xf32> to vector<8x128xf32>
    %593 = arith.addf %589, %592 : vector<8x128xf32>
    %c0_323 = arith.constant 0 : index
    %c0_324 = arith.constant 0 : index
    %594 = vector.load %arg25[%c0_323, %c0_324] : memref<8x128xf32, #tpu.memory_space<vmem>>, vector<8x128xf32>
    %595 = vector.broadcast %14 : vector<1x128xf32> to vector<8x128xf32>
    %596 = arith.mulf %594, %595 : vector<8x128xf32>
    %597 = vector.broadcast %21 : vector<1x128xf32> to vector<8x128xf32>
    %598 = arith.mulf %597, %593 : vector<8x128xf32>
    %599 = arith.addf %596, %598 : vector<8x128xf32>
    %c0_325 = arith.constant 0 : index
    %c0_326 = arith.constant 0 : index
    %600 = vector.load %arg26[%c0_325, %c0_326] : memref<8x128xf32, #tpu.memory_space<vmem>>, vector<8x128xf32>
    %cst_327 = arith.constant 1.800000e+00 : f32
    %601 = vector.broadcast %cst_327 : f32 to vector<8x128xf32>
    %602 = arith.mulf %601, %600 : vector<8x128xf32>
    %cst_328 = arith.constant 0.00999999977 : f32
    %603 = vector.broadcast %cst_328 : f32 to vector<8x128xf32>
    %604 = arith.addf %603, %602 : vector<8x128xf32>
    %605 = arith.subf %599, %604 : vector<8x128xf32>
    %cst_329 = arith.constant 0.000000e+00 : f32
    %606 = vector.broadcast %cst_329 : f32 to vector<8x128xf32>
    %607 = arith.cmpf oge, %605, %606 : vector<8x128xf32>
    %608 = arith.extui %607 : vector<8x128xi1> to vector<8x128xi32>
    %609 = arith.sitofp %608 : vector<8x128xi32> to vector<8x128xf32>
    %610 = arith.mulf %609, %604 : vector<8x128xf32>
    %611 = arith.subf %599, %610 : vector<8x128xf32>
    %c0_330 = arith.constant 0 : index
    %c0_331 = arith.constant 0 : index
    %612 = vector.load %arg25[%c0_330, %c0_331] : memref<8x128xf32, #tpu.memory_space<vmem>>, vector<8x128xf32>
    tpu.vector_store %arg25[%c0_330, %c0_331], %611 {strides = array<i32>} : memref<8x128xf32, #tpu.memory_space<vmem>>, vector<8x128xf32>,
    %613 = vector.broadcast %15 : vector<1x128xf32> to vector<8x128xf32>
    %614 = arith.mulf %613, %600 : vector<8x128xf32>
    %615 = vector.broadcast %23 : vector<1x128xf32> to vector<8x128xf32>
    %616 = arith.mulf %615, %609 : vector<8x128xf32>
    %617 = arith.addf %614, %616 : vector<8x128xf32>
    %c0_332 = arith.constant 0 : index
    %c0_333 = arith.constant 0 : index
    %618 = vector.load %arg26[%c0_332, %c0_333] : memref<8x128xf32, #tpu.memory_space<vmem>>, vector<8x128xf32>
    tpu.vector_store %arg26[%c0_332, %c0_333], %617 {strides = array<i32>} : memref<8x128xf32, #tpu.memory_space<vmem>>, vector<8x128xf32>,
    %619 = vector.broadcast %24 : vector<1x128xf32> to vector<8x128xf32>
    %620 = arith.mulf %609, %619 : vector<8x128xf32>
    %c0_334 = arith.constant 0 : index
    %c0_335 = arith.constant 0 : index
    %621 = vector.load %arg27[%c0_334, %c0_335] : memref<8x128xf32, #tpu.memory_space<vmem>>, vector<8x128xf32>
    tpu.vector_store %arg27[%c0_334, %c0_335], %620 {strides = array<i32>} : memref<8x128xf32, #tpu.memory_space<vmem>>, vector<8x128xf32>,
    %c0_336 = arith.constant 0 : index
    %c0_337 = arith.constant 0 : index
    %622 = vector.load %arg16[%c0_336, %c0_337] : memref<128x128xf32, #tpu.memory_space<vmem>>, vector<128x128xf32>
    %cst_338 = arith.constant dense<0.000000e+00> : vector<8x128xf32>
    %623 = tpu.matmul %620, %622, %cst_338 {dimension_numbers = #tpu.dot_dimension_numbers<[1], [0], [0], [1], [0, 0, 1, 1], [], []>} : vector<8x128xf32>, vector<128x128xf32>, vector<8x128xf32> -> vector<8x128xf32>
    %624 = vector.broadcast %27 : vector<1x128xf32> to vector<8x128xf32>
    %625 = arith.addf %623, %624 : vector<8x128xf32>
    %c0_339 = arith.constant 0 : index
    %c0_340 = arith.constant 0 : index
    %626 = vector.load %arg28[%c0_339, %c0_340] : memref<8x128xf32, #tpu.memory_space<vmem>>, vector<8x128xf32>
    %627 = vector.broadcast %25 : vector<1x128xf32> to vector<8x128xf32>
    %628 = arith.mulf %626, %627 : vector<8x128xf32>
    %629 = vector.broadcast %31 : vector<1x128xf32> to vector<8x128xf32>
    %630 = arith.mulf %629, %625 : vector<8x128xf32>
    %631 = arith.addf %628, %630 : vector<8x128xf32>
    %c0_341 = arith.constant 0 : index
    %c0_342 = arith.constant 0 : index
    %632 = vector.load %arg29[%c0_341, %c0_342] : memref<8x128xf32, #tpu.memory_space<vmem>>, vector<8x128xf32>
    %cst_343 = arith.constant 1.800000e+00 : f32
    %633 = vector.broadcast %cst_343 : f32 to vector<8x128xf32>
    %634 = arith.mulf %633, %632 : vector<8x128xf32>
    %cst_344 = arith.constant 0.00999999977 : f32
    %635 = vector.broadcast %cst_344 : f32 to vector<8x128xf32>
    %636 = arith.addf %635, %634 : vector<8x128xf32>
    %637 = arith.subf %631, %636 : vector<8x128xf32>
    %cst_345 = arith.constant 0.000000e+00 : f32
    %638 = vector.broadcast %cst_345 : f32 to vector<8x128xf32>
    %639 = arith.cmpf oge, %637, %638 : vector<8x128xf32>
    %640 = arith.extui %639 : vector<8x128xi1> to vector<8x128xi32>
    %641 = arith.sitofp %640 : vector<8x128xi32> to vector<8x128xf32>
    %642 = arith.mulf %641, %636 : vector<8x128xf32>
    %643 = arith.subf %631, %642 : vector<8x128xf32>
    %c0_346 = arith.constant 0 : index
    %c0_347 = arith.constant 0 : index
    %644 = vector.load %arg28[%c0_346, %c0_347] : memref<8x128xf32, #tpu.memory_space<vmem>>, vector<8x128xf32>
    tpu.vector_store %arg28[%c0_346, %c0_347], %643 {strides = array<i32>} : memref<8x128xf32, #tpu.memory_space<vmem>>, vector<8x128xf32>,
    %645 = vector.broadcast %26 : vector<1x128xf32> to vector<8x128xf32>
    %646 = arith.mulf %645, %632 : vector<8x128xf32>
    %647 = vector.broadcast %33 : vector<1x128xf32> to vector<8x128xf32>
    %648 = arith.mulf %647, %641 : vector<8x128xf32>
    %649 = arith.addf %646, %648 : vector<8x128xf32>
    %c0_348 = arith.constant 0 : index
    %c0_349 = arith.constant 0 : index
    %650 = vector.load %arg29[%c0_348, %c0_349] : memref<8x128xf32, #tpu.memory_space<vmem>>, vector<8x128xf32>
    tpu.vector_store %arg29[%c0_348, %c0_349], %649 {strides = array<i32>} : memref<8x128xf32, #tpu.memory_space<vmem>>, vector<8x128xf32>,
    %651 = arith.index_cast %c4_i32 : i32 to index
    %c0_350 = arith.constant 0 : index
    %c0_351 = arith.constant 0 : index
    %652 = vector.load %arg20[%651, %c0_350, %c0_351] : memref<8x8x128xf32, #tpu.memory_space<vmem>>, vector<1x8x128xf32>
    %653 = vector.shape_cast %652 : vector<1x8x128xf32> to vector<8x128xf32>
    %654 = vector.shape_cast %641 : vector<8x128xf32> to vector<1x8x128xf32>
    tpu.vector_store %arg20[%651, %c0_350, %c0_351], %654 {strides = array<i32>} : memref<8x8x128xf32, #tpu.memory_space<vmem>>, vector<1x8x128xf32>,
    %655 = arith.index_cast %c4_i32 : i32 to index
    %c0_352 = arith.constant 0 : index
    %c0_353 = arith.constant 0 : index
    %656 = vector.load %arg21[%655, %c0_352, %c0_353] : memref<8x8x128xf32, #tpu.memory_space<vmem>>, vector<1x8x128xf32>
    %657 = vector.shape_cast %656 : vector<1x8x128xf32> to vector<8x128xf32>
    %658 = vector.shape_cast %625 : vector<8x128xf32> to vector<1x8x128xf32>
    tpu.vector_store %arg21[%655, %c0_352, %c0_353], %658 {strides = array<i32>} : memref<8x8x128xf32, #tpu.memory_space<vmem>>, vector<1x8x128xf32>,
    %c5_i32 = arith.constant 5 : i32
    %c8_i32_354 = arith.constant 8 : i32
    %659 = arith.muli %arg0, %c8_i32_354 : i32
    %660 = arith.addi %659, %c5_i32 : i32
    %c0_i32_355 = arith.constant 0 : i32
    %661 = arith.cmpi sgt, %660, %c0_i32_355 : i32
    %662 = arith.extui %661 : i1 to i32
    %663 = arith.sitofp %662 : i32 to f32
    %664 = arith.index_cast %c5_i32 : i32 to index
    %c0_356 = arith.constant 0 : index
    %c0_357 = arith.constant 0 : index
    %665 = vector.load %arg1[%664, %c0_356, %c0_357] : memref<8x8x16xf32, #tpu.memory_space<vmem>>, vector<1x8x16xf32>
    %666 = vector.shape_cast %665 : vector<1x8x16xf32> to vector<8x16xf32>
    %c0_358 = arith.constant 0 : index
    %c0_359 = arith.constant 0 : index
    %667 = vector.load %arg2[%c0_358, %c0_359] : memref<16x128xf32, #tpu.memory_space<vmem>>, vector<16x128xf32>
    %cst_360 = arith.constant dense<0.000000e+00> : vector<8x128xf32>
    %668 = tpu.matmul %666, %667, %cst_360 {dimension_numbers = #tpu.dot_dimension_numbers<[1], [0], [0], [1], [0, 0, 1, 1], [], []>} : vector<8x16xf32>, vector<16x128xf32>, vector<8x128xf32> -> vector<8x128xf32>
    %669 = vector.broadcast %5 : vector<1x128xf32> to vector<8x128xf32>
    %670 = arith.addf %668, %669 : vector<8x128xf32>
    %c0_361 = arith.constant 0 : index
    %c0_362 = arith.constant 0 : index
    %671 = vector.load %arg24[%c0_361, %c0_362] : memref<8x128xf32, #tpu.memory_space<vmem>>, vector<8x128xf32>
    %c0_363 = arith.constant 0 : index
    %c0_364 = arith.constant 0 : index
    %672 = vector.load %arg4[%c0_363, %c0_364] : memref<128x128xf32, #tpu.memory_space<vmem>>, vector<128x128xf32>
    %cst_365 = arith.constant dense<0.000000e+00> : vector<8x128xf32>
    %673 = tpu.matmul %671, %672, %cst_365 {dimension_numbers = #tpu.dot_dimension_numbers<[1], [0], [0], [1], [0, 0, 1, 1], [], []>} : vector<8x128xf32>, vector<128x128xf32>, vector<8x128xf32> -> vector<8x128xf32>
    %674 = arith.addf %670, %673 : vector<8x128xf32>
    %675 = vector.broadcast %663 : f32 to vector<1x128xf32>
    %676 = arith.mulf %675, %6 : vector<1x128xf32>
    %677 = vector.broadcast %676 : vector<1x128xf32> to vector<8x128xf32>
    %678 = arith.addf %674, %677 : vector<8x128xf32>
    %c0_366 = arith.constant 0 : index
    %c0_367 = arith.constant 0 : index
    %679 = vector.load %arg22[%c0_366, %c0_367] : memref<8x128xf32, #tpu.memory_space<vmem>>, vector<8x128xf32>
    %680 = vector.broadcast %3 : vector<1x128xf32> to vector<8x128xf32>
    %681 = arith.mulf %679, %680 : vector<8x128xf32>
    %682 = vector.broadcast %10 : vector<1x128xf32> to vector<8x128xf32>
    %683 = arith.mulf %682, %678 : vector<8x128xf32>
    %684 = arith.addf %681, %683 : vector<8x128xf32>
    %c0_368 = arith.constant 0 : index
    %c0_369 = arith.constant 0 : index
    %685 = vector.load %arg23[%c0_368, %c0_369] : memref<8x128xf32, #tpu.memory_space<vmem>>, vector<8x128xf32>
    %cst_370 = arith.constant 1.800000e+00 : f32
    %686 = vector.broadcast %cst_370 : f32 to vector<8x128xf32>
    %687 = arith.mulf %686, %685 : vector<8x128xf32>
    %cst_371 = arith.constant 0.00999999977 : f32
    %688 = vector.broadcast %cst_371 : f32 to vector<8x128xf32>
    %689 = arith.addf %688, %687 : vector<8x128xf32>
    %690 = arith.subf %684, %689 : vector<8x128xf32>
    %cst_372 = arith.constant 0.000000e+00 : f32
    %691 = vector.broadcast %cst_372 : f32 to vector<8x128xf32>
    %692 = arith.cmpf oge, %690, %691 : vector<8x128xf32>
    %693 = arith.extui %692 : vector<8x128xi1> to vector<8x128xi32>
    %694 = arith.sitofp %693 : vector<8x128xi32> to vector<8x128xf32>
    %695 = arith.mulf %694, %689 : vector<8x128xf32>
    %696 = arith.subf %684, %695 : vector<8x128xf32>
    %c0_373 = arith.constant 0 : index
    %c0_374 = arith.constant 0 : index
    %697 = vector.load %arg22[%c0_373, %c0_374] : memref<8x128xf32, #tpu.memory_space<vmem>>, vector<8x128xf32>
    tpu.vector_store %arg22[%c0_373, %c0_374], %696 {strides = array<i32>} : memref<8x128xf32, #tpu.memory_space<vmem>>, vector<8x128xf32>,
    %698 = vector.broadcast %4 : vector<1x128xf32> to vector<8x128xf32>
    %699 = arith.mulf %698, %685 : vector<8x128xf32>
    %700 = vector.broadcast %12 : vector<1x128xf32> to vector<8x128xf32>
    %701 = arith.mulf %700, %694 : vector<8x128xf32>
    %702 = arith.addf %699, %701 : vector<8x128xf32>
    %c0_375 = arith.constant 0 : index
    %c0_376 = arith.constant 0 : index
    %703 = vector.load %arg23[%c0_375, %c0_376] : memref<8x128xf32, #tpu.memory_space<vmem>>, vector<8x128xf32>
    tpu.vector_store %arg23[%c0_375, %c0_376], %702 {strides = array<i32>} : memref<8x128xf32, #tpu.memory_space<vmem>>, vector<8x128xf32>,
    %704 = vector.broadcast %13 : vector<1x128xf32> to vector<8x128xf32>
    %705 = arith.mulf %694, %704 : vector<8x128xf32>
    %c0_377 = arith.constant 0 : index
    %c0_378 = arith.constant 0 : index
    %706 = vector.load %arg24[%c0_377, %c0_378] : memref<8x128xf32, #tpu.memory_space<vmem>>, vector<8x128xf32>
    tpu.vector_store %arg24[%c0_377, %c0_378], %705 {strides = array<i32>} : memref<8x128xf32, #tpu.memory_space<vmem>>, vector<8x128xf32>,
    %c0_379 = arith.constant 0 : index
    %c0_380 = arith.constant 0 : index
    %707 = vector.load %arg9[%c0_379, %c0_380] : memref<128x128xf32, #tpu.memory_space<vmem>>, vector<128x128xf32>
    %cst_381 = arith.constant dense<0.000000e+00> : vector<8x128xf32>
    %708 = tpu.matmul %705, %707, %cst_381 {dimension_numbers = #tpu.dot_dimension_numbers<[1], [0], [0], [1], [0, 0, 1, 1], [], []>} : vector<8x128xf32>, vector<128x128xf32>, vector<8x128xf32> -> vector<8x128xf32>
    %709 = vector.broadcast %16 : vector<1x128xf32> to vector<8x128xf32>
    %710 = arith.addf %708, %709 : vector<8x128xf32>
    %c0_382 = arith.constant 0 : index
    %c0_383 = arith.constant 0 : index
    %711 = vector.load %arg27[%c0_382, %c0_383] : memref<8x128xf32, #tpu.memory_space<vmem>>, vector<8x128xf32>
    %c0_384 = arith.constant 0 : index
    %c0_385 = arith.constant 0 : index
    %712 = vector.load %arg11[%c0_384, %c0_385] : memref<128x128xf32, #tpu.memory_space<vmem>>, vector<128x128xf32>
    %cst_386 = arith.constant dense<0.000000e+00> : vector<8x128xf32>
    %713 = tpu.matmul %711, %712, %cst_386 {dimension_numbers = #tpu.dot_dimension_numbers<[1], [0], [0], [1], [0, 0, 1, 1], [], []>} : vector<8x128xf32>, vector<128x128xf32>, vector<8x128xf32> -> vector<8x128xf32>
    %714 = arith.addf %710, %713 : vector<8x128xf32>
    %715 = vector.broadcast %663 : f32 to vector<1x128xf32>
    %716 = arith.mulf %715, %17 : vector<1x128xf32>
    %717 = vector.broadcast %716 : vector<1x128xf32> to vector<8x128xf32>
    %718 = arith.addf %714, %717 : vector<8x128xf32>
    %c0_387 = arith.constant 0 : index
    %c0_388 = arith.constant 0 : index
    %719 = vector.load %arg25[%c0_387, %c0_388] : memref<8x128xf32, #tpu.memory_space<vmem>>, vector<8x128xf32>
    %720 = vector.broadcast %14 : vector<1x128xf32> to vector<8x128xf32>
    %721 = arith.mulf %719, %720 : vector<8x128xf32>
    %722 = vector.broadcast %21 : vector<1x128xf32> to vector<8x128xf32>
    %723 = arith.mulf %722, %718 : vector<8x128xf32>
    %724 = arith.addf %721, %723 : vector<8x128xf32>
    %c0_389 = arith.constant 0 : index
    %c0_390 = arith.constant 0 : index
    %725 = vector.load %arg26[%c0_389, %c0_390] : memref<8x128xf32, #tpu.memory_space<vmem>>, vector<8x128xf32>
    %cst_391 = arith.constant 1.800000e+00 : f32
    %726 = vector.broadcast %cst_391 : f32 to vector<8x128xf32>
    %727 = arith.mulf %726, %725 : vector<8x128xf32>
    %cst_392 = arith.constant 0.00999999977 : f32
    %728 = vector.broadcast %cst_392 : f32 to vector<8x128xf32>
    %729 = arith.addf %728, %727 : vector<8x128xf32>
    %730 = arith.subf %724, %729 : vector<8x128xf32>
    %cst_393 = arith.constant 0.000000e+00 : f32
    %731 = vector.broadcast %cst_393 : f32 to vector<8x128xf32>
    %732 = arith.cmpf oge, %730, %731 : vector<8x128xf32>
    %733 = arith.extui %732 : vector<8x128xi1> to vector<8x128xi32>
    %734 = arith.sitofp %733 : vector<8x128xi32> to vector<8x128xf32>
    %735 = arith.mulf %734, %729 : vector<8x128xf32>
    %736 = arith.subf %724, %735 : vector<8x128xf32>
    %c0_394 = arith.constant 0 : index
    %c0_395 = arith.constant 0 : index
    %737 = vector.load %arg25[%c0_394, %c0_395] : memref<8x128xf32, #tpu.memory_space<vmem>>, vector<8x128xf32>
    tpu.vector_store %arg25[%c0_394, %c0_395], %736 {strides = array<i32>} : memref<8x128xf32, #tpu.memory_space<vmem>>, vector<8x128xf32>,
    %738 = vector.broadcast %15 : vector<1x128xf32> to vector<8x128xf32>
    %739 = arith.mulf %738, %725 : vector<8x128xf32>
    %740 = vector.broadcast %23 : vector<1x128xf32> to vector<8x128xf32>
    %741 = arith.mulf %740, %734 : vector<8x128xf32>
    %742 = arith.addf %739, %741 : vector<8x128xf32>
    %c0_396 = arith.constant 0 : index
    %c0_397 = arith.constant 0 : index
    %743 = vector.load %arg26[%c0_396, %c0_397] : memref<8x128xf32, #tpu.memory_space<vmem>>, vector<8x128xf32>
    tpu.vector_store %arg26[%c0_396, %c0_397], %742 {strides = array<i32>} : memref<8x128xf32, #tpu.memory_space<vmem>>, vector<8x128xf32>,
    %744 = vector.broadcast %24 : vector<1x128xf32> to vector<8x128xf32>
    %745 = arith.mulf %734, %744 : vector<8x128xf32>
    %c0_398 = arith.constant 0 : index
    %c0_399 = arith.constant 0 : index
    %746 = vector.load %arg27[%c0_398, %c0_399] : memref<8x128xf32, #tpu.memory_space<vmem>>, vector<8x128xf32>
    tpu.vector_store %arg27[%c0_398, %c0_399], %745 {strides = array<i32>} : memref<8x128xf32, #tpu.memory_space<vmem>>, vector<8x128xf32>,
    %c0_400 = arith.constant 0 : index
    %c0_401 = arith.constant 0 : index
    %747 = vector.load %arg16[%c0_400, %c0_401] : memref<128x128xf32, #tpu.memory_space<vmem>>, vector<128x128xf32>
    %cst_402 = arith.constant dense<0.000000e+00> : vector<8x128xf32>
    %748 = tpu.matmul %745, %747, %cst_402 {dimension_numbers = #tpu.dot_dimension_numbers<[1], [0], [0], [1], [0, 0, 1, 1], [], []>} : vector<8x128xf32>, vector<128x128xf32>, vector<8x128xf32> -> vector<8x128xf32>
    %749 = vector.broadcast %27 : vector<1x128xf32> to vector<8x128xf32>
    %750 = arith.addf %748, %749 : vector<8x128xf32>
    %c0_403 = arith.constant 0 : index
    %c0_404 = arith.constant 0 : index
    %751 = vector.load %arg28[%c0_403, %c0_404] : memref<8x128xf32, #tpu.memory_space<vmem>>, vector<8x128xf32>
    %752 = vector.broadcast %25 : vector<1x128xf32> to vector<8x128xf32>
    %753 = arith.mulf %751, %752 : vector<8x128xf32>
    %754 = vector.broadcast %31 : vector<1x128xf32> to vector<8x128xf32>
    %755 = arith.mulf %754, %750 : vector<8x128xf32>
    %756 = arith.addf %753, %755 : vector<8x128xf32>
    %c0_405 = arith.constant 0 : index
    %c0_406 = arith.constant 0 : index
    %757 = vector.load %arg29[%c0_405, %c0_406] : memref<8x128xf32, #tpu.memory_space<vmem>>, vector<8x128xf32>
    %cst_407 = arith.constant 1.800000e+00 : f32
    %758 = vector.broadcast %cst_407 : f32 to vector<8x128xf32>
    %759 = arith.mulf %758, %757 : vector<8x128xf32>
    %cst_408 = arith.constant 0.00999999977 : f32
    %760 = vector.broadcast %cst_408 : f32 to vector<8x128xf32>
    %761 = arith.addf %760, %759 : vector<8x128xf32>
    %762 = arith.subf %756, %761 : vector<8x128xf32>
    %cst_409 = arith.constant 0.000000e+00 : f32
    %763 = vector.broadcast %cst_409 : f32 to vector<8x128xf32>
    %764 = arith.cmpf oge, %762, %763 : vector<8x128xf32>
    %765 = arith.extui %764 : vector<8x128xi1> to vector<8x128xi32>
    %766 = arith.sitofp %765 : vector<8x128xi32> to vector<8x128xf32>
    %767 = arith.mulf %766, %761 : vector<8x128xf32>
    %768 = arith.subf %756, %767 : vector<8x128xf32>
    %c0_410 = arith.constant 0 : index
    %c0_411 = arith.constant 0 : index
    %769 = vector.load %arg28[%c0_410, %c0_411] : memref<8x128xf32, #tpu.memory_space<vmem>>, vector<8x128xf32>
    tpu.vector_store %arg28[%c0_410, %c0_411], %768 {strides = array<i32>} : memref<8x128xf32, #tpu.memory_space<vmem>>, vector<8x128xf32>,
    %770 = vector.broadcast %26 : vector<1x128xf32> to vector<8x128xf32>
    %771 = arith.mulf %770, %757 : vector<8x128xf32>
    %772 = vector.broadcast %33 : vector<1x128xf32> to vector<8x128xf32>
    %773 = arith.mulf %772, %766 : vector<8x128xf32>
    %774 = arith.addf %771, %773 : vector<8x128xf32>
    %c0_412 = arith.constant 0 : index
    %c0_413 = arith.constant 0 : index
    %775 = vector.load %arg29[%c0_412, %c0_413] : memref<8x128xf32, #tpu.memory_space<vmem>>, vector<8x128xf32>
    tpu.vector_store %arg29[%c0_412, %c0_413], %774 {strides = array<i32>} : memref<8x128xf32, #tpu.memory_space<vmem>>, vector<8x128xf32>,
    %776 = arith.index_cast %c5_i32 : i32 to index
    %c0_414 = arith.constant 0 : index
    %c0_415 = arith.constant 0 : index
    %777 = vector.load %arg20[%776, %c0_414, %c0_415] : memref<8x8x128xf32, #tpu.memory_space<vmem>>, vector<1x8x128xf32>
    %778 = vector.shape_cast %777 : vector<1x8x128xf32> to vector<8x128xf32>
    %779 = vector.shape_cast %766 : vector<8x128xf32> to vector<1x8x128xf32>
    tpu.vector_store %arg20[%776, %c0_414, %c0_415], %779 {strides = array<i32>} : memref<8x8x128xf32, #tpu.memory_space<vmem>>, vector<1x8x128xf32>,
    %780 = arith.index_cast %c5_i32 : i32 to index
    %c0_416 = arith.constant 0 : index
    %c0_417 = arith.constant 0 : index
    %781 = vector.load %arg21[%780, %c0_416, %c0_417] : memref<8x8x128xf32, #tpu.memory_space<vmem>>, vector<1x8x128xf32>
    %782 = vector.shape_cast %781 : vector<1x8x128xf32> to vector<8x128xf32>
    %783 = vector.shape_cast %750 : vector<8x128xf32> to vector<1x8x128xf32>
    tpu.vector_store %arg21[%780, %c0_416, %c0_417], %783 {strides = array<i32>} : memref<8x8x128xf32, #tpu.memory_space<vmem>>, vector<1x8x128xf32>,
    %c6_i32 = arith.constant 6 : i32
    %c8_i32_418 = arith.constant 8 : i32
    %784 = arith.muli %arg0, %c8_i32_418 : i32
    %785 = arith.addi %784, %c6_i32 : i32
    %c0_i32_419 = arith.constant 0 : i32
    %786 = arith.cmpi sgt, %785, %c0_i32_419 : i32
    %787 = arith.extui %786 : i1 to i32
    %788 = arith.sitofp %787 : i32 to f32
    %789 = arith.index_cast %c6_i32 : i32 to index
    %c0_420 = arith.constant 0 : index
    %c0_421 = arith.constant 0 : index
    %790 = vector.load %arg1[%789, %c0_420, %c0_421] : memref<8x8x16xf32, #tpu.memory_space<vmem>>, vector<1x8x16xf32>
    %791 = vector.shape_cast %790 : vector<1x8x16xf32> to vector<8x16xf32>
    %c0_422 = arith.constant 0 : index
    %c0_423 = arith.constant 0 : index
    %792 = vector.load %arg2[%c0_422, %c0_423] : memref<16x128xf32, #tpu.memory_space<vmem>>, vector<16x128xf32>
    %cst_424 = arith.constant dense<0.000000e+00> : vector<8x128xf32>
    %793 = tpu.matmul %791, %792, %cst_424 {dimension_numbers = #tpu.dot_dimension_numbers<[1], [0], [0], [1], [0, 0, 1, 1], [], []>} : vector<8x16xf32>, vector<16x128xf32>, vector<8x128xf32> -> vector<8x128xf32>
    %794 = vector.broadcast %5 : vector<1x128xf32> to vector<8x128xf32>
    %795 = arith.addf %793, %794 : vector<8x128xf32>
    %c0_425 = arith.constant 0 : index
    %c0_426 = arith.constant 0 : index
    %796 = vector.load %arg24[%c0_425, %c0_426] : memref<8x128xf32, #tpu.memory_space<vmem>>, vector<8x128xf32>
    %c0_427 = arith.constant 0 : index
    %c0_428 = arith.constant 0 : index
    %797 = vector.load %arg4[%c0_427, %c0_428] : memref<128x128xf32, #tpu.memory_space<vmem>>, vector<128x128xf32>
    %cst_429 = arith.constant dense<0.000000e+00> : vector<8x128xf32>
    %798 = tpu.matmul %796, %797, %cst_429 {dimension_numbers = #tpu.dot_dimension_numbers<[1], [0], [0], [1], [0, 0, 1, 1], [], []>} : vector<8x128xf32>, vector<128x128xf32>, vector<8x128xf32> -> vector<8x128xf32>
    %799 = arith.addf %795, %798 : vector<8x128xf32>
    %800 = vector.broadcast %788 : f32 to vector<1x128xf32>
    %801 = arith.mulf %800, %6 : vector<1x128xf32>
    %802 = vector.broadcast %801 : vector<1x128xf32> to vector<8x128xf32>
    %803 = arith.addf %799, %802 : vector<8x128xf32>
    %c0_430 = arith.constant 0 : index
    %c0_431 = arith.constant 0 : index
    %804 = vector.load %arg22[%c0_430, %c0_431] : memref<8x128xf32, #tpu.memory_space<vmem>>, vector<8x128xf32>
    %805 = vector.broadcast %3 : vector<1x128xf32> to vector<8x128xf32>
    %806 = arith.mulf %804, %805 : vector<8x128xf32>
    %807 = vector.broadcast %10 : vector<1x128xf32> to vector<8x128xf32>
    %808 = arith.mulf %807, %803 : vector<8x128xf32>
    %809 = arith.addf %806, %808 : vector<8x128xf32>
    %c0_432 = arith.constant 0 : index
    %c0_433 = arith.constant 0 : index
    %810 = vector.load %arg23[%c0_432, %c0_433] : memref<8x128xf32, #tpu.memory_space<vmem>>, vector<8x128xf32>
    %cst_434 = arith.constant 1.800000e+00 : f32
    %811 = vector.broadcast %cst_434 : f32 to vector<8x128xf32>
    %812 = arith.mulf %811, %810 : vector<8x128xf32>
    %cst_435 = arith.constant 0.00999999977 : f32
    %813 = vector.broadcast %cst_435 : f32 to vector<8x128xf32>
    %814 = arith.addf %813, %812 : vector<8x128xf32>
    %815 = arith.subf %809, %814 : vector<8x128xf32>
    %cst_436 = arith.constant 0.000000e+00 : f32
    %816 = vector.broadcast %cst_436 : f32 to vector<8x128xf32>
    %817 = arith.cmpf oge, %815, %816 : vector<8x128xf32>
    %818 = arith.extui %817 : vector<8x128xi1> to vector<8x128xi32>
    %819 = arith.sitofp %818 : vector<8x128xi32> to vector<8x128xf32>
    %820 = arith.mulf %819, %814 : vector<8x128xf32>
    %821 = arith.subf %809, %820 : vector<8x128xf32>
    %c0_437 = arith.constant 0 : index
    %c0_438 = arith.constant 0 : index
    %822 = vector.load %arg22[%c0_437, %c0_438] : memref<8x128xf32, #tpu.memory_space<vmem>>, vector<8x128xf32>
    tpu.vector_store %arg22[%c0_437, %c0_438], %821 {strides = array<i32>} : memref<8x128xf32, #tpu.memory_space<vmem>>, vector<8x128xf32>,
    %823 = vector.broadcast %4 : vector<1x128xf32> to vector<8x128xf32>
    %824 = arith.mulf %823, %810 : vector<8x128xf32>
    %825 = vector.broadcast %12 : vector<1x128xf32> to vector<8x128xf32>
    %826 = arith.mulf %825, %819 : vector<8x128xf32>
    %827 = arith.addf %824, %826 : vector<8x128xf32>
    %c0_439 = arith.constant 0 : index
    %c0_440 = arith.constant 0 : index
    %828 = vector.load %arg23[%c0_439, %c0_440] : memref<8x128xf32, #tpu.memory_space<vmem>>, vector<8x128xf32>
    tpu.vector_store %arg23[%c0_439, %c0_440], %827 {strides = array<i32>} : memref<8x128xf32, #tpu.memory_space<vmem>>, vector<8x128xf32>,
    %829 = vector.broadcast %13 : vector<1x128xf32> to vector<8x128xf32>
    %830 = arith.mulf %819, %829 : vector<8x128xf32>
    %c0_441 = arith.constant 0 : index
    %c0_442 = arith.constant 0 : index
    %831 = vector.load %arg24[%c0_441, %c0_442] : memref<8x128xf32, #tpu.memory_space<vmem>>, vector<8x128xf32>
    tpu.vector_store %arg24[%c0_441, %c0_442], %830 {strides = array<i32>} : memref<8x128xf32, #tpu.memory_space<vmem>>, vector<8x128xf32>,
    %c0_443 = arith.constant 0 : index
    %c0_444 = arith.constant 0 : index
    %832 = vector.load %arg9[%c0_443, %c0_444] : memref<128x128xf32, #tpu.memory_space<vmem>>, vector<128x128xf32>
    %cst_445 = arith.constant dense<0.000000e+00> : vector<8x128xf32>
    %833 = tpu.matmul %830, %832, %cst_445 {dimension_numbers = #tpu.dot_dimension_numbers<[1], [0], [0], [1], [0, 0, 1, 1], [], []>} : vector<8x128xf32>, vector<128x128xf32>, vector<8x128xf32> -> vector<8x128xf32>
    %834 = vector.broadcast %16 : vector<1x128xf32> to vector<8x128xf32>
    %835 = arith.addf %833, %834 : vector<8x128xf32>
    %c0_446 = arith.constant 0 : index
    %c0_447 = arith.constant 0 : index
    %836 = vector.load %arg27[%c0_446, %c0_447] : memref<8x128xf32, #tpu.memory_space<vmem>>, vector<8x128xf32>
    %c0_448 = arith.constant 0 : index
    %c0_449 = arith.constant 0 : index
    %837 = vector.load %arg11[%c0_448, %c0_449] : memref<128x128xf32, #tpu.memory_space<vmem>>, vector<128x128xf32>
    %cst_450 = arith.constant dense<0.000000e+00> : vector<8x128xf32>
    %838 = tpu.matmul %836, %837, %cst_450 {dimension_numbers = #tpu.dot_dimension_numbers<[1], [0], [0], [1], [0, 0, 1, 1], [], []>} : vector<8x128xf32>, vector<128x128xf32>, vector<8x128xf32> -> vector<8x128xf32>
    %839 = arith.addf %835, %838 : vector<8x128xf32>
    %840 = vector.broadcast %788 : f32 to vector<1x128xf32>
    %841 = arith.mulf %840, %17 : vector<1x128xf32>
    %842 = vector.broadcast %841 : vector<1x128xf32> to vector<8x128xf32>
    %843 = arith.addf %839, %842 : vector<8x128xf32>
    %c0_451 = arith.constant 0 : index
    %c0_452 = arith.constant 0 : index
    %844 = vector.load %arg25[%c0_451, %c0_452] : memref<8x128xf32, #tpu.memory_space<vmem>>, vector<8x128xf32>
    %845 = vector.broadcast %14 : vector<1x128xf32> to vector<8x128xf32>
    %846 = arith.mulf %844, %845 : vector<8x128xf32>
    %847 = vector.broadcast %21 : vector<1x128xf32> to vector<8x128xf32>
    %848 = arith.mulf %847, %843 : vector<8x128xf32>
    %849 = arith.addf %846, %848 : vector<8x128xf32>
    %c0_453 = arith.constant 0 : index
    %c0_454 = arith.constant 0 : index
    %850 = vector.load %arg26[%c0_453, %c0_454] : memref<8x128xf32, #tpu.memory_space<vmem>>, vector<8x128xf32>
    %cst_455 = arith.constant 1.800000e+00 : f32
    %851 = vector.broadcast %cst_455 : f32 to vector<8x128xf32>
    %852 = arith.mulf %851, %850 : vector<8x128xf32>
    %cst_456 = arith.constant 0.00999999977 : f32
    %853 = vector.broadcast %cst_456 : f32 to vector<8x128xf32>
    %854 = arith.addf %853, %852 : vector<8x128xf32>
    %855 = arith.subf %849, %854 : vector<8x128xf32>
    %cst_457 = arith.constant 0.000000e+00 : f32
    %856 = vector.broadcast %cst_457 : f32 to vector<8x128xf32>
    %857 = arith.cmpf oge, %855, %856 : vector<8x128xf32>
    %858 = arith.extui %857 : vector<8x128xi1> to vector<8x128xi32>
    %859 = arith.sitofp %858 : vector<8x128xi32> to vector<8x128xf32>
    %860 = arith.mulf %859, %854 : vector<8x128xf32>
    %861 = arith.subf %849, %860 : vector<8x128xf32>
    %c0_458 = arith.constant 0 : index
    %c0_459 = arith.constant 0 : index
    %862 = vector.load %arg25[%c0_458, %c0_459] : memref<8x128xf32, #tpu.memory_space<vmem>>, vector<8x128xf32>
    tpu.vector_store %arg25[%c0_458, %c0_459], %861 {strides = array<i32>} : memref<8x128xf32, #tpu.memory_space<vmem>>, vector<8x128xf32>,
    %863 = vector.broadcast %15 : vector<1x128xf32> to vector<8x128xf32>
    %864 = arith.mulf %863, %850 : vector<8x128xf32>
    %865 = vector.broadcast %23 : vector<1x128xf32> to vector<8x128xf32>
    %866 = arith.mulf %865, %859 : vector<8x128xf32>
    %867 = arith.addf %864, %866 : vector<8x128xf32>
    %c0_460 = arith.constant 0 : index
    %c0_461 = arith.constant 0 : index
    %868 = vector.load %arg26[%c0_460, %c0_461] : memref<8x128xf32, #tpu.memory_space<vmem>>, vector<8x128xf32>
    tpu.vector_store %arg26[%c0_460, %c0_461], %867 {strides = array<i32>} : memref<8x128xf32, #tpu.memory_space<vmem>>, vector<8x128xf32>,
    %869 = vector.broadcast %24 : vector<1x128xf32> to vector<8x128xf32>
    %870 = arith.mulf %859, %869 : vector<8x128xf32>
    %c0_462 = arith.constant 0 : index
    %c0_463 = arith.constant 0 : index
    %871 = vector.load %arg27[%c0_462, %c0_463] : memref<8x128xf32, #tpu.memory_space<vmem>>, vector<8x128xf32>
    tpu.vector_store %arg27[%c0_462, %c0_463], %870 {strides = array<i32>} : memref<8x128xf32, #tpu.memory_space<vmem>>, vector<8x128xf32>,
    %c0_464 = arith.constant 0 : index
    %c0_465 = arith.constant 0 : index
    %872 = vector.load %arg16[%c0_464, %c0_465] : memref<128x128xf32, #tpu.memory_space<vmem>>, vector<128x128xf32>
    %cst_466 = arith.constant dense<0.000000e+00> : vector<8x128xf32>
    %873 = tpu.matmul %870, %872, %cst_466 {dimension_numbers = #tpu.dot_dimension_numbers<[1], [0], [0], [1], [0, 0, 1, 1], [], []>} : vector<8x128xf32>, vector<128x128xf32>, vector<8x128xf32> -> vector<8x128xf32>
    %874 = vector.broadcast %27 : vector<1x128xf32> to vector<8x128xf32>
    %875 = arith.addf %873, %874 : vector<8x128xf32>
    %c0_467 = arith.constant 0 : index
    %c0_468 = arith.constant 0 : index
    %876 = vector.load %arg28[%c0_467, %c0_468] : memref<8x128xf32, #tpu.memory_space<vmem>>, vector<8x128xf32>
    %877 = vector.broadcast %25 : vector<1x128xf32> to vector<8x128xf32>
    %878 = arith.mulf %876, %877 : vector<8x128xf32>
    %879 = vector.broadcast %31 : vector<1x128xf32> to vector<8x128xf32>
    %880 = arith.mulf %879, %875 : vector<8x128xf32>
    %881 = arith.addf %878, %880 : vector<8x128xf32>
    %c0_469 = arith.constant 0 : index
    %c0_470 = arith.constant 0 : index
    %882 = vector.load %arg29[%c0_469, %c0_470] : memref<8x128xf32, #tpu.memory_space<vmem>>, vector<8x128xf32>
    %cst_471 = arith.constant 1.800000e+00 : f32
    %883 = vector.broadcast %cst_471 : f32 to vector<8x128xf32>
    %884 = arith.mulf %883, %882 : vector<8x128xf32>
    %cst_472 = arith.constant 0.00999999977 : f32
    %885 = vector.broadcast %cst_472 : f32 to vector<8x128xf32>
    %886 = arith.addf %885, %884 : vector<8x128xf32>
    %887 = arith.subf %881, %886 : vector<8x128xf32>
    %cst_473 = arith.constant 0.000000e+00 : f32
    %888 = vector.broadcast %cst_473 : f32 to vector<8x128xf32>
    %889 = arith.cmpf oge, %887, %888 : vector<8x128xf32>
    %890 = arith.extui %889 : vector<8x128xi1> to vector<8x128xi32>
    %891 = arith.sitofp %890 : vector<8x128xi32> to vector<8x128xf32>
    %892 = arith.mulf %891, %886 : vector<8x128xf32>
    %893 = arith.subf %881, %892 : vector<8x128xf32>
    %c0_474 = arith.constant 0 : index
    %c0_475 = arith.constant 0 : index
    %894 = vector.load %arg28[%c0_474, %c0_475] : memref<8x128xf32, #tpu.memory_space<vmem>>, vector<8x128xf32>
    tpu.vector_store %arg28[%c0_474, %c0_475], %893 {strides = array<i32>} : memref<8x128xf32, #tpu.memory_space<vmem>>, vector<8x128xf32>,
    %895 = vector.broadcast %26 : vector<1x128xf32> to vector<8x128xf32>
    %896 = arith.mulf %895, %882 : vector<8x128xf32>
    %897 = vector.broadcast %33 : vector<1x128xf32> to vector<8x128xf32>
    %898 = arith.mulf %897, %891 : vector<8x128xf32>
    %899 = arith.addf %896, %898 : vector<8x128xf32>
    %c0_476 = arith.constant 0 : index
    %c0_477 = arith.constant 0 : index
    %900 = vector.load %arg29[%c0_476, %c0_477] : memref<8x128xf32, #tpu.memory_space<vmem>>, vector<8x128xf32>
    tpu.vector_store %arg29[%c0_476, %c0_477], %899 {strides = array<i32>} : memref<8x128xf32, #tpu.memory_space<vmem>>, vector<8x128xf32>,
    %901 = arith.index_cast %c6_i32 : i32 to index
    %c0_478 = arith.constant 0 : index
    %c0_479 = arith.constant 0 : index
    %902 = vector.load %arg20[%901, %c0_478, %c0_479] : memref<8x8x128xf32, #tpu.memory_space<vmem>>, vector<1x8x128xf32>
    %903 = vector.shape_cast %902 : vector<1x8x128xf32> to vector<8x128xf32>
    %904 = vector.shape_cast %891 : vector<8x128xf32> to vector<1x8x128xf32>
    tpu.vector_store %arg20[%901, %c0_478, %c0_479], %904 {strides = array<i32>} : memref<8x8x128xf32, #tpu.memory_space<vmem>>, vector<1x8x128xf32>,
    %905 = arith.index_cast %c6_i32 : i32 to index
    %c0_480 = arith.constant 0 : index
    %c0_481 = arith.constant 0 : index
    %906 = vector.load %arg21[%905, %c0_480, %c0_481] : memref<8x8x128xf32, #tpu.memory_space<vmem>>, vector<1x8x128xf32>
    %907 = vector.shape_cast %906 : vector<1x8x128xf32> to vector<8x128xf32>
    %908 = vector.shape_cast %875 : vector<8x128xf32> to vector<1x8x128xf32>
    tpu.vector_store %arg21[%905, %c0_480, %c0_481], %908 {strides = array<i32>} : memref<8x8x128xf32, #tpu.memory_space<vmem>>, vector<1x8x128xf32>,
    %c7_i32 = arith.constant 7 : i32
    %c8_i32_482 = arith.constant 8 : i32
    %909 = arith.muli %arg0, %c8_i32_482 : i32
    %910 = arith.addi %909, %c7_i32 : i32
    %c0_i32_483 = arith.constant 0 : i32
    %911 = arith.cmpi sgt, %910, %c0_i32_483 : i32
    %912 = arith.extui %911 : i1 to i32
    %913 = arith.sitofp %912 : i32 to f32
    %914 = arith.index_cast %c7_i32 : i32 to index
    %c0_484 = arith.constant 0 : index
    %c0_485 = arith.constant 0 : index
    %915 = vector.load %arg1[%914, %c0_484, %c0_485] : memref<8x8x16xf32, #tpu.memory_space<vmem>>, vector<1x8x16xf32>
    %916 = vector.shape_cast %915 : vector<1x8x16xf32> to vector<8x16xf32>
    %c0_486 = arith.constant 0 : index
    %c0_487 = arith.constant 0 : index
    %917 = vector.load %arg2[%c0_486, %c0_487] : memref<16x128xf32, #tpu.memory_space<vmem>>, vector<16x128xf32>
    %cst_488 = arith.constant dense<0.000000e+00> : vector<8x128xf32>
    %918 = tpu.matmul %916, %917, %cst_488 {dimension_numbers = #tpu.dot_dimension_numbers<[1], [0], [0], [1], [0, 0, 1, 1], [], []>} : vector<8x16xf32>, vector<16x128xf32>, vector<8x128xf32> -> vector<8x128xf32>
    %919 = vector.broadcast %5 : vector<1x128xf32> to vector<8x128xf32>
    %920 = arith.addf %918, %919 : vector<8x128xf32>
    %c0_489 = arith.constant 0 : index
    %c0_490 = arith.constant 0 : index
    %921 = vector.load %arg24[%c0_489, %c0_490] : memref<8x128xf32, #tpu.memory_space<vmem>>, vector<8x128xf32>
    %c0_491 = arith.constant 0 : index
    %c0_492 = arith.constant 0 : index
    %922 = vector.load %arg4[%c0_491, %c0_492] : memref<128x128xf32, #tpu.memory_space<vmem>>, vector<128x128xf32>
    %cst_493 = arith.constant dense<0.000000e+00> : vector<8x128xf32>
    %923 = tpu.matmul %921, %922, %cst_493 {dimension_numbers = #tpu.dot_dimension_numbers<[1], [0], [0], [1], [0, 0, 1, 1], [], []>} : vector<8x128xf32>, vector<128x128xf32>, vector<8x128xf32> -> vector<8x128xf32>
    %924 = arith.addf %920, %923 : vector<8x128xf32>
    %925 = vector.broadcast %913 : f32 to vector<1x128xf32>
    %926 = arith.mulf %925, %6 : vector<1x128xf32>
    %927 = vector.broadcast %926 : vector<1x128xf32> to vector<8x128xf32>
    %928 = arith.addf %924, %927 : vector<8x128xf32>
    %c0_494 = arith.constant 0 : index
    %c0_495 = arith.constant 0 : index
    %929 = vector.load %arg22[%c0_494, %c0_495] : memref<8x128xf32, #tpu.memory_space<vmem>>, vector<8x128xf32>
    %930 = vector.broadcast %3 : vector<1x128xf32> to vector<8x128xf32>
    %931 = arith.mulf %929, %930 : vector<8x128xf32>
    %932 = vector.broadcast %10 : vector<1x128xf32> to vector<8x128xf32>
    %933 = arith.mulf %932, %928 : vector<8x128xf32>
    %934 = arith.addf %931, %933 : vector<8x128xf32>
    %c0_496 = arith.constant 0 : index
    %c0_497 = arith.constant 0 : index
    %935 = vector.load %arg23[%c0_496, %c0_497] : memref<8x128xf32, #tpu.memory_space<vmem>>, vector<8x128xf32>
    %cst_498 = arith.constant 1.800000e+00 : f32
    %936 = vector.broadcast %cst_498 : f32 to vector<8x128xf32>
    %937 = arith.mulf %936, %935 : vector<8x128xf32>
    %cst_499 = arith.constant 0.00999999977 : f32
    %938 = vector.broadcast %cst_499 : f32 to vector<8x128xf32>
    %939 = arith.addf %938, %937 : vector<8x128xf32>
    %940 = arith.subf %934, %939 : vector<8x128xf32>
    %cst_500 = arith.constant 0.000000e+00 : f32
    %941 = vector.broadcast %cst_500 : f32 to vector<8x128xf32>
    %942 = arith.cmpf oge, %940, %941 : vector<8x128xf32>
    %943 = arith.extui %942 : vector<8x128xi1> to vector<8x128xi32>
    %944 = arith.sitofp %943 : vector<8x128xi32> to vector<8x128xf32>
    %945 = arith.mulf %944, %939 : vector<8x128xf32>
    %946 = arith.subf %934, %945 : vector<8x128xf32>
    %c0_501 = arith.constant 0 : index
    %c0_502 = arith.constant 0 : index
    %947 = vector.load %arg22[%c0_501, %c0_502] : memref<8x128xf32, #tpu.memory_space<vmem>>, vector<8x128xf32>
    tpu.vector_store %arg22[%c0_501, %c0_502], %946 {strides = array<i32>} : memref<8x128xf32, #tpu.memory_space<vmem>>, vector<8x128xf32>,
    %948 = vector.broadcast %4 : vector<1x128xf32> to vector<8x128xf32>
    %949 = arith.mulf %948, %935 : vector<8x128xf32>
    %950 = vector.broadcast %12 : vector<1x128xf32> to vector<8x128xf32>
    %951 = arith.mulf %950, %944 : vector<8x128xf32>
    %952 = arith.addf %949, %951 : vector<8x128xf32>
    %c0_503 = arith.constant 0 : index
    %c0_504 = arith.constant 0 : index
    %953 = vector.load %arg23[%c0_503, %c0_504] : memref<8x128xf32, #tpu.memory_space<vmem>>, vector<8x128xf32>
    tpu.vector_store %arg23[%c0_503, %c0_504], %952 {strides = array<i32>} : memref<8x128xf32, #tpu.memory_space<vmem>>, vector<8x128xf32>,
    %954 = vector.broadcast %13 : vector<1x128xf32> to vector<8x128xf32>
    %955 = arith.mulf %944, %954 : vector<8x128xf32>
    %c0_505 = arith.constant 0 : index
    %c0_506 = arith.constant 0 : index
    %956 = vector.load %arg24[%c0_505, %c0_506] : memref<8x128xf32, #tpu.memory_space<vmem>>, vector<8x128xf32>
    tpu.vector_store %arg24[%c0_505, %c0_506], %955 {strides = array<i32>} : memref<8x128xf32, #tpu.memory_space<vmem>>, vector<8x128xf32>,
    %c0_507 = arith.constant 0 : index
    %c0_508 = arith.constant 0 : index
    %957 = vector.load %arg9[%c0_507, %c0_508] : memref<128x128xf32, #tpu.memory_space<vmem>>, vector<128x128xf32>
    %cst_509 = arith.constant dense<0.000000e+00> : vector<8x128xf32>
    %958 = tpu.matmul %955, %957, %cst_509 {dimension_numbers = #tpu.dot_dimension_numbers<[1], [0], [0], [1], [0, 0, 1, 1], [], []>} : vector<8x128xf32>, vector<128x128xf32>, vector<8x128xf32> -> vector<8x128xf32>
    %959 = vector.broadcast %16 : vector<1x128xf32> to vector<8x128xf32>
    %960 = arith.addf %958, %959 : vector<8x128xf32>
    %c0_510 = arith.constant 0 : index
    %c0_511 = arith.constant 0 : index
    %961 = vector.load %arg27[%c0_510, %c0_511] : memref<8x128xf32, #tpu.memory_space<vmem>>, vector<8x128xf32>
    %c0_512 = arith.constant 0 : index
    %c0_513 = arith.constant 0 : index
    %962 = vector.load %arg11[%c0_512, %c0_513] : memref<128x128xf32, #tpu.memory_space<vmem>>, vector<128x128xf32>
    %cst_514 = arith.constant dense<0.000000e+00> : vector<8x128xf32>
    %963 = tpu.matmul %961, %962, %cst_514 {dimension_numbers = #tpu.dot_dimension_numbers<[1], [0], [0], [1], [0, 0, 1, 1], [], []>} : vector<8x128xf32>, vector<128x128xf32>, vector<8x128xf32> -> vector<8x128xf32>
    %964 = arith.addf %960, %963 : vector<8x128xf32>
    %965 = vector.broadcast %913 : f32 to vector<1x128xf32>
    %966 = arith.mulf %965, %17 : vector<1x128xf32>
    %967 = vector.broadcast %966 : vector<1x128xf32> to vector<8x128xf32>
    %968 = arith.addf %964, %967 : vector<8x128xf32>
    %c0_515 = arith.constant 0 : index
    %c0_516 = arith.constant 0 : index
    %969 = vector.load %arg25[%c0_515, %c0_516] : memref<8x128xf32, #tpu.memory_space<vmem>>, vector<8x128xf32>
    %970 = vector.broadcast %14 : vector<1x128xf32> to vector<8x128xf32>
    %971 = arith.mulf %969, %970 : vector<8x128xf32>
    %972 = vector.broadcast %21 : vector<1x128xf32> to vector<8x128xf32>
    %973 = arith.mulf %972, %968 : vector<8x128xf32>
    %974 = arith.addf %971, %973 : vector<8x128xf32>
    %c0_517 = arith.constant 0 : index
    %c0_518 = arith.constant 0 : index
    %975 = vector.load %arg26[%c0_517, %c0_518] : memref<8x128xf32, #tpu.memory_space<vmem>>, vector<8x128xf32>
    %cst_519 = arith.constant 1.800000e+00 : f32
    %976 = vector.broadcast %cst_519 : f32 to vector<8x128xf32>
    %977 = arith.mulf %976, %975 : vector<8x128xf32>
    %cst_520 = arith.constant 0.00999999977 : f32
    %978 = vector.broadcast %cst_520 : f32 to vector<8x128xf32>
    %979 = arith.addf %978, %977 : vector<8x128xf32>
    %980 = arith.subf %974, %979 : vector<8x128xf32>
    %cst_521 = arith.constant 0.000000e+00 : f32
    %981 = vector.broadcast %cst_521 : f32 to vector<8x128xf32>
    %982 = arith.cmpf oge, %980, %981 : vector<8x128xf32>
    %983 = arith.extui %982 : vector<8x128xi1> to vector<8x128xi32>
    %984 = arith.sitofp %983 : vector<8x128xi32> to vector<8x128xf32>
    %985 = arith.mulf %984, %979 : vector<8x128xf32>
    %986 = arith.subf %974, %985 : vector<8x128xf32>
    %c0_522 = arith.constant 0 : index
    %c0_523 = arith.constant 0 : index
    %987 = vector.load %arg25[%c0_522, %c0_523] : memref<8x128xf32, #tpu.memory_space<vmem>>, vector<8x128xf32>
    tpu.vector_store %arg25[%c0_522, %c0_523], %986 {strides = array<i32>} : memref<8x128xf32, #tpu.memory_space<vmem>>, vector<8x128xf32>,
    %988 = vector.broadcast %15 : vector<1x128xf32> to vector<8x128xf32>
    %989 = arith.mulf %988, %975 : vector<8x128xf32>
    %990 = vector.broadcast %23 : vector<1x128xf32> to vector<8x128xf32>
    %991 = arith.mulf %990, %984 : vector<8x128xf32>
    %992 = arith.addf %989, %991 : vector<8x128xf32>
    %c0_524 = arith.constant 0 : index
    %c0_525 = arith.constant 0 : index
    %993 = vector.load %arg26[%c0_524, %c0_525] : memref<8x128xf32, #tpu.memory_space<vmem>>, vector<8x128xf32>
    tpu.vector_store %arg26[%c0_524, %c0_525], %992 {strides = array<i32>} : memref<8x128xf32, #tpu.memory_space<vmem>>, vector<8x128xf32>,
    %994 = vector.broadcast %24 : vector<1x128xf32> to vector<8x128xf32>
    %995 = arith.mulf %984, %994 : vector<8x128xf32>
    %c0_526 = arith.constant 0 : index
    %c0_527 = arith.constant 0 : index
    %996 = vector.load %arg27[%c0_526, %c0_527] : memref<8x128xf32, #tpu.memory_space<vmem>>, vector<8x128xf32>
    tpu.vector_store %arg27[%c0_526, %c0_527], %995 {strides = array<i32>} : memref<8x128xf32, #tpu.memory_space<vmem>>, vector<8x128xf32>,
    %c0_528 = arith.constant 0 : index
    %c0_529 = arith.constant 0 : index
    %997 = vector.load %arg16[%c0_528, %c0_529] : memref<128x128xf32, #tpu.memory_space<vmem>>, vector<128x128xf32>
    %cst_530 = arith.constant dense<0.000000e+00> : vector<8x128xf32>
    %998 = tpu.matmul %995, %997, %cst_530 {dimension_numbers = #tpu.dot_dimension_numbers<[1], [0], [0], [1], [0, 0, 1, 1], [], []>} : vector<8x128xf32>, vector<128x128xf32>, vector<8x128xf32> -> vector<8x128xf32>
    %999 = vector.broadcast %27 : vector<1x128xf32> to vector<8x128xf32>
    %1000 = arith.addf %998, %999 : vector<8x128xf32>
    %c0_531 = arith.constant 0 : index
    %c0_532 = arith.constant 0 : index
    %1001 = vector.load %arg28[%c0_531, %c0_532] : memref<8x128xf32, #tpu.memory_space<vmem>>, vector<8x128xf32>
    %1002 = vector.broadcast %25 : vector<1x128xf32> to vector<8x128xf32>
    %1003 = arith.mulf %1001, %1002 : vector<8x128xf32>
    %1004 = vector.broadcast %31 : vector<1x128xf32> to vector<8x128xf32>
    %1005 = arith.mulf %1004, %1000 : vector<8x128xf32>
    %1006 = arith.addf %1003, %1005 : vector<8x128xf32>
    %c0_533 = arith.constant 0 : index
    %c0_534 = arith.constant 0 : index
    %1007 = vector.load %arg29[%c0_533, %c0_534] : memref<8x128xf32, #tpu.memory_space<vmem>>, vector<8x128xf32>
    %cst_535 = arith.constant 1.800000e+00 : f32
    %1008 = vector.broadcast %cst_535 : f32 to vector<8x128xf32>
    %1009 = arith.mulf %1008, %1007 : vector<8x128xf32>
    %cst_536 = arith.constant 0.00999999977 : f32
    %1010 = vector.broadcast %cst_536 : f32 to vector<8x128xf32>
    %1011 = arith.addf %1010, %1009 : vector<8x128xf32>
    %1012 = arith.subf %1006, %1011 : vector<8x128xf32>
    %cst_537 = arith.constant 0.000000e+00 : f32
    %1013 = vector.broadcast %cst_537 : f32 to vector<8x128xf32>
    %1014 = arith.cmpf oge, %1012, %1013 : vector<8x128xf32>
    %1015 = arith.extui %1014 : vector<8x128xi1> to vector<8x128xi32>
    %1016 = arith.sitofp %1015 : vector<8x128xi32> to vector<8x128xf32>
    %1017 = arith.mulf %1016, %1011 : vector<8x128xf32>
    %1018 = arith.subf %1006, %1017 : vector<8x128xf32>
    %c0_538 = arith.constant 0 : index
    %c0_539 = arith.constant 0 : index
    %1019 = vector.load %arg28[%c0_538, %c0_539] : memref<8x128xf32, #tpu.memory_space<vmem>>, vector<8x128xf32>
    tpu.vector_store %arg28[%c0_538, %c0_539], %1018 {strides = array<i32>} : memref<8x128xf32, #tpu.memory_space<vmem>>, vector<8x128xf32>,
    %1020 = vector.broadcast %26 : vector<1x128xf32> to vector<8x128xf32>
    %1021 = arith.mulf %1020, %1007 : vector<8x128xf32>
    %1022 = vector.broadcast %33 : vector<1x128xf32> to vector<8x128xf32>
    %1023 = arith.mulf %1022, %1016 : vector<8x128xf32>
    %1024 = arith.addf %1021, %1023 : vector<8x128xf32>
    %c0_540 = arith.constant 0 : index
    %c0_541 = arith.constant 0 : index
    %1025 = vector.load %arg29[%c0_540, %c0_541] : memref<8x128xf32, #tpu.memory_space<vmem>>, vector<8x128xf32>
    tpu.vector_store %arg29[%c0_540, %c0_541], %1024 {strides = array<i32>} : memref<8x128xf32, #tpu.memory_space<vmem>>, vector<8x128xf32>,
    %1026 = arith.index_cast %c7_i32 : i32 to index
    %c0_542 = arith.constant 0 : index
    %c0_543 = arith.constant 0 : index
    %1027 = vector.load %arg20[%1026, %c0_542, %c0_543] : memref<8x8x128xf32, #tpu.memory_space<vmem>>, vector<1x8x128xf32>
    %1028 = vector.shape_cast %1027 : vector<1x8x128xf32> to vector<8x128xf32>
    %1029 = vector.shape_cast %1016 : vector<8x128xf32> to vector<1x8x128xf32>
    tpu.vector_store %arg20[%1026, %c0_542, %c0_543], %1029 {strides = array<i32>} : memref<8x8x128xf32, #tpu.memory_space<vmem>>, vector<1x8x128xf32>,
    %1030 = arith.index_cast %c7_i32 : i32 to index
    %c0_544 = arith.constant 0 : index
    %c0_545 = arith.constant 0 : index
    %1031 = vector.load %arg21[%1030, %c0_544, %c0_545] : memref<8x8x128xf32, #tpu.memory_space<vmem>>, vector<1x8x128xf32>
    %1032 = vector.shape_cast %1031 : vector<1x8x128xf32> to vector<8x128xf32>
    %1033 = vector.shape_cast %1000 : vector<8x128xf32> to vector<1x8x128xf32>
    tpu.vector_store %arg21[%1030, %c0_544, %c0_545], %1033 {strides = array<i32>} : memref<8x8x128xf32, #tpu.memory_space<vmem>>, vector<1x8x128xf32>,
    %c8_i32_546 = arith.constant 8 : i32
    return
  }
  func.func @transform_0(%arg0: i32) -> (i32, i32, i32) {
    %c0_i32 = arith.constant 0 : i32
    %c0_i32_0 = arith.constant 0 : i32
    %c0_i32_1 = arith.constant 0 : i32
    return %arg0, %c0_i32, %c0_i32_0 : i32, i32, i32
  }
  func.func @transform_1(%arg0: i32) -> (i32, i32) {
    %c0_i32 = arith.constant 0 : i32
    %c0_i32_0 = arith.constant 0 : i32
    %c0_i32_1 = arith.constant 0 : i32
    return %c0_i32, %c0_i32_0 : i32, i32
  }
  func.func @transform_2(%arg0: i32) -> (i32, i32) {
    %c0_i32 = arith.constant 0 : i32
    %c0_i32_0 = arith.constant 0 : i32
    %c0_i32_1 = arith.constant 0 : i32
    return %c0_i32, %c0_i32_0 : i32, i32
  }
  func.func @transform_3(%arg0: i32) -> (i32, i32) {
    %c0_i32 = arith.constant 0 : i32
    %c0_i32_0 = arith.constant 0 : i32
    %c0_i32_1 = arith.constant 0 : i32
    return %c0_i32, %c0_i32_0 : i32, i32
  }
  func.func @transform_4(%arg0: i32) -> (i32, i32) {
    %c0_i32 = arith.constant 0 : i32
    %c0_i32_0 = arith.constant 0 : i32
    %c0_i32_1 = arith.constant 0 : i32
    return %c0_i32, %c0_i32_0 : i32, i32
  }
  func.func @transform_5(%arg0: i32) -> (i32, i32) {
    %c0_i32 = arith.constant 0 : i32
    %c0_i32_0 = arith.constant 0 : i32
    %c0_i32_1 = arith.constant 0 : i32
    return %c0_i32, %c0_i32_0 : i32, i32
  }
  func.func @transform_6(%arg0: i32) -> (i32, i32) {
    %c0_i32 = arith.constant 0 : i32
    %c0_i32_0 = arith.constant 0 : i32
    %c0_i32_1 = arith.constant 0 : i32
    return %c0_i32, %c0_i32_0 : i32, i32
  }
  func.func @transform_7(%arg0: i32) -> (i32, i32) {
    %c0_i32 = arith.constant 0 : i32
    %c0_i32_0 = arith.constant 0 : i32
    %c0_i32_1 = arith.constant 0 : i32
    return %c0_i32, %c0_i32_0 : i32, i32
  }
  func.func @transform_8(%arg0: i32) -> (i32, i32) {
    %c0_i32 = arith.constant 0 : i32
    %c0_i32_0 = arith.constant 0 : i32
    %c0_i32_1 = arith.constant 0 : i32
    return %c0_i32, %c0_i32_0 : i32, i32
  }
  func.func @transform_9(%arg0: i32) -> (i32, i32) {
    %c0_i32 = arith.constant 0 : i32
    %c0_i32_0 = arith.constant 0 : i32
    %c0_i32_1 = arith.constant 0 : i32
    return %c0_i32, %c0_i32_0 : i32, i32
  }
  func.func @transform_10(%arg0: i32) -> (i32, i32) {
    %c0_i32 = arith.constant 0 : i32
    %c0_i32_0 = arith.constant 0 : i32
    %c0_i32_1 = arith.constant 0 : i32
    return %c0_i32, %c0_i32_0 : i32, i32
  }
  func.func @transform_11(%arg0: i32) -> (i32, i32) {
    %c0_i32 = arith.constant 0 : i32
    %c0_i32_0 = arith.constant 0 : i32
    %c0_i32_1 = arith.constant 0 : i32
    return %c0_i32, %c0_i32_0 : i32, i32
  }
  func.func @transform_12(%arg0: i32) -> (i32, i32) {
    %c0_i32 = arith.constant 0 : i32
    %c0_i32_0 = arith.constant 0 : i32
    %c0_i32_1 = arith.constant 0 : i32
    return %c0_i32, %c0_i32_0 : i32, i32
  }
  func.func @transform_13(%arg0: i32) -> (i32, i32) {
    %c0_i32 = arith.constant 0 : i32
    %c0_i32_0 = arith.constant 0 : i32
    %c0_i32_1 = arith.constant 0 : i32
    return %c0_i32, %c0_i32_0 : i32, i32
  }
  func.func @transform_14(%arg0: i32) -> (i32, i32) {
    %c0_i32 = arith.constant 0 : i32
    %c0_i32_0 = arith.constant 0 : i32
    %c0_i32_1 = arith.constant 0 : i32
    return %c0_i32, %c0_i32_0 : i32, i32
  }
  func.func @transform_15(%arg0: i32) -> (i32, i32) {
    %c0_i32 = arith.constant 0 : i32
    %c0_i32_0 = arith.constant 0 : i32
    %c0_i32_1 = arith.constant 0 : i32
    return %c0_i32, %c0_i32_0 : i32, i32
  }
  func.func @transform_16(%arg0: i32) -> (i32, i32) {
    %c0_i32 = arith.constant 0 : i32
    %c0_i32_0 = arith.constant 0 : i32
    %c0_i32_1 = arith.constant 0 : i32
    return %c0_i32, %c0_i32_0 : i32, i32
  }
  func.func @transform_17(%arg0: i32) -> (i32, i32) {
    %c0_i32 = arith.constant 0 : i32
    %c0_i32_0 = arith.constant 0 : i32
    %c0_i32_1 = arith.constant 0 : i32
    return %c0_i32, %c0_i32_0 : i32, i32
  }
  func.func @transform_18(%arg0: i32) -> (i32, i32) {
    %c0_i32 = arith.constant 0 : i32
    %c0_i32_0 = arith.constant 0 : i32
    %c0_i32_1 = arith.constant 0 : i32
    return %c0_i32, %c0_i32_0 : i32, i32
  }
  func.func @transform_19(%arg0: i32) -> (i32, i32, i32) {
    %c0_i32 = arith.constant 0 : i32
    %c0_i32_0 = arith.constant 0 : i32
    %c0_i32_1 = arith.constant 0 : i32
    return %arg0, %c0_i32, %c0_i32_0 : i32, i32, i32
  }
  func.func @transform_20(%arg0: i32) -> (i32, i32, i32) {
    %c0_i32 = arith.constant 0 : i32
    %c0_i32_0 = arith.constant 0 : i32
    %c0_i32_1 = arith.constant 0 : i32
    return %arg0, %c0_i32, %c0_i32_0 : i32, i32, i32
  }
}

</mosaic_0001>

<bundles_post_ra>
// kernel: tpu_custom_call.1
= control target key start
LH: loop header
LB: loop body
LE: loop exit
PB: predicated region body
PF: predicated region fallthrough
CT: control target
= control target key end

     0   :  { %s8871_s0 = inlined_call_operand.hbm [shape: f32[8,8,16], index: 0, kind: input, shape index: {}]   ;;  %s8872_s1 = inlined_call_operand.hbm [shape: f32[16,128], index: 1, kind: input, shape index: {}]   ;;  %s8873_s2 = inlined_call_operand.vmem [shape: f32[1,128], index: 2, kind: input, shape index: {}]   ;;  %s8874_s3 = inlined_call_operand.hbm [shape: f32[128,128], index: 3, kind: input, shape index: {}]   ;;  %s8875_s4 = inlined_call_operand.vmem [shape: f32[1,128], index: 4, kind: input, shape index: {}]   ;;  %s8876_s5 = inlined_call_operand.vmem [shape: f32[1,128], index: 5, kind: input, shape index: {}]   ;;  %s8877_s6 = inlined_call_operand.vmem [shape: f32[1,128], index: 6, kind: input, shape index: {}]   ;;  %s8878_s7 = inlined_call_operand.vmem [shape: f32[1,128], index: 7, kind: input, shape index: {}]   ;;  %s8879_s8 = inlined_call_operand.hbm [shape: f32[128,128], index: 8, kind: input, shape index: {}]   ;;  %s8880_s9 = inlined_call_operand.vmem [shape: f32[1,128], index: 9, kind: input, shape index: {}]   ;;  %s8881_s10 = inlined_call_operand.hbm [shape: f32[128,128], index: 10, kind: input, shape index: {}]   ;;  %s8882_s11 = inlined_call_operand.vmem [shape: f32[1,128], index: 11, kind: input, shape index: {}]   ;;  %s8883_s12 = inlined_call_operand.vmem [shape: f32[1,128], index: 12, kind: input, shape index: {}]   ;;  %s8884_s13 = inlined_call_operand.vmem [shape: f32[1,128], index: 13, kind: input, shape index: {}]   ;;  %s8885_s14 = inlined_call_operand.vmem [shape: f32[1,128], index: 14, kind: input, shape index: {}]   ;;  %s8886_s15 = inlined_call_operand.hbm [shape: f32[128,128], index: 15, kind: input, shape index: {}]   ;;  %s8887_s16 = inlined_call_operand.vmem [shape: f32[1,128], index: 16, kind: input, shape index: {}]   ;;  %s8888_s17 = inlined_call_operand.vmem [shape: f32[1,128], index: 17, kind: input, shape index: {}]   ;;  %s8889_s18 = inlined_call_operand.vmem [shape: f32[1,128], index: 18, kind: input, shape index: {}]   ;;  %s8890_s19 = inlined_call_operand.hbm [shape: f32[8,8,128], index: 19, kind: output, shape index: {0}]   ;;  %s8891_s20 = inlined_call_operand.hbm [shape: f32[8,8,128], index: 20, kind: output, shape index: {1}]  }
   0x1   :  { %8933 = sst [smem:[#allocation42_spill]] %s8871_s0 }
   0x2   :  { %8934 = sst [smem:[#allocation43_spill]] %s8872_s1 }
   0x3   :  { %8935 = sst [smem:[#allocation44_spill]] %s8873_s2 }
   0x4   :  { %8936 = sst [smem:[#allocation45_spill]] %s8874_s3 }
   0x5   :  { %8937 = sst [smem:[#allocation46_spill]] %s8875_s4 }
   0x6   :  { %8938 = sst [smem:[#allocation47_spill]] %s8890_s19 }
   0x7   :  { %8939 = sst [smem:[#allocation48_spill]] %s8891_s20 }
   0x8   :  { %26 = vsyncpa [#allocation11], 0 }
   0x9   :  { %27 = vsyncpa [#allocation14], 0 }
   0xa   :  { %28 = vsyncpa [#allocation17], 0 }
   0xb   :  { %29 = vsyncpa [#allocation20], 0 }
   0xc   :  { %30 = vsyncpa [#allocation12], 0 }
   0xd   :  { %31 = vsyncpa [#allocation23], 0  ;;  %s7166_s1 = smov [#allocation13]   ;;  %s7167_s23 = smov [#allocation16]  }
   0xe   :  { %s49_s22 = sshll.u32 %s7166_s1, 4  ;;  %s83_s24 = sshll.u32 %s7167_s23, 4  ;;  %s50_s22 = int_to_ptr.vmem [resolvable:$true] %s49_s22  ;;  %s7284_s24 = int_to_ptr.vmem [resolvable:$true] %s83_s24 }
   0xf   :  { %s8940_s3 = sld [smem:[#allocation43_spill]] }
  0x15   :  { %s6978_s26 = scalar_lea.hbm %s8940_s3, 256 }
  0x16   :  { %p6979_p0 = scmp.ne.s32.totalorder %s8940_s3, %s6978_s26  ;;  %p6982_p1 = scmp.lt.u32.totalorder %s6978_s26, %s8940_s3 }
  0x18   :  { %p6984_p2 = pnand %p6982_p1, %p6979_p0 }
  0x1a   :  { %6987 = shalt.err (!%p6984_p2)
}
  0x1b   :  { %s6988_s30 = scalar_lea.vmem %s50_s22, 256  ;;  %p6993_p4 = scmp.lt.s32.totalorder %s50_s22, %s50_s22 }
  0x1c   :  { %p6989_p3 = scmp.ne.s32.totalorder %s50_s22, %s6988_s30  ;;  %p6994_p5 = scmp.lt.s32.totalorder %s6988_s30, %s6988_s30 }
  0x1e   :  { %p6995_p6 = por %p6994_p5, %p6993_p4 }
  0x20   :  { %p6996_p7 = pnand %p6995_p6, %p6989_p3 }
  0x22   :  { %6999 = shalt.err (!%p6996_p7)
}
  0x23   :  { %s7168_s0 = smov 128   ;;  %s7169_s21 = smov 8  }
  0x24   :  { %55 = dma.hbm_to_vmem [thread:$0]  %s8940_s3, 256, %s50_s22, [#allocation14], %s7168_s0, %s7168_s0, %s7169_s21  }
  0x25   :  { %s7000_s26 = scalar_lea.hbm %s8879_s8, 2048 }
  0x26   :  { %p7001_p8 = scmp.ne.s32.totalorder %s8879_s8, %s7000_s26  ;;  %p7004_p9 = scmp.lt.u32.totalorder %s7000_s26, %s8879_s8 }
  0x28   :  { %p7006_p10 = pnand %p7004_p9, %p7001_p8 }
  0x2a   :  { %7009 = shalt.err (!%p7006_p10)
}
  0x2b   :  { %s7010_s30 = scalar_lea.vmem %s7284_s24, 2048  ;;  %p7015_p12 = scmp.lt.s32.totalorder %s7284_s24, %s7284_s24 }
  0x2c   :  { %p7011_p11 = scmp.ne.s32.totalorder %s7284_s24, %s7010_s30  ;;  %p7016_p13 = scmp.lt.s32.totalorder %s7010_s30, %s7010_s30 }
  0x2e   :  { %p7017_p0 = por %p7016_p13, %p7015_p12 }
  0x30   :  { %p7018_p1 = pnand %p7017_p0, %p7011_p11 }
  0x32   :  { %7021 = shalt.err (!%p7018_p1)
}
  0x33   :  { %89 = dma.hbm_to_vmem [thread:$0]  %s8879_s8, 2048, %s7284_s24, [#allocation17], %s7168_s0, %s7168_s0, %s7169_s21  }
  0x34   :  { %s7170_s1 = smov [#allocation10]   ;;  %s7171_s2 = smov [#allocation15]  }
  0x35   :  { %s37_s23 = sshll.u32 %s7170_s1, 4  ;;  %s63_s25 = sshll.u32 %s7171_s2, 4  ;;  %s38_s23 = int_to_ptr.vmem [resolvable:$true] %s37_s23  ;;  %s7321_s25 = int_to_ptr.vmem [resolvable:$true] %s63_s25 }
  0x36   :  { %s8941_s28 = sld [smem:[#allocation42_spill]] }
  0x3c   :  { %s7022_s4 = scalar_lea.hbm %s8941_s28, 1024 }
  0x3d   :  { %p7023_p2 = scmp.ne.s32.totalorder %s8941_s28, %s7022_s4  ;;  %p7026_p3 = scmp.lt.u32.totalorder %s7022_s4, %s8941_s28 }
  0x3f   :  { %p7028_p4 = pnand %p7026_p3, %p7023_p2 }
  0x41   :  { %7031 = shalt.err (!%p7028_p4)
}
  0x42   :  { %s7032_s8 = scalar_lea.vmem %s38_s23, 1024  ;;  %p7037_p6 = scmp.lt.s32.totalorder %s38_s23, %s38_s23 }
  0x43   :  { %p7033_p5 = scmp.ne.s32.totalorder %s38_s23, %s7032_s8  ;;  %p7038_p7 = scmp.lt.s32.totalorder %s7032_s8, %s7032_s8 }
  0x45   :  { %p7039_p8 = por %p7038_p7, %p7037_p6 }
  0x47   :  { %p7040_p9 = pnand %p7039_p8, %p7033_p5 }
  0x49   :  { %7043 = shalt.err (!%p7040_p9)
}
  0x4a   :  { %43 = dma.hbm_to_vmem [thread:$0]  %s8941_s28, 1024, %s38_s23, [#allocation11], %s7168_s0, %s7168_s0, %s7169_s21  }
  0x4b   :  { %s8942_s19 = sld [smem:[#allocation45_spill]] }
  0x51   :  { %s7044_s20 = scalar_lea.hbm %s8942_s19, 2048 }
  0x52   :  { %p7045_p10 = scmp.ne.s32.totalorder %s8942_s19, %s7044_s20  ;;  %p7048_p11 = scmp.lt.u32.totalorder %s7044_s20, %s8942_s19 }
  0x54   :  { %p7050_p12 = pnand %p7048_p11, %p7045_p10 }
  0x56   :  { %7053 = shalt.err (!%p7050_p12)
}
  0x57   :  { %s7054_s29 = scalar_lea.vmem %s7321_s25, 2048  ;;  %p7059_p0 = scmp.lt.s32.totalorder %s7321_s25, %s7321_s25 }
  0x58   :  { %p7055_p13 = scmp.ne.s32.totalorder %s7321_s25, %s7054_s29  ;;  %p7060_p1 = scmp.lt.s32.totalorder %s7054_s29, %s7054_s29 }
  0x5a   :  { %p7061_p2 = por %p7060_p1, %p7059_p0 }
  0x5c   :  { %p7062_p3 = pnand %p7061_p2, %p7055_p13 }
  0x5e   :  { %7065 = shalt.err (!%p7062_p3)
}
  0x5f   :  { %69 = dma.hbm_to_vmem [thread:$0]  %s8942_s19, 2048, %s7321_s25, [#allocation14], %s7168_s0, %s7168_s0, %s7169_s21  }
  0x60   :  { %s7172_s30 = smov [#allocation18]   ;;  %s7173_s24 = smov [#allocation19]  }
  0x61   :  { %s97_s8 = sshll.u32 %s7172_s30, 4  ;;  %s117_s22 = sshll.u32 %s7173_s24, 4  ;;  %s98_s8 = int_to_ptr.vmem [resolvable:$true] %s97_s8  ;;  %s7358_s22 = int_to_ptr.vmem [resolvable:$true] %s117_s22 }
  0x62   :  { %s7066_s20 = scalar_lea.hbm %s8881_s10, 2048 }
  0x63   :  { %p7067_p4 = scmp.ne.s32.totalorder %s8881_s10, %s7066_s20  ;;  %p7070_p5 = scmp.lt.u32.totalorder %s7066_s20, %s8881_s10 }
  0x65   :  { %p7072_p6 = pnand %p7070_p5, %p7067_p4 }
  0x67   :  { %7075 = shalt.err (!%p7072_p6)
}
  0x68   :  { %s7076_s25 = scalar_lea.vmem %s98_s8, 2048  ;;  %p7081_p8 = scmp.lt.s32.totalorder %s98_s8, %s98_s8 }
  0x69   :  { %p7077_p7 = scmp.ne.s32.totalorder %s98_s8, %s7076_s25  ;;  %p7082_p9 = scmp.lt.s32.totalorder %s7076_s25, %s7076_s25 }
  0x6b   :  { %p7083_p10 = por %p7082_p9, %p7081_p8 }
  0x6d   :  { %p7084_p11 = pnand %p7083_p10, %p7077_p7 }
  0x6f   :  { %7087 = shalt.err (!%p7084_p11)
}
  0x70   :  { %103 = dma.hbm_to_vmem [thread:$0]  %s8881_s10, 2048, %s98_s8, [#allocation17], %s7168_s0, %s7168_s0, %s7169_s21  }
  0x71   :  { %s7088_s30 = scalar_lea.hbm %s8886_s15, 2048 }
  0x72   :  { %p7089_p12 = scmp.ne.s32.totalorder %s8886_s15, %s7088_s30  ;;  %p7092_p13 = scmp.lt.u32.totalorder %s7088_s30, %s8886_s15 }
  0x74   :  { %p7094_p0 = pnand %p7092_p13, %p7089_p12 }
  0x76   :  { %7097 = shalt.err (!%p7094_p0)
}
  0x77   :  { %s7098_s2 = scalar_lea.vmem %s7358_s22, 2048  ;;  %p7103_p2 = scmp.lt.s32.totalorder %s7358_s22, %s7358_s22 }
  0x78   :  { %p7099_p1 = scmp.ne.s32.totalorder %s7358_s22, %s7098_s2  ;;  %p7104_p3 = scmp.lt.s32.totalorder %s7098_s2, %s7098_s2 }
  0x7a   :  { %p7105_p4 = por %p7104_p3, %p7103_p2 }
  0x7c   :  { %p7106_p5 = pnand %p7105_p4, %p7099_p1 }
  0x7e   :  { %7109 = shalt.err (!%p7106_p5)
}
  0x7f   :  { %123 = dma.hbm_to_vmem [thread:$0]  %s8886_s15, 2048, %s7358_s22, [#allocation20], %s7168_s0, %s7168_s0, %s7169_s21  }
  0x80   :  { %7154 = dma.done.wait [#allocation11], 1024  }
  0x81   :  { %7155 = vsyncadd [#allocation11], 4294966272 }
  0x82   :  { %7156 = dma.done.wait [#allocation14], 2304  }
  0x83   :  { %7157 = vsyncadd [#allocation14], 4294964992 }
  0x84   :  { %7158 = dma.done.wait [#allocation17], 4096  }
  0x85   :  { %7159 = vsyncadd [#allocation17], 4294963200 }
  0x86   :  { %7160 = dma.done.wait [#allocation20], 2048  }
  0x87   :  { %7161 = vsyncadd [#allocation20], 4294965248  ;;  %v8898_v0 = vmov 0.0|0.0   ;;  %vm7175_vm0 = vmmov 0   ;;  %v8900_v1 = vmov 0.0   ;;  %v267_v2 = vld [vmem:[#allocation15] sm:$0xff] }
  0x88   :  { %6166 = vmatprep.subr.bf16.mxu1 %v8898_v0  ;;  %6163 = vmatprep.subr.bf16.mxu0 %v8898_v0  ;;  %v268_v3 = vld [vmem:[#allocation15 + $0x8] sm:$0xff]  ;;  %v269_v4 = vld [vmem:[#allocation15 + $0x10] sm:$0xff]  ;;  %v270_v6 = vld [vmem:[#allocation15 + $0x18] sm:$0xff]  ;;  %vm192_vm1 = vcmask 130048   ;;  %s8943_s26 = sld [smem:[#allocation46_spill]]  ;;  %s8944_s25 = sld [smem:[#allocation44_spill]] }
  0x89   :  { %4991 = vmatprep.mubr.msk.f32.mxu0 %vm7175_vm0, %v8900_v1  ;;  %5026 = vmatprep.mubr.msk.f32.mxu1 %vm7175_vm0, %v8900_v1  ;;  %v7401_v5 = vpack.c.bf16 %v268_v3, %v267_v2  ;;  %v7404_v7 = vpack.c.bf16 %v270_v6, %v269_v4  ;;  %v271_v8 = vld [vmem:[#allocation15 + $0x20] sm:$0xff]  ;;  %v272_v9 = vld [vmem:[#allocation15 + $0x28] sm:$0xff]  ;;  %v184_v10 = vld [vmem:[#allocation13] sm:$0xff]  ;;  %s7177_s10 = smov [#allocation22]  }
  0x8a   :  { %v185_v11 = vld [vmem:[#allocation13 + $0x8] sm:$0xff]  ;;  %v413_v13 = vld [vmem:[#allocation16] sm:$0xff]  ;;  %v414_v14 = vld [vmem:[#allocation16 + $0x8] sm:$0xff]  ;;  %v7410_v15 = vpack.c.bf16 %v272_v9, %v271_v8  ;;  %s4360_s8 = sshll.u32 %s7177_s10, 4  ;;  %s4361_s8 = int_to_ptr.vmem [resolvable:$true] %s4360_s8 }
  0x8b   :  { %6168 = vmatpush3.bf16.msra.mxu1 %v7401_v5  ;;  %v7407_v12 = vpack.c.bf16 %v185_v11, %v184_v10  ;;  %v273_v16 = vld [vmem:[#allocation15 + $0x30] sm:$0xff]  ;;  %v274_v17 = vld [vmem:[#allocation15 + $0x38] sm:$0xff]  ;;  %v7414_v19 = vpack.c.bf16 %v414_v14, %v413_v13  ;;  %v275_v23 = vld [vmem:[#allocation15 + $0x40] sm:$0xff]  ;;  %s7110_s22 = scalar_lea.vmem %s4361_s8, 1024  ;;  %p7115_p7 = scmp.lt.s32.totalorder %s4361_s8, %s4361_s8 }
  0x8c   :  { %6169 = vmatprep.subr.bf16.mxu1 %v8898_v0  ;;  %v183_v18 = vld [vmem:[#allocation10] sm:$0xff]  ;;  %v416_v21 = vld [vmem:[#allocation16 + $0x18] sm:$0xff]  ;;  %v7418_v22 = vpack.c.bf16 %v274_v17, %v273_v16  ;;  %v276_v24 = vld [vmem:[#allocation15 + $0x48] sm:$0xff]  ;;  %p7111_p6 = scmp.ne.s32.totalorder %s4361_s8, %s7110_s22  ;;  %p7116_p8 = scmp.lt.s32.totalorder %s7110_s22, %s7110_s22 }
  0x8d   :  { %6165 = vmatpush3.bf16.msra.mxu0 %v7407_v12  ;;  %v415_v20 = vld [vmem:[#allocation16 + $0x10] sm:$0xff]  ;;  %v417_v26 = vld [vmem:[#allocation16 + $0x20] sm:$0xff]  ;;  %v418_v27 = vld [vmem:[#allocation16 + $0x28] sm:$0xff]  ;;  %v7429_v28 = vpack.c.bf16 %v276_v24, %v275_v23  ;;  %v357_v24 = vlaneseq }
  0x8e   :  { %6190 = vmatprep.subr.bf16.mxu0 %v8898_v0  ;;  %v7423_v25 = vpack.c.bf16 %v416_v21, %v415_v20  ;;  %v277_v29 = vld [vmem:[#allocation15 + $0x50] sm:$0xff]  ;;  %v278_v30 = vld [vmem:[#allocation15 + $0x58] sm:$0xff]  ;;  %v7433_v31 = vpack.c.bf16 %v418_v27, %v417_v26  ;;  %v279_v35 = vld [vmem:[#allocation15 + $0x60] sm:$0xff]  ;;  %p7117_p9 = por %p7116_p8, %p7115_p7 }
  0x8f   :  { %6171 = vmatpush3.bf16.msra.mxu1 %v7404_v7  ;;  %v419_v32 = vld [vmem:[#allocation16 + $0x30] sm:$0xff]  ;;  %v420_v33 = vld [vmem:[#allocation16 + $0x38] sm:$0xff]  ;;  %v7437_v34 = vpack.c.bf16 %v278_v30, %v277_v29  ;;  %v280_v36 = vld [vmem:[#allocation15 + $0x68] sm:$0xff]  ;;  %v358_v26 = vshrl.u32 %v357_v24, 7 }
  0x90   :  { %6172 = vmatprep.subr.bf16.mxu1 %v8898_v0  ;;  %4992 = vmatmul.mubr.msk.f32.vlgmr.msra.gmra.mrb[0].mxu0 %vm192_vm1, %v183_v18  ;;  %v7441_v37 = vpack.c.bf16 %v420_v33, %v419_v32  ;;  %v7445_v38 = vpack.c.bf16 %v280_v36, %v279_v35  ;;  %v281_v39 = vld [vmem:[#allocation15 + $0x70] sm:$0xff]  ;;  %v282_v40 = vld [vmem:[#allocation15 + $0x78] sm:$0xff]  ;;  %v506_v42 = vld [vmem:[#allocation18] sm:$0xff]  ;;  %p7118_p10 = pnand %p7117_p9, %p7111_p6 }
  0x91   :  { %6192 = vmatpush3.bf16.msra.mxu0 %v7414_v19  ;;  %5061 = vmatprep.mubr.msk.f32.mxu0 %vm7175_vm0, %v8900_v1  ;;  %v7451_v41 = vpack.c.bf16 %v282_v40, %v281_v39  ;;  %v507_v43 = vld [vmem:[#allocation18 + $0x8] sm:$0xff]  ;;  %v508_v45 = vld [vmem:[#allocation18 + $0x10] sm:$0xff]  ;;  %v509_v46 = vld [vmem:[#allocation18 + $0x18] sm:$0xff]  ;;  %v7526_v33 = vsub.s32 0, %v358_v26 }
  0x92   :  { %6193 = vmatprep.subr.bf16.mxu0 %v8898_v0  ;;  %v7455_v44 = vpack.c.bf16 %v507_v43, %v506_v42  ;;  %v7460_v47 = vpack.c.bf16 %v509_v46, %v508_v45  ;;  %v510_v48 = vld [vmem:[#allocation18 + $0x20] sm:$0xff]  ;;  %v511_v49 = vld [vmem:[#allocation18 + $0x28] sm:$0xff]  ;;  %v512_v51 = vld [vmem:[#allocation18 + $0x30] sm:$0xff] }
  0x93   :  { %6174 = vmatpush3.bf16.msra.mxu1 %v7410_v15  ;;  %v7466_v50 = vpack.c.bf16 %v511_v49, %v510_v48  ;;  %v513_v52 = vld [vmem:[#allocation18 + $0x38] sm:$0xff]  ;;  %v421_v54 = vld [vmem:[#allocation16 + $0x40] sm:$0xff]  ;;  %v422_v55 = vld [vmem:[#allocation16 + $0x48] sm:$0xff] }
  0x94   :  { %6175 = vmatprep.subr.bf16.mxu1 %v8898_v0  ;;  %v7471_v53 = vpack.c.bf16 %v513_v52, %v512_v51  ;;  %v7475_v56 = vpack.c.bf16 %v422_v55, %v421_v54  ;;  %v514_v57 = vld [vmem:[#allocation18 + $0x40] sm:$0xff]  ;;  %v515_v58 = vld [vmem:[#allocation18 + $0x48] sm:$0xff]  ;;  %v423_v60 = vld [vmem:[#allocation16 + $0x50] sm:$0xff] }
  0x95   :  { %6195 = vmatpush3.bf16.msra.mxu0 %v7423_v25  ;;  %v7477_v59 = vpack.c.bf16 %v515_v58, %v514_v57  ;;  %v424_v61 = vld [vmem:[#allocation16 + $0x58] sm:$0xff]  ;;  %v516_v63 = vld [vmem:[#allocation18 + $0x50] sm:$0xff]  ;;  %v425_v4 = vld [vmem:[#allocation16 + $0x60] sm:$0xff] }
  0x96   :  { %6196 = vmatprep.subr.bf16.mxu0 %v8898_v0  ;;  %v7482_v62 = vpack.c.bf16 %v424_v61, %v423_v60  ;;  %v517_v2 = vld [vmem:[#allocation18 + $0x58] sm:$0xff]  ;;  %v426_v6 = vld [vmem:[#allocation16 + $0x68] sm:$0xff]  ;;  %v518_v9 = vld [vmem:[#allocation18 + $0x60] sm:$0xff] }
  0x97   :  { %6177 = vmatpush3.bf16.msra.mxu1 %v7418_v22  ;;  %v7485_v3 = vpack.c.bf16 %v517_v2, %v516_v63  ;;  %v7490_v8 = vpack.c.bf16 %v426_v6, %v425_v4  ;;  %v519_v10 = vld [vmem:[#allocation18 + $0x68] sm:$0xff]  ;;  %v427_v13 = vld [vmem:[#allocation16 + $0x70] sm:$0xff]  ;;  %v428_v14 = vld [vmem:[#allocation16 + $0x78] sm:$0xff] }
  0x98   :  { %6178 = vmatprep.subr.bf16.mxu1 %v8898_v0  ;;  %v7493_v11 = vpack.c.bf16 %v519_v10, %v518_v9  ;;  %v7498_v16 = vpack.c.bf16 %v428_v14, %v427_v13  ;;  %v520_v17 = vld [vmem:[#allocation18 + $0x70] sm:$0xff]  ;;  %v521_v18 = vld [vmem:[#allocation18 + $0x78] sm:$0xff]  ;;  %v651_v55 = vld [vmem:[#allocation19] sm:$0xff] }
  0x99   :  { %6198 = vmatpush3.bf16.msra.mxu0 %v7433_v31  ;;  %v7501_v20 = vpack.c.bf16 %v521_v18, %v520_v17  ;;  %v7515_v27 = vld [vmem:[%s8943_s26] sm:$0x1]  ;;  %v652_v57 = vld [vmem:[#allocation19 + $0x8] sm:$0xff]  ;;  %v654_v6 = vld [vmem:[#allocation19 + $0x18] sm:$0xff] }
  0x9a   :  { %6199 = vmatprep.subr.bf16.mxu0 %v8898_v0  ;;  %v7520_v29 = vld [vmem:[%s8944_s25] ss:$0 sm:$0xff]  ;;  %v355_v32 = vmul.f32 0.0, %v7515_v27  ;;  %v7549_v61 = vpack.c.bf16 %v652_v57, %v651_v55  ;;  %v655_v13 = vld [vmem:[#allocation19 + $0x20] sm:$0xff]  ;;  %v656_v14 = vld [vmem:[#allocation19 + $0x28] sm:$0xff] }
  0x9b   :  { %6180 = vmatpush3.bf16.msra.mxu1 %v7429_v28  ;;  %v160_v30 = vld [vmem:[%s8876_s5] sm:$0x1]  ;;  %v7568_v17 = vpack.c.bf16 %v656_v14, %v655_v13  ;;  %v659_v24 = vld [vmem:[#allocation19 + $0x40] sm:$0xff]  ;;  %v660_v26 = vld [vmem:[#allocation19 + $0x48] sm:$0xff] }
  0x9c   :  { %6181 = vmatprep.subr.bf16.mxu1 %v8898_v0  ;;  %v164_v36 = vsub.f32 1.0, %v160_v30  ;;  %v360_v39 = vrot.slane %v355_v32, %v7526_v33  ;;  %v7531_v40 = vrot.slane %v160_v30, %v7526_v33  ;;  %v7544_v58 = vld [vmem:[%s8878_s7] ss:$0 sm:$0xff]  ;;  %v7577_v30 = vpack.c.bf16 %v660_v26, %v659_v24  ;;  %v792_v55 = vld [vmem:[#allocation10 + $0x8] sm:$0xff] }
  0x9d   :  { %6201 = vmatpush3.bf16.msra.mxu0 %v7441_v37  ;;  %v653_v4 = vld [vmem:[#allocation19 + $0x10] sm:$0xff] }
  0x9e   :  { %6202 = vmatprep.subr.bf16.mxu0 %v8898_v0  ;;  %v7534_v45 = vrot.slane %v164_v36, %v7526_v33  ;;  %v370_v49 = vmul.f32 0.0, %v7531_v40  ;;  %v7562_v10 = vpack.c.bf16 %v654_v6, %v653_v4  ;;  %v657_v18 = vld [vmem:[#allocation19 + $0x30] sm:$0xff]  ;;  %8946 = vst [vmem:[#allocation31_spill] sm:$0xff] %v7577_v30 }
  0x9f   :  { %6183 = vmatpush3.bf16.msra.mxu1 %v7437_v34  ;;  %v661_v36 = vld [vmem:[#allocation19 + $0x50] sm:$0xff] }
  0xa0   :  { %6184 = vmatprep.subr.bf16.mxu1 %v8898_v0 }
  0xa1   :  { %6204 = vmatpush3.bf16.msra.mxu0 %v7475_v56 }
  0xa2   :  { %6205 = vmatprep.subr.bf16.mxu0 %v8898_v0 }
  0xa3   :  { %6186 = vmatpush3.bf16.msra.mxu1 %v7445_v38 }
  0xa4   :  { %6187 = vmatprep.subr.bf16.mxu1 %v8898_v0 }
  0xa5   :  { %6207 = vmatpush3.bf16.msra.mxu0 %v7482_v62 }
  0xa6   :  { %6208 = vmatprep.subr.bf16.mxu0 %v8898_v0 }
  0xa7   :  { %6189 = vmatpush3.bf16.msra.mxu1 %v7451_v41 }
  0xa8   :  { %6214 = vmatprep.subr.bf16.mxu1 %v8898_v0 }
  0xa9   :  { %6210 = vmatpush3.bf16.msra.mxu0 %v7490_v8 }
  0xaa   :  { %5027 = vmatmul.mubr.f32.vlgmr.msra.gmra.mrb[0].mxu1 %v8900_v1  ;;  %6211 = vmatprep.subr.bf16.mxu0 %v8898_v0 }
  0xab   :  { %6216 = vmatpush3.bf16.msra.mxu1 %v7455_v44  ;;  %5096 = vmatprep.mubr.msk.f32.mxu1 %vm7175_vm0, %v8900_v1 }
  0xac   :  { %6217 = vmatprep.subr.bf16.mxu1 %v8898_v0 }
  0xad   :  { %6213 = vmatpush3.bf16.msra.mxu0 %v7498_v16 }
  0xae   :  { %6238 = vmatprep.subr.bf16.mxu0 %v8898_v0 }
  0xaf   :  { %6219 = vmatpush3.bf16.msra.mxu1 %v7460_v47 }
  0xb0   :  { %6220 = vmatprep.subr.bf16.mxu1 %v8898_v0 }
  0xb3   :  { %6222 = vmatpush3.bf16.msra.mxu1 %v7466_v50 }
  0xb4   :  { %6223 = vmatprep.subr.bf16.mxu1 %v8898_v0 }
  0xb7   :  { %6225 = vmatpush3.bf16.msra.mxu1 %v7471_v53 }
  0xb8   :  { %6226 = vmatprep.subr.bf16.mxu1 %v8898_v0 }
  0xbb   :  { %6228 = vmatpush3.bf16.msra.mxu1 %v7477_v59 }
  0xbc   :  { %6229 = vmatprep.subr.bf16.mxu1 %v8898_v0 }
  0xbf   :  { %6231 = vmatpush3.bf16.msra.mxu1 %v7485_v3 }
  0xc0   :  { %6232 = vmatprep.subr.bf16.mxu1 %v8898_v0 }
  0xc3   :  { %6234 = vmatpush3.bf16.msra.mxu1 %v7493_v11 }
  0xc4   :  { %6235 = vmatprep.subr.bf16.mxu1 %v8898_v0 }
  0xc7   :  { %6237 = vmatpush3.bf16.msra.mxu1 %v7501_v20 }
  0xc8   :  { %6262 = vmatprep.subr.bf16.mxu1 %v8898_v0 }
  0xca   :  { %5097 = vmatmul.mubr.f32.vlgmr.msra.gmra.mrb[2].mxu1 %v8900_v1 }
  0xcb   :  { %6264 = vmatpush3.bf16.msra.mxu1 %v7407_v12  ;;  %5138 = vmatprep.mubr.msk.f32.mxu1 %vm7175_vm0, %v8900_v1 }
  0xcc   :  { %6289 = vmatprep.subr.bf16.mxu1 %v8898_v0 }
  0xce   :  { %5139 = vmatmul.mubr.msk.f32.vlgmr.msra.gmra.mrb[4].mxu1 %vm192_vm1, %v792_v55 }
  0xcf   :  { %6291 = vmatpush3.bf16.msra.mxu1 %v7414_v19  ;;  %5208 = vmatprep.mubr.msk.f32.mxu1 %vm7175_vm0, %v8900_v1  ;;  %v7615_v19 = vld [vmem:[%s8882_s11] sm:$0x1] }
  0xd0   :  { %6292 = vmatprep.subr.bf16.mxu1 %v8898_v0 }
  0xd3   :  { %6294 = vmatpush3.bf16.msra.mxu1 %v7423_v25  ;;  %v167_v25 = vld [vmem:[%s8883_s12] sm:$0x1] }
  0xd4   :  { %6295 = vmatprep.subr.bf16.mxu1 %v8898_v0  ;;  %v171_v57 = vsub.f32 1.0, %v167_v25 }
  0xd6   :  { %v7632_v24 = vrot.slane %v171_v57, %v7526_v33 }
  0xd7   :  { %6297 = vmatpush3.bf16.msra.mxu1 %v7433_v31  ;;  %v593_v31 = vmul.f32 0.0, %v7615_v19 }
  0xd8   :  { %6298 = vmatprep.subr.bf16.mxu1 %v8898_v0 }
  0xd9   :  { %v598_v14 = vrot.slane %v593_v31, %v7526_v33  ;;  %v174_v31 = vld [vmem:[%s8888_s17] sm:$0x1] }
  0xda   :  { %v177_v57 = vsub.f32 1.0, %v174_v31 }
  0xdb   :  { %6300 = vmatpush3.bf16.msra.mxu1 %v7441_v37  ;;  %v7624_v37 = vld [vmem:[%s8880_s9] ss:$0 sm:$0xff] }
  0xdc   :  { %6301 = vmatprep.subr.bf16.mxu1 %v8898_v0 }
  0xdf   :  { %6303 = vmatpush3.bf16.msra.mxu1 %v7475_v56 }
  0xe0   :  { %6304 = vmatprep.subr.bf16.mxu1 %v8898_v0 }
  0xe3   :  { %6306 = vmatpush3.bf16.msra.mxu1 %v7482_v62 }
  0xe4   :  { %6307 = vmatprep.subr.bf16.mxu1 %v8898_v0 }
  0xe7   :  { %6309 = vmatpush3.bf16.msra.mxu1 %v7490_v8 }
  0xe8   :  { %6310 = vmatprep.subr.bf16.mxu1 %v8898_v0 }
  0xeb   :  { %6312 = vmatpush3.bf16.msra.mxu1 %v7498_v16 }
  0xec   :  { %6337 = vmatprep.subr.bf16.mxu1 %v8898_v0 }
 0x163   :  { %v262_v21 = vpop.f32.mrb[0].mxu0 }
 0x164   :  { %v4993_v23 = vpop.f32.mrb[1].mxu0  ;;  %v263_v35 = vadd.f32 %v7520_v29, %v262_v21  ;;  %v658_v21 = vld [vmem:[#allocation19 + $0x38] sm:$0xff] }
 0x165   :  { %v7572_v23 = vpack.c.bf16 %v658_v21, %v657_v18  ;;  %v7629_v18 = vrot.slane %v167_v25, %v7526_v33 }
 0x167   :  { %8945 = vst [vmem:[#allocation30_spill] sm:$0xff] %v7572_v23 }
 0x17d   :  { %v349_v42 = vpop.f32.mrb[0].mxu1 }
 0x17e   :  { %v353_v43 = vadd.f32 %v349_v42, %v263_v35  ;;  %v5028_v46 = vpop.f32.mrb[1].mxu1 }
 0x17f   :  { %v664_v46 = vld [vmem:[#allocation19 + $0x68] sm:$0xff] }
 0x180   :  { %v362_v48 = vadd.f32 %v360_v39, %v353_v43  ;;  %v662_v39 = vld [vmem:[#allocation19 + $0x58] sm:$0xff]  ;;  %v663_v43 = vld [vmem:[#allocation19 + $0x60] sm:$0xff] }
 0x181   :  { %v7581_v42 = vpack.c.bf16 %v662_v39, %v661_v36 }
 0x182   :  { %v377_v51 = vmul.f32 %v7534_v45, %v362_v48  ;;  %v7585_v48 = vpack.c.bf16 %v664_v46, %v663_v43  ;;  %v7642_v46 = vld [vmem:[%s8885_s14] ss:$0 sm:$0xff] }
 0x183   :  { %8947 = vst [vmem:[#allocation32_spill] sm:$0xff] %v7581_v42 }
 0x184   :  { %v7538_v52 = vadd.f32 %v377_v51, %v370_v49  ;;  %8948 = vst [vmem:[#allocation33_spill] sm:$0xff] %v7585_v48  ;;  %v665_v49 = vld [vmem:[#allocation19 + $0x70] sm:$0xff]  ;;  %v666_v51 = vld [vmem:[#allocation19 + $0x78] sm:$0xff] }
 0x186   :  { %v4416_v54 = vadd.f32 -0.01, %v7538_v52 }
 0x188   :  { %vm383_vm2 = vcmp.ge.f32.partialorder %v4416_v54, 0.0  ;;  %v7589_v54 = vpack.c.bf16 %v666_v51, %v665_v49 }
 0x189   :  { %v7547_v60 = vsel %vm383_vm2, 1.0, %v8900_v1 }
 0x18a   :  { %v7552_v63 = vmul.f32 0.01, %v7547_v60  ;;  %v7556_v2 = vmul.f32 %v7544_v58, %v7547_v60  ;;  %8949 = vst [vmem:[#allocation34_spill] sm:$0xff] %v7589_v54 }
 0x18c   :  { %5062 = vmatmul.mubr.f32.vlgmr.msra.gmra.mrb[2].mxu0 %v7556_v2 }
 0x18d   :  { %6240 = vmatpush3.bf16.msra.mxu0 %v7549_v61  ;;  %5131 = vmatprep.mubr.msk.f32.mxu0 %vm7175_vm0, %v8900_v1 }
 0x18e   :  { %6241 = vmatprep.subr.bf16.mxu0 %v8898_v0 }
 0x191   :  { %6243 = vmatpush3.bf16.msra.mxu0 %v7562_v10 }
 0x192   :  { %6244 = vmatprep.subr.bf16.mxu0 %v8898_v0 }
 0x195   :  { %6246 = vmatpush3.bf16.msra.mxu0 %v7568_v17 }
 0x196   :  { %6247 = vmatprep.subr.bf16.mxu0 %v8898_v0 }
 0x199   :  { %6249 = vmatpush3.bf16.msra.mxu0 %v7572_v23 }
 0x19a   :  { %6250 = vmatprep.subr.bf16.mxu0 %v8898_v0 }
 0x19d   :  { %v588_v32 = vpop.f32.mrb[2].mxu1  ;;  %6252 = vmatpush3.bf16.msra.mxu0 %v7577_v30 }
 0x19e   :  { %v5098_v35 = vpop.f32.mrb[3].mxu1  ;;  %6253 = vmatprep.subr.bf16.mxu0 %v8898_v0 }
 0x19f   :  { %v608_v35 = vmul.f32 0.0, %v7629_v18 }
 0x1a1   :  { %6255 = vmatpush3.bf16.msra.mxu0 %v7581_v42 }
 0x1a2   :  { %6256 = vmatprep.subr.bf16.mxu0 %v8898_v0 }
 0x1a5   :  { %6258 = vmatpush3.bf16.msra.mxu0 %v7585_v48 }
 0x1a6   :  { %6259 = vmatprep.subr.bf16.mxu0 %v8898_v0 }
 0x1a9   :  { %6261 = vmatpush3.bf16.msra.mxu0 %v7589_v54 }
 0x1aa   :  { %6265 = vmatprep.subr.bf16.mxu0 %v8898_v0 }
 0x25f   :  { %v501_v4 = vpop.f32.mrb[2].mxu0 }
 0x260   :  { %v502_v6 = vadd.f32 %v7624_v37, %v501_v4  ;;  %v5063_v13 = vpop.f32.mrb[3].mxu0  ;;  %v7699_v4 = vrot.slane %v174_v31, %v7526_v33  ;;  %v7739_v31 = vrot.slane %v7515_v27, %v7526_v33 }
 0x262   :  { %v592_v21 = vadd.f32 %v588_v32, %v502_v6  ;;  %v7704_v6 = vld [vmem:[%s8887_s16] ss:$0 sm:$0xff] }
 0x264   :  { %v600_v26 = vadd.f32 %v598_v14, %v592_v21  ;;  %v750_v21 = vmul.f32 0.0, %v7699_v4 }
 0x266   :  { %v615_v36 = vmul.f32 %v7632_v24, %v600_v26 }
 0x268   :  { %v7636_v39 = vadd.f32 %v615_v36, %v608_v35 }
 0x26a   :  { %v4417_v43 = vadd.f32 -0.01, %v7636_v39 }
 0x26c   :  { %vm621_vm3 = vcmp.ge.f32.partialorder %v4417_v43, 0.0 }
 0x26d   :  { %v7645_v32 = vsel %vm621_vm3, 1.0, %v8900_v1 }
 0x26e   :  { %v7648_v49 = vmul.f32 0.01, %v7645_v32  ;;  %v649_v51 = vmul.f32 %v7642_v46, %v7645_v32 }
 0x270   :  { %5132 = vmatmul.mubr.f32.vlgmr.msra.gmra.mrb[4].mxu0 %v649_v51 }
 0x271   :  { %6267 = vmatpush3.bf16.msra.mxu0 %v7401_v5  ;;  %5173 = vmatprep.mubr.msk.f32.mxu0 %vm7175_vm0, %v8900_v1 }
 0x272   :  { %6268 = vmatprep.subr.bf16.mxu0 %v8898_v0 }
 0x275   :  { %6270 = vmatpush3.bf16.msra.mxu0 %v7404_v7 }
 0x276   :  { %6271 = vmatprep.subr.bf16.mxu0 %v8898_v0 }
 0x279   :  { %6273 = vmatpush3.bf16.msra.mxu0 %v7410_v15 }
 0x27a   :  { %6274 = vmatprep.subr.bf16.mxu0 %v8898_v0 }
 0x27d   :  { %6276 = vmatpush3.bf16.msra.mxu0 %v7418_v22 }
 0x27e   :  { %6277 = vmatprep.subr.bf16.mxu0 %v8898_v0 }
 0x281   :  { %6279 = vmatpush3.bf16.msra.mxu0 %v7429_v28 }
 0x282   :  { %6280 = vmatprep.subr.bf16.mxu0 %v8898_v0 }
 0x285   :  { %6282 = vmatpush3.bf16.msra.mxu0 %v7437_v34 }
 0x286   :  { %6283 = vmatprep.subr.bf16.mxu0 %v8898_v0 }
 0x289   :  { %6285 = vmatpush3.bf16.msra.mxu0 %v7445_v38 }
 0x28a   :  { %6286 = vmatprep.subr.bf16.mxu0 %v8898_v0 }
 0x28d   :  { %6288 = vmatpush3.bf16.msra.mxu0 %v7451_v41 }
 0x28e   :  { %6313 = vmatprep.subr.bf16.mxu0 %v8898_v0 }
 0x290   :  { %5174 = vmatmul.mubr.f32.vlgmr.msra.gmra.mrb[6].mxu0 %v7556_v2  ;;  %v864_v2 = vpop.f32.mrb[4].mxu1 }
 0x291   :  { %6315 = vmatpush3.bf16.msra.mxu0 %v7455_v44  ;;  %5243 = vmatprep.mubr.msk.f32.mxu0 %vm7175_vm0, %v8900_v1  ;;  %v5140_v25 = vpop.f32.mrb[5].mxu1 }
 0x292   :  { %6316 = vmatprep.subr.bf16.mxu0 %v8898_v0 }
 0x295   :  { %6318 = vmatpush3.bf16.msra.mxu0 %v7460_v47 }
 0x296   :  { %6319 = vmatprep.subr.bf16.mxu0 %v8898_v0 }
 0x299   :  { %6321 = vmatpush3.bf16.msra.mxu0 %v7466_v50 }
 0x29a   :  { %6322 = vmatprep.subr.bf16.mxu0 %v8898_v0 }
 0x29d   :  { %6324 = vmatpush3.bf16.msra.mxu0 %v7471_v53 }
 0x29e   :  { %6325 = vmatprep.subr.bf16.mxu0 %v8898_v0 }
 0x2a1   :  { %6327 = vmatpush3.bf16.msra.mxu0 %v7477_v59 }
 0x2a2   :  { %6328 = vmatprep.subr.bf16.mxu0 %v8898_v0 }
 0x2a5   :  { %6330 = vmatpush3.bf16.msra.mxu0 %v7485_v3 }
 0x2a6   :  { %6331 = vmatprep.subr.bf16.mxu0 %v8898_v0 }
 0x2a9   :  { %6333 = vmatpush3.bf16.msra.mxu0 %v7493_v11 }
 0x2aa   :  { %6334 = vmatprep.subr.bf16.mxu0 %v8898_v0 }
 0x2ad   :  { %6336 = vmatpush3.bf16.msra.mxu0 %v7501_v20 }
 0x2ae   :  { %6361 = vmatprep.subr.bf16.mxu0 %v8898_v0 }
 0x2b0   :  { %5244 = vmatmul.mubr.f32.vlgmr.msra.gmra.mrb[8].mxu0 %v649_v51 }
 0x2b1   :  { %6363 = vmatpush3.bf16.msra.mxu0 %v7407_v12  ;;  %5285 = vmatprep.mubr.msk.f32.mxu0 %vm7175_vm0, %v8900_v1  ;;  %v7707_v12 = vrot.slane %v177_v57, %v7526_v33  ;;  %v161_v57 = vld [vmem:[%s8877_s6] sm:$0x1] }
 0x2b2   :  { %6388 = vmatprep.subr.bf16.mxu0 %v8898_v0 }
 0x2b3   :  { %8950 = vst [vmem:[#allocation35_spill] sm:$0xff] %v7707_v12 }
 0x343   :  { %v739_v13 = vpop.f32.mrb[4].mxu0 }
 0x344   :  { %v740_v14 = vadd.f32 %v7704_v6, %v739_v13  ;;  %v5133_v26 = vpop.f32.mrb[5].mxu0  ;;  %v165_v13 = vsub.f32 1.0, %v161_v57 }
 0x346   :  { %v757_v35 = vmul.f32 %v7707_v12, %v740_v14  ;;  %786 = vst [vmem:[#allocation22] sm:$0xff] %v740_v14  ;;  %v7728_v14 = vrot.slane %v165_v13, %v7526_v33 }
 0x348   :  { %v7712_v36 = vadd.f32 %v757_v35, %v750_v21  ;;  %v7731_v21 = vrot.slane %v161_v57, %v7526_v33  ;;  %v402_v26 = vmul.f32 %v7547_v60, %v7728_v14  ;;  %v8953_v57 = vsub.f32 %v7538_v52, %v7552_v63 }
 0x34a   :  { %8951 = vst [vmem:[#allocation36_spill] sm:$0xff] %v7712_v36  ;;  %v4418_v43 = vadd.f32 -0.01, %v7712_v36  ;;  %v395_v35 = vmul.f32 0.0, %v7731_v21  ;;  %v966_v60 = vmul.f32 %v8953_v57, %v7531_v40  ;;  %v168_v57 = vld [vmem:[%s8884_s13] sm:$0x1] }
 0x34c   :  { %vm763_vm4 = vcmp.ge.f32.partialorder %v4418_v43, 0.0  ;;  %v865_v43 = vadd.f32 %v7520_v29, %v864_v2  ;;  %v403_v55 = vadd.f32 %v402_v26, %v395_v35  ;;  %v8954_v26 = vmov 0.0  }
 0x34d   :  { %v7716_v51 = vsel %vm763_vm4, 1.0, %v8900_v1 }
 0x34e   :  { %v7719_v25 = vmul.f32 0.01, %v7716_v51  ;;  %785 = vst [vmem:[#allocation21] sm:$0xff] %v7716_v51  ;;  %v970_v12 = vmul.f32 1.8, %v403_v55  ;;  %v979_v52 = vmul.f32 %v403_v55, %v7731_v21 }
 0x350   :  { %8952 = vst [vmem:[#allocation37_spill] sm:$0xff] %v7719_v25  ;;  %v971_v2 = vadd.f32 0.01, %v970_v12 }
 0x363   :  { %v951_v0 = vpop.f32.mrb[6].mxu0 }
 0x364   :  { %v955_v1 = vadd.f32 %v951_v0, %v865_v43  ;;  %v5175_v9 = vpop.f32.mrb[7].mxu0 }
 0x366   :  { %v964_v13 = vadd.f32 %v7739_v31, %v955_v1 }
 0x368   :  { %v967_v25 = vmul.f32 %v964_v13, %v7534_v45  ;;  %v1300_v13 = vld [vmem:[#allocation10 + $0x10] sm:$0xff] }
 0x369   :  { %5286 = vmatmul.mubr.msk.f32.vlgmr.msra.gmra.mrb[10].mxu0 %vm192_vm1, %v1300_v13  ;;  %v7798_v13 = vrot.slane %v7615_v19, %v7526_v33 }
 0x36a   :  { %v7747_v36 = vadd.f32 %v967_v25, %v966_v60  ;;  %v8955_v25 = vmov 0.0|0.0   ;;  %5355 = vmatprep.mubr.msk.f32.mxu0 %vm7175_vm0, %v8954_v26  ;;  %v172_v60 = vsub.f32 1.0, %v168_v57 }
 0x36c   :  { %v972_v27 = vsub.f32 %v7747_v36, %v971_v2 }
 0x36e   :  { %vm973_vm5 = vcmp.ge.f32.partialorder %v972_v27, 0.0  ;;  %v7791_v27 = vrot.slane %v172_v60, %v7526_v33  ;;  %v8956_v60 = vsub.f32 %v7636_v39, %v7648_v49 }
 0x36f   :  { %v4389_v35 = vsel %vm973_vm5, 1.0, %v8954_v26 }
 0x370   :  { %v7751_v0 = vmul.f32 %v4389_v35, %v971_v2  ;;  %v980_v1 = vmul.f32 %v4389_v35, %v7728_v14  ;;  %v7755_v9 = vmul.f32 %v4389_v35, %v7544_v58  ;;  %v7788_v2 = vrot.slane %v168_v57, %v7526_v33 }
 0x372   :  { %5209 = vmatmul.mubr.f32.vlgmr.msra.gmra.mrb[6].mxu1 %v7755_v9  ;;  %v7761_v12 = vadd.f32 %v980_v1, %v979_v52  ;;  %v633_v35 = vmul.f32 0.0, %v7788_v2  ;;  %v640_v1 = vmul.f32 %v7645_v32, %v7791_v27 }
 0x373   :  { %6339 = vmatpush3.bf16.msra.mxu1 %v7549_v61  ;;  %5278 = vmatprep.mubr.msk.f32.mxu1 %vm7175_vm0, %v8954_v26 }
 0x374   :  { %6340 = vmatprep.subr.bf16.mxu1 %v8955_v25 }
 0x377   :  { %6342 = vmatpush3.bf16.msra.mxu1 %v7562_v10 }
 0x378   :  { %6343 = vmatprep.subr.bf16.mxu1 %v8955_v25 }
 0x37b   :  { %6345 = vmatpush3.bf16.msra.mxu1 %v7568_v17 }
 0x37c   :  { %6346 = vmatprep.subr.bf16.mxu1 %v8955_v25 }
 0x37f   :  { %6348 = vmatpush3.bf16.msra.mxu1 %v7572_v23 }
 0x380   :  { %6349 = vmatprep.subr.bf16.mxu1 %v8955_v25 }
 0x383   :  { %v1154_v55 = vpop.f32.mrb[8].mxu0  ;;  %6351 = vmatpush3.bf16.msra.mxu1 %v7577_v30  ;;  %v1168_v30 = vmul.f32 %v8956_v60, %v7629_v18  ;;  %v8960_v60 = vld [vmem:[#allocation37_spill] sm:$0xff] }
 0x384   :  { %v5245_v43 = vpop.f32.mrb[9].mxu0  ;;  %6352 = vmatprep.subr.bf16.mxu1 %v8955_v25 }
 0x385   :  { %v641_v43 = vadd.f32 %v640_v1, %v633_v35 }
 0x387   :  { %6354 = vmatpush3.bf16.msra.mxu1 %v7581_v42  ;;  %v1172_v42 = vmul.f32 1.8, %v641_v43 }
 0x388   :  { %6355 = vmatprep.subr.bf16.mxu1 %v8955_v25 }
 0x389   :  { %v1173_v35 = vadd.f32 0.01, %v1172_v42 }
 0x38b   :  { %6357 = vmatpush3.bf16.msra.mxu1 %v7585_v48 }
 0x38c   :  { %6358 = vmatprep.subr.bf16.mxu1 %v8955_v25 }
 0x38f   :  { %6360 = vmatpush3.bf16.msra.mxu1 %v7589_v54 }
 0x390   :  { %6364 = vmatprep.subr.bf16.mxu1 %v8955_v25 }
 0x445   :  { %v1067_v52 = vpop.f32.mrb[6].mxu1 }
 0x446   :  { %v1068_v63 = vadd.f32 %v7624_v37, %v1067_v52  ;;  %v5210_v54 = vpop.f32.mrb[7].mxu1 }
 0x448   :  { %v1158_v48 = vadd.f32 %v1154_v55, %v1068_v63 }
 0x44a   :  { %v1166_v57 = vadd.f32 %v7798_v13, %v1158_v48  ;;  %v1181_v48 = vmul.f32 %v641_v43, %v7788_v2 }
 0x44c   :  { %v1169_v32 = vmul.f32 %v1166_v57, %v7632_v24  ;;  %v8959_v57 = vld [vmem:[#allocation36_spill] sm:$0xff] }
 0x44e   :  { %v7807_v23 = vadd.f32 %v1169_v32, %v1168_v30  ;;  %v8961_v32 = vsub.f32 %v8959_v57, %v8960_v60  ;;  %v8965_v60 = vld [vmem:[#allocation31_spill] sm:$0xff] }
 0x450   :  { %v1174_v19 = vsub.f32 %v7807_v23, %v1173_v35 }
 0x452   :  { %vm1175_vm6 = vcmp.ge.f32.partialorder %v1174_v19, 0.0  ;;  %v8962_v19 = vld [vmem:[#allocation35_spill] sm:$0xff] }
 0x453   :  { %v4390_v1 = vsel %vm1175_vm6, 1.0, %v8954_v26 }
 0x454   :  { %v7811_v54 = vmul.f32 %v4390_v1, %v1173_v35  ;;  %v1182_v63 = vmul.f32 %v4390_v1, %v7791_v27  ;;  %v1185_v55 = vmul.f32 %v4390_v1, %v7642_v46  ;;  %v1274_v35 = vmul.f32 %v8961_v32, %v7699_v4  ;;  %v8966_v32 = vld [vmem:[#allocation32_spill] sm:$0xff] }
 0x456   :  { %v7816_v39 = vadd.f32 %v1182_v63, %v1181_v48  ;;  %5279 = vmatmul.mubr.f32.vlgmr.msra.gmra.mrb[8].mxu1 %v1185_v55  ;;  %v1179_v30 = vsub.f32 %v7807_v23, %v7811_v54 }
 0x457   :  { %6366 = vmatpush3.bf16.msra.mxu1 %v7401_v5  ;;  %5320 = vmatprep.mubr.msk.f32.mxu1 %vm7175_vm0, %v8954_v26  ;;  %v1493_v5 = vld [vmem:[#allocation16] sm:$0xff] }
 0x458   :  { %6367 = vmatprep.subr.bf16.mxu1 %v8955_v25  ;;  %v1689_v23 = vmul.f32 %v7816_v39, %v7788_v2 }
 0x45b   :  { %6369 = vmatpush3.bf16.msra.mxu1 %v7404_v7  ;;  %v1494_v7 = vld [vmem:[#allocation16 + $0x8] sm:$0xff] }
 0x45c   :  { %6370 = vmatprep.subr.bf16.mxu1 %v8955_v25 }
 0x45f   :  { %6372 = vmatpush3.bf16.msra.mxu1 %v7410_v15  ;;  %v1495_v15 = vld [vmem:[#allocation16 + $0x10] sm:$0xff] }
 0x460   :  { %6373 = vmatprep.subr.bf16.mxu1 %v8955_v25 }
 0x463   :  { %6375 = vmatpush3.bf16.msra.mxu1 %v7418_v22  ;;  %v7859_v22 = vpack.c.bf16 %v1494_v7, %v1493_v5 }
 0x464   :  { %6376 = vmatprep.subr.bf16.mxu1 %v8955_v25 }
 0x465   :  { %6390 = vmatpush3.bf16.msra.mxu0 %v7859_v22 }
 0x466   :  { %6391 = vmatprep.subr.bf16.mxu0 %v8955_v25 }
 0x467   :  { %6378 = vmatpush3.bf16.msra.mxu1 %v7429_v28  ;;  %v1496_v28 = vld [vmem:[#allocation16 + $0x18] sm:$0xff] }
 0x468   :  { %6379 = vmatprep.subr.bf16.mxu1 %v8955_v25 }
 0x46b   :  { %6381 = vmatpush3.bf16.msra.mxu1 %v7437_v34  ;;  %v7862_v34 = vpack.c.bf16 %v1496_v28, %v1495_v15 }
 0x46c   :  { %6382 = vmatprep.subr.bf16.mxu1 %v8955_v25 }
 0x46d   :  { %6393 = vmatpush3.bf16.msra.mxu0 %v7862_v34 }
 0x46e   :  { %6394 = vmatprep.subr.bf16.mxu0 %v8955_v25 }
 0x46f   :  { %6384 = vmatpush3.bf16.msra.mxu1 %v7445_v38  ;;  %v1497_v38 = vld [vmem:[#allocation16 + $0x20] sm:$0xff] }
 0x470   :  { %6385 = vmatprep.subr.bf16.mxu1 %v8955_v25 }
 0x473   :  { %6387 = vmatpush3.bf16.msra.mxu1 %v7451_v41  ;;  %v1498_v41 = vld [vmem:[#allocation16 + $0x28] sm:$0xff] }
 0x474   :  { %6412 = vmatprep.subr.bf16.mxu1 %v8955_v25 }
 0x476   :  { %5321 = vmatmul.mubr.f32.vlgmr.msra.gmra.mrb[10].mxu1 %v7755_v9 }
 0x477   :  { %6414 = vmatpush3.bf16.msra.mxu1 %v7455_v44  ;;  %5390 = vmatprep.mubr.msk.f32.mxu1 %vm7175_vm0, %v8954_v26  ;;  %v7866_v44 = vpack.c.bf16 %v1498_v41, %v1497_v38 }
 0x478   :  { %6415 = vmatprep.subr.bf16.mxu1 %v8955_v25 }
 0x479   :  { %6396 = vmatpush3.bf16.msra.mxu0 %v7866_v44 }
 0x47a   :  { %6397 = vmatprep.subr.bf16.mxu0 %v8955_v25 }
 0x47b   :  { %6417 = vmatpush3.bf16.msra.mxu1 %v7460_v47  ;;  %v1499_v47 = vld [vmem:[#allocation16 + $0x30] sm:$0xff] }
 0x47c   :  { %6418 = vmatprep.subr.bf16.mxu1 %v8955_v25 }
 0x47f   :  { %6420 = vmatpush3.bf16.msra.mxu1 %v7466_v50  ;;  %v1500_v50 = vld [vmem:[#allocation16 + $0x38] sm:$0xff] }
 0x480   :  { %6421 = vmatprep.subr.bf16.mxu1 %v8955_v25 }
 0x483   :  { %6423 = vmatpush3.bf16.msra.mxu1 %v7471_v53  ;;  %v7870_v53 = vpack.c.bf16 %v1500_v50, %v1499_v47 }
 0x484   :  { %6424 = vmatprep.subr.bf16.mxu1 %v8955_v25 }
 0x485   :  { %6399 = vmatpush3.bf16.msra.mxu0 %v7870_v53 }
 0x486   :  { %6400 = vmatprep.subr.bf16.mxu0 %v8955_v25 }
 0x487   :  { %6426 = vmatpush3.bf16.msra.mxu1 %v7477_v59  ;;  %v1372_v59 = vpop.f32.mrb[10].mxu0 }
 0x488   :  { %6427 = vmatprep.subr.bf16.mxu1 %v8955_v25  ;;  %v1373_v38 = vadd.f32 %v7520_v29, %v1372_v59 }
 0x489   :  { %6402 = vmatpush3.bf16.msra.mxu0 %v7475_v56 }
 0x48a   :  { %6403 = vmatprep.subr.bf16.mxu0 %v8955_v25 }
 0x48b   :  { %6429 = vmatpush3.bf16.msra.mxu1 %v7485_v3  ;;  %v5287_v3 = vpop.f32.mrb[11].mxu0 }
 0x48c   :  { %6430 = vmatprep.subr.bf16.mxu1 %v8955_v25 }
 0x48d   :  { %6405 = vmatpush3.bf16.msra.mxu0 %v7482_v62 }
 0x48e   :  { %6406 = vmatprep.subr.bf16.mxu0 %v8955_v25 }
 0x48f   :  { %6432 = vmatpush3.bf16.msra.mxu1 %v7493_v11  ;;  %v175_v11 = vld [vmem:[%s8889_s18] sm:$0x1] }
 0x490   :  { %6433 = vmatprep.subr.bf16.mxu1 %v8955_v25  ;;  %v7890_v62 = vrot.slane %v175_v11, %v7526_v33 }
 0x491   :  { %6408 = vmatpush3.bf16.msra.mxu0 %v7490_v8 }
 0x492   :  { %6409 = vmatprep.subr.bf16.mxu0 %v8955_v25  ;;  %8958 = vst [vmem:[#allocation39_spill] sm:$0xff] %v7890_v62  ;;  %v775_v42 = vmul.f32 0.0, %v7890_v62 }
 0x493   :  { %6435 = vmatpush3.bf16.msra.mxu1 %v7501_v20  ;;  %v178_v20 = vsub.f32 1.0, %v175_v11  ;;  %v1478_v11 = vmul.f32 1.8, %v7761_v12 }
 0x494   :  { %6460 = vmatprep.subr.bf16.mxu1 %v8955_v25 }
 0x495   :  { %6411 = vmatpush3.bf16.msra.mxu0 %v7498_v16  ;;  %v7887_v56 = vrot.slane %v178_v20, %v7526_v33  ;;  %v8963_v20 = vsub.f32 %v7747_v36, %v7751_v0  ;;  %v1487_v36 = vmul.f32 %v7761_v12, %v7731_v21 }
 0x496   :  { %5391 = vmatmul.mubr.f32.vlgmr.msra.gmra.mrb[12].mxu1 %v1185_v55  ;;  %6436 = vmatprep.subr.bf16.mxu0 %v8955_v25 }
 0x497   :  { %5432 = vmatprep.mubr.msk.f32.mxu1 %vm7175_vm0, %v8954_v26  ;;  %8957 = vst [vmem:[#allocation38_spill] sm:$0xff] %v7887_v56  ;;  %v782_v8 = vmul.f32 %v7716_v51, %v7887_v56 }
 0x499   :  { %v783_v49 = vadd.f32 %v782_v8, %v775_v42  ;;  %v1474_v8 = vmul.f32 %v8963_v20, %v7531_v40 }
 0x49b   :  { %v1278_v52 = vmul.f32 1.8, %v783_v49  ;;  %v1287_v7 = vmul.f32 %v783_v49, %v7890_v62 }
 0x49d   :  { %v1279_v48 = vadd.f32 0.01, %v1278_v52 }
 0x529   :  { %v1269_v16 = vpop.f32.mrb[8].mxu1 }
 0x52a   :  { %v1270_v9 = vadd.f32 %v7704_v6, %v1269_v16  ;;  %v5280_v43 = vpop.f32.mrb[9].mxu1  ;;  %v1479_v16 = vadd.f32 0.01, %v1478_v11 }
 0x52c   :  { %v1275_v1 = vmul.f32 %v1270_v9, %v8962_v19  ;;  %1294 = vst [vmem:[#allocation22 + $0x8] sm:$0xff] %v1270_v9 }
 0x52e   :  { %v7901_v33 = vadd.f32 %v1275_v1, %v1274_v35  ;;  %v1809_v35 = vld [vmem:[#allocation13] sm:$0xff]  ;;  %v1810_v1 = vld [vmem:[#allocation13 + $0x8] sm:$0xff] }
 0x530   :  { %v1280_v51 = vsub.f32 %v7901_v33, %v1279_v48 }
 0x532   :  { %vm1281_vm7 = vcmp.ge.f32.partialorder %v1280_v51, 0.0  ;;  %v1808_v51 = vld [vmem:[#allocation10 + $0x18] sm:$0xff] }
 0x533   :  { %v4391_v63 = vsel %vm1281_vm7, 1.0, %v8954_v26 }
 0x534   :  { %v7905_v55 = vmul.f32 %v4391_v63, %v1279_v48  ;;  %v1288_v5 = vmul.f32 %v4391_v63, %v7887_v56  ;;  %1292 = vst [vmem:[#allocation21 + $0x8] sm:$0xff] %v4391_v63  ;;  %v7956_v48 = vpack.c.bf16 %v1810_v1, %v1809_v35  ;;  %v1893_v35 = vld [vmem:[#allocation15 + $0x40] sm:$0xff]  ;;  %v1894_v1 = vld [vmem:[#allocation15 + $0x48] sm:$0xff] }
 0x536   :  { %v1285_v15 = vsub.f32 %v7901_v33, %v7905_v55  ;;  %v7911_v28 = vadd.f32 %v1288_v5, %v1287_v7  ;;  %6462 = vmatpush3.bf16.msra.mxu1 %v7956_v48 }
 0x537   :  { %6487 = vmatprep.subr.bf16.mxu1 %v8955_v25 }
 0x538   :  { %v1795_v33 = vmul.f32 %v7911_v28, %v7890_v62 }
 0x539   :  { %5433 = vmatmul.mubr.msk.f32.vlgmr.msra.gmra.mrb[14].mxu1 %vm192_vm1, %v1808_v51  ;;  %v8013_v51 = vpack.c.bf16 %v1894_v1, %v1893_v35  ;;  %v2097_v35 = vld [vmem:[#allocation18 + $0x48] sm:$0xff] }
 0x53a   :  { %6489 = vmatpush3.bf16.msra.mxu1 %v7859_v22  ;;  %5502 = vmatprep.mubr.msk.f32.mxu1 %vm7175_vm0, %v8954_v26 }
 0x53b   :  { %6490 = vmatprep.subr.bf16.mxu1 %v8955_v25 }
 0x53e   :  { %6492 = vmatpush3.bf16.msra.mxu1 %v7862_v34 }
 0x53f   :  { %6493 = vmatprep.subr.bf16.mxu1 %v8955_v25 }
 0x542   :  { %6495 = vmatpush3.bf16.msra.mxu1 %v7866_v44 }
 0x543   :  { %6496 = vmatprep.subr.bf16.mxu1 %v8955_v25 }
 0x546   :  { %6498 = vmatpush3.bf16.msra.mxu1 %v7870_v53 }
 0x547   :  { %6499 = vmatprep.subr.bf16.mxu1 %v8955_v25 }
 0x549   :  { %v1459_v41 = vpop.f32.mrb[10].mxu1 }
 0x54a   :  { %v1463_v47 = vadd.f32 %v1459_v41, %v1373_v38  ;;  %v5322_v50 = vpop.f32.mrb[11].mxu1 }
 0x54b   :  { %v1676_v50 = vmul.f32 %v1179_v30, %v7629_v18 }
 0x54c   :  { %v1472_v3 = vadd.f32 %v1463_v47, %v7739_v31  ;;  %v1680_v47 = vmul.f32 1.8, %v7816_v39  ;;  %v1890_v39 = vld [vmem:[#allocation15 + $0x28] sm:$0xff] }
 0x54e   :  { %v1475_v42 = vmul.f32 %v1472_v3, %v7534_v45  ;;  %v1681_v20 = vadd.f32 0.01, %v1680_v47 }
 0x550   :  { %v7921_v49 = vadd.f32 %v1475_v42, %v1474_v8  ;;  %v1885_v42 = vld [vmem:[#allocation15] sm:$0xff] }
 0x552   :  { %v1480_v9 = vsub.f32 %v7921_v49, %v1479_v16 }
 0x554   :  { %vm1481_vm8 = vcmp.ge.f32.partialorder %v1480_v9, 0.0 }
 0x555   :  { %v4393_v29 = vsel %vm1481_vm8, 1.0, %v8954_v26 }
 0x556   :  { %v7925_v59 = vmul.f32 %v4393_v29, %v1479_v16  ;;  %v1488_v52 = vmul.f32 %v4393_v29, %v7728_v14  ;;  %v7929_v43 = vmul.f32 %v4393_v29, %v7544_v58  ;;  %v8964_v58 = vld [vmem:[#allocation30_spill] sm:$0xff] }
 0x558   :  { %v1485_v0 = vsub.f32 %v7921_v49, %v7925_v59  ;;  %5356 = vmatmul.mubr.f32.vlgmr.msra.gmra.mrb[12].mxu0 %v7929_v43  ;;  %v7936_v57 = vadd.f32 %v1488_v52, %v1487_v36  ;;  %v1887_v52 = vld [vmem:[#allocation15 + $0x10] sm:$0xff]  ;;  %v1888_v36 = vld [vmem:[#allocation15 + $0x18] sm:$0xff] }
 0x559   :  { %6438 = vmatpush3.bf16.msra.mxu0 %v7549_v61  ;;  %5425 = vmatprep.mubr.msk.f32.mxu0 %vm7175_vm0, %v8954_v26  ;;  %v8131_v49 = vld [vmem:[%s8878_s7] ss:$0 sm:$0xff] }
 0x55a   :  { %6439 = vmatprep.subr.bf16.mxu0 %v8955_v25 }
 0x55d   :  { %6441 = vmatpush3.bf16.msra.mxu0 %v7562_v10  ;;  %v8967_v10 = vld [vmem:[#allocation33_spill] sm:$0xff] }
 0x55e   :  { %6442 = vmatprep.subr.bf16.mxu0 %v8955_v25 }
 0x561   :  { %6444 = vmatpush3.bf16.msra.mxu0 %v7568_v17  ;;  %v8968_v17 = vld [vmem:[#allocation34_spill] sm:$0xff] }
 0x562   :  { %6445 = vmatprep.subr.bf16.mxu0 %v8955_v25 }
 0x565   :  { %6447 = vmatpush3.bf16.msra.mxu0 %v8964_v58 }
 0x566   :  { %6448 = vmatprep.subr.bf16.mxu0 %v8955_v25 }
 0x569   :  { %v1662_v12 = vpop.f32.mrb[12].mxu1  ;;  %6450 = vmatpush3.bf16.msra.mxu0 %v8965_v60  ;;  %v7999_v60 = vpack.c.bf16 %v1888_v36, %v1887_v52  ;;  %v2092_v52 = vld [vmem:[#allocation18 + $0x20] sm:$0xff]  ;;  %v2093_v36 = vld [vmem:[#allocation18 + $0x28] sm:$0xff] }
 0x56a   :  { %v5392_v61 = vpop.f32.mrb[13].mxu1  ;;  %6451 = vmatprep.subr.bf16.mxu0 %v8955_v25 }
 0x56d   :  { %6453 = vmatpush3.bf16.msra.mxu0 %v8966_v32  ;;  %v1891_v32 = vld [vmem:[#allocation15 + $0x30] sm:$0xff] }
 0x56e   :  { %6454 = vmatprep.subr.bf16.mxu0 %v8955_v25 }
 0x571   :  { %6456 = vmatpush3.bf16.msra.mxu0 %v8967_v10  ;;  %v1892_v10 = vld [vmem:[#allocation15 + $0x38] sm:$0xff] }
 0x572   :  { %6457 = vmatprep.subr.bf16.mxu0 %v8955_v25 }
 0x575   :  { %6459 = vmatpush3.bf16.msra.mxu0 %v8968_v17  ;;  %v8009_v17 = vpack.c.bf16 %v1892_v10, %v1891_v32  ;;  %v2095_v32 = vld [vmem:[#allocation18 + $0x38] sm:$0xff]  ;;  %v2096_v10 = vld [vmem:[#allocation18 + $0x40] sm:$0xff] }
 0x576   :  { %6463 = vmatprep.subr.bf16.mxu0 %v8955_v25  ;;  %v8048_v1 = vpack.c.bf16 %v2097_v35, %v2096_v10  ;;  %v2011_v10 = vld [vmem:[#allocation16 + $0x50] sm:$0xff]  ;;  %v2012_v35 = vld [vmem:[#allocation16 + $0x58] sm:$0xff] }
 0x62b   :  { %v1575_v63 = vpop.f32.mrb[12].mxu0 }
 0x62c   :  { %v1576_v5 = vadd.f32 %v7624_v37, %v1575_v63  ;;  %v5357_v7 = vpop.f32.mrb[13].mxu0  ;;  %v1886_v37 = vld [vmem:[#allocation15 + $0x8] sm:$0xff]  ;;  %v1895_v63 = vld [vmem:[#allocation15 + $0x50] sm:$0xff] }
 0x62d   :  { %v7983_v9 = vpack.c.bf16 %v1886_v37, %v1885_v42  ;;  %v2089_v42 = vld [vmem:[#allocation18 + $0x8] sm:$0xff] }
 0x62e   :  { %v1666_v38 = vadd.f32 %v1662_v12, %v1576_v5  ;;  %v1896_v5 = vld [vmem:[#allocation15 + $0x58] sm:$0xff] }
 0x62f   :  { %v8017_v7 = vpack.c.bf16 %v1896_v5, %v1895_v63  ;;  %v2098_v63 = vld [vmem:[#allocation18 + $0x50] sm:$0xff]  ;;  %v2099_v5 = vld [vmem:[#allocation18 + $0x58] sm:$0xff] }
 0x630   :  { %v1674_v41 = vadd.f32 %v1666_v38, %v7798_v13  ;;  %v1897_v38 = vld [vmem:[#allocation15 + $0x60] sm:$0xff] }
 0x632   :  { %v1677_v3 = vmul.f32 %v1674_v41, %v7632_v24  ;;  %v1898_v41 = vld [vmem:[#allocation15 + $0x68] sm:$0xff] }
 0x633   :  { %v8021_v47 = vpack.c.bf16 %v1898_v41, %v1897_v38  ;;  %v8052_v38 = vpack.c.bf16 %v2099_v5, %v2098_v63  ;;  %v2100_v41 = vld [vmem:[#allocation18 + $0x60] sm:$0xff]  ;;  %v2014_v5 = vld [vmem:[#allocation16 + $0x68] sm:$0xff] }
 0x634   :  { %v7979_v11 = vadd.f32 %v1677_v3, %v1676_v50  ;;  %v1899_v50 = vld [vmem:[#allocation15 + $0x70] sm:$0xff]  ;;  %v1900_v3 = vld [vmem:[#allocation15 + $0x78] sm:$0xff]  ;;  %v2013_v63 = vld [vmem:[#allocation16 + $0x60] sm:$0xff] }
 0x636   :  { %v1682_v8 = vsub.f32 %v7979_v11, %v1681_v20 }
 0x638   :  { %vm1683_vm9 = vcmp.ge.f32.partialorder %v1682_v8, 0.0  ;;  %v2088_v8 = vld [vmem:[#allocation18] sm:$0xff] }
 0x639   :  { %v4394_v16 = vsel %vm1683_vm9, 1.0, %v8954_v26  ;;  %v8029_v37 = vpack.c.bf16 %v2089_v42, %v2088_v8  ;;  %v2102_v8 = vld [vmem:[#allocation18 + $0x70] sm:$0xff]  ;;  %v2103_v42 = vld [vmem:[#allocation18 + $0x78] sm:$0xff] }
 0x63a   :  { %v7985_v29 = vmul.f32 %v4394_v16, %v1681_v20  ;;  %v1690_v54 = vmul.f32 %v4394_v16, %v7791_v27  ;;  %v7991_v30 = vmul.f32 %v4394_v16, %v7642_v46  ;;  %v1889_v46 = vld [vmem:[#allocation15 + $0x20] sm:$0xff]  ;;  %v8025_v20 = vpack.c.bf16 %v1900_v3, %v1899_v50  ;;  %v2090_v16 = vld [vmem:[#allocation18 + $0x10] sm:$0xff]  ;;  %v2101_v50 = vld [vmem:[#allocation18 + $0x68] sm:$0xff] }
 0x63b   :  { %v8005_v61 = vpack.c.bf16 %v1890_v39, %v1889_v46  ;;  %v8040_v46 = vpack.c.bf16 %v2093_v36, %v2092_v52  ;;  %v2094_v39 = vld [vmem:[#allocation18 + $0x30] sm:$0xff]  ;;  %v8056_v3 = vpack.c.bf16 %v2101_v50, %v2100_v41  ;;  %v2009_v52 = vld [vmem:[#allocation16 + $0x40] sm:$0xff]  ;;  %v2010_v36 = vld [vmem:[#allocation16 + $0x48] sm:$0xff]  ;;  %v8078_v41 = vpack.c.bf16 %v2014_v5, %v2013_v63 }
 0x63c   :  { %v7993_v58 = vadd.f32 %v1690_v54, %v1689_v23  ;;  %5426 = vmatmul.mubr.f32.vlgmr.msra.gmra.mrb[14].mxu0 %v7991_v30  ;;  %v2091_v23 = vld [vmem:[#allocation18 + $0x18] sm:$0xff]  ;;  %v2015_v50 = vld [vmem:[#allocation16 + $0x70] sm:$0xff] }
 0x63d   :  { %6465 = vmatpush3.bf16.msra.mxu0 %v7983_v9  ;;  %5467 = vmatprep.mubr.msk.f32.mxu0 %vm7175_vm0, %v8954_v26  ;;  %v8034_v54 = vpack.c.bf16 %v2091_v23, %v2090_v16  ;;  %v8060_v16 = vpack.c.bf16 %v2103_v42, %v2102_v8  ;;  %v1880_v23 = vpop.f32.mrb[14].mxu1  ;;  %8970 = vst [vmem:[#allocation37_spill] sm:$0xff] %v8078_v41  ;;  %v2016_v8 = vld [vmem:[#allocation16 + $0x78] sm:$0xff] }
 0x63e   :  { %6466 = vmatprep.subr.bf16.mxu0 %v8955_v25  ;;  %v8082_v42 = vpack.c.bf16 %v2016_v8, %v2015_v50 }
 0x640   :  { %8971 = vst [vmem:[#allocation35_spill] sm:$0xff] %v8082_v42 }
 0x641   :  { %6468 = vmatpush3.bf16.msra.mxu0 %v7999_v60 }
 0x642   :  { %6469 = vmatprep.subr.bf16.mxu0 %v8955_v25 }
 0x645   :  { %6471 = vmatpush3.bf16.msra.mxu0 %v8005_v61 }
 0x646   :  { %6472 = vmatprep.subr.bf16.mxu0 %v8955_v25 }
 0x649   :  { %6474 = vmatpush3.bf16.msra.mxu0 %v8009_v17 }
 0x64a   :  { %6475 = vmatprep.subr.bf16.mxu0 %v8955_v25 }
 0x64d   :  { %6477 = vmatpush3.bf16.msra.mxu0 %v8013_v51 }
 0x64e   :  { %6478 = vmatprep.subr.bf16.mxu0 %v8955_v25 }
 0x651   :  { %6480 = vmatpush3.bf16.msra.mxu0 %v8017_v7 }
 0x652   :  { %6481 = vmatprep.subr.bf16.mxu0 %v8955_v25 }
 0x655   :  { %6483 = vmatpush3.bf16.msra.mxu0 %v8021_v47 }
 0x656   :  { %6484 = vmatprep.subr.bf16.mxu0 %v8955_v25 }
 0x659   :  { %6486 = vmatpush3.bf16.msra.mxu0 %v8025_v20 }
 0x65a   :  { %6511 = vmatprep.subr.bf16.mxu0 %v8955_v25 }
 0x65c   :  { %5468 = vmatmul.mubr.f32.vlgmr.msra.gmra.mrb[16].mxu0 %v7929_v43  ;;  %v8044_v43 = vpack.c.bf16 %v2095_v32, %v2094_v39  ;;  %v5434_v39 = vpop.f32.mrb[15].mxu1  ;;  %v8070_v32 = vpack.c.bf16 %v2010_v36, %v2009_v52 }
 0x65d   :  { %6513 = vmatpush3.bf16.msra.mxu0 %v8029_v37  ;;  %5537 = vmatprep.mubr.msk.f32.mxu0 %vm7175_vm0, %v8954_v26  ;;  %v1786_v39 = vmul.f32 1.8, %v7911_v28  ;;  %v1982_v28 = vmul.f32 %v1485_v0, %v7531_v40  ;;  %v2205_v0 = vld [vmem:[#allocation19 + $0x10] sm:$0xff] }
 0x65e   :  { %6514 = vmatprep.subr.bf16.mxu0 %v8955_v25  ;;  %6501 = vmatpush3.bf16.msra.mxu1 %v8070_v32 }
 0x65f   :  { %6502 = vmatprep.subr.bf16.mxu1 %v8955_v25  ;;  %v1787_v50 = vadd.f32 0.01, %v1786_v39 }
 0x661   :  { %6516 = vmatpush3.bf16.msra.mxu0 %v8034_v54 }
 0x662   :  { %6517 = vmatprep.subr.bf16.mxu0 %v8955_v25 }
 0x665   :  { %6519 = vmatpush3.bf16.msra.mxu0 %v8040_v46 }
 0x666   :  { %6520 = vmatprep.subr.bf16.mxu0 %v8955_v25 }
 0x669   :  { %6522 = vmatpush3.bf16.msra.mxu0 %v8044_v43 }
 0x66a   :  { %6523 = vmatprep.subr.bf16.mxu0 %v8955_v25 }
 0x66d   :  { %6525 = vmatpush3.bf16.msra.mxu0 %v8048_v1 }
 0x66e   :  { %6526 = vmatprep.subr.bf16.mxu0 %v8955_v25 }
 0x671   :  { %6528 = vmatpush3.bf16.msra.mxu0 %v8052_v38 }
 0x672   :  { %6529 = vmatprep.subr.bf16.mxu0 %v8955_v25 }
 0x675   :  { %6531 = vmatpush3.bf16.msra.mxu0 %v8056_v3 }
 0x676   :  { %6532 = vmatprep.subr.bf16.mxu0 %v8955_v25 }
 0x679   :  { %6534 = vmatpush3.bf16.msra.mxu0 %v8060_v16 }
 0x67a   :  { %6559 = vmatprep.subr.bf16.mxu0 %v8955_v25 }
 0x67c   :  { %5538 = vmatmul.mubr.f32.vlgmr.msra.gmra.mrb[18].mxu0 %v7991_v30  ;;  %v8074_v30 = vpack.c.bf16 %v2012_v35, %v2011_v10  ;;  %v1782_v35 = vmul.f32 %v1285_v15, %v7699_v4 }
 0x67d   :  { %6561 = vmatpush3.bf16.msra.mxu0 %v7956_v48  ;;  %5579 = vmatprep.mubr.msk.f32.mxu0 %vm7175_vm0, %v8954_v26 }
 0x67e   :  { %6586 = vmatprep.subr.bf16.mxu0 %v8955_v25  ;;  %8969 = vst [vmem:[#allocation36_spill] sm:$0xff] %v8074_v30  ;;  %6504 = vmatpush3.bf16.msra.mxu1 %v8074_v30 }
 0x67f   :  { %6505 = vmatprep.subr.bf16.mxu1 %v8955_v25 }
 0x682   :  { %6507 = vmatpush3.bf16.msra.mxu1 %v8078_v41 }
 0x683   :  { %6508 = vmatprep.subr.bf16.mxu1 %v8955_v25 }
 0x686   :  { %6510 = vmatpush3.bf16.msra.mxu1 %v8082_v42 }
 0x687   :  { %6535 = vmatprep.subr.bf16.mxu1 %v8955_v25 }
 0x70f   :  { %v1777_v52 = vpop.f32.mrb[14].mxu0 }
 0x710   :  { %v1778_v36 = vadd.f32 %v7704_v6, %v1777_v52  ;;  %v5427_v10 = vpop.f32.mrb[15].mxu0 }
 0x712   :  { %v1783_v63 = vmul.f32 %v1778_v36, %v8962_v19  ;;  %1802 = vst [vmem:[#allocation22 + $0x10] sm:$0xff] %v1778_v36  ;;  %v8109_v36 = vld [vmem:[%s8944_s25] ss:$0 sm:$0xff] }
 0x713   :  { %8972 = vst [vmem:[#allocation30_spill] sm:$0xff] %v8109_v36  ;;  %v1881_v39 = vadd.f32 %v8109_v36, %v1880_v23  ;;  %v2203_v23 = vld [vmem:[#allocation19] sm:$0xff]  ;;  %v2204_v36 = vld [vmem:[#allocation19 + $0x8] sm:$0xff] }
 0x714   :  { %v8093_v5 = vadd.f32 %v1783_v63, %v1782_v35 }
 0x716   :  { %v1788_v8 = vsub.f32 %v8093_v5, %v1787_v50 }
 0x718   :  { %vm1789_vm10 = vcmp.ge.f32.partialorder %v1788_v8, 0.0 }
 0x719   :  { %v4395_v12 = vsel %vm1789_vm10, 1.0, %v8954_v26 }
 0x71a   :  { %v8097_v6 = vmul.f32 %v4395_v12, %v1787_v50  ;;  %v1796_v52 = vmul.f32 %v4395_v12, %v7887_v56  ;;  %1800 = vst [vmem:[#allocation21 + $0x10] sm:$0xff] %v4395_v12  ;;  %v1986_v50 = vmul.f32 1.8, %v7936_v57 }
 0x71c   :  { %v8104_v15 = vadd.f32 %v1796_v52, %v1795_v33  ;;  %v1987_v33 = vadd.f32 0.01, %v1986_v50 }
 0x72f   :  { %v1967_v10 = vpop.f32.mrb[16].mxu0 }
 0x730   :  { %v1971_v35 = vadd.f32 %v1967_v10, %v1881_v39  ;;  %v5469_v63 = vpop.f32.mrb[17].mxu0  ;;  %v8123_v10 = vpack.c.bf16 %v2204_v36, %v2203_v23  ;;  %v2209_v23 = vld [vmem:[#allocation19 + $0x30] sm:$0xff]  ;;  %v2212_v36 = vld [vmem:[#allocation19 + $0x48] sm:$0xff] }
 0x732   :  { %v1980_v12 = vadd.f32 %v1971_v35, %v7739_v31 }
 0x734   :  { %v1983_v8 = vmul.f32 %v1980_v12, %v7534_v45  ;;  %v2206_v12 = vld [vmem:[#allocation19 + $0x18] sm:$0xff] }
 0x736   :  { %v8119_v52 = vadd.f32 %v1983_v8, %v1982_v28  ;;  %v8144_v28 = vpack.c.bf16 %v2206_v12, %v2205_v0  ;;  %v2207_v8 = vld [vmem:[#allocation19 + $0x20] sm:$0xff] }
 0x738   :  { %v1988_v55 = vsub.f32 %v8119_v52, %v1987_v33  ;;  %8973 = vst [vmem:[#allocation31_spill] sm:$0xff] %v8144_v28 }
 0x73a   :  { %vm1989_vm11 = vcmp.ge.f32.partialorder %v1988_v55, 0.0  ;;  %v1995_v55 = vmul.f32 %v7936_v57, %v7731_v21 }
 0x73b   :  { %v4397_v39 = vsel %vm1989_vm11, 1.0, %v8954_v26 }
 0x73c   :  { %v8125_v35 = vmul.f32 %v4397_v39, %v1987_v33  ;;  %v1996_v63 = vmul.f32 %v4397_v39, %v7728_v14  ;;  %v8134_v59 = vmul.f32 %v8131_v49, %v4397_v39  ;;  %v2208_v33 = vld [vmem:[#allocation19 + $0x28] sm:$0xff]  ;;  %v2210_v39 = vld [vmem:[#allocation19 + $0x38] sm:$0xff] }
 0x73d   :  { %v8150_v57 = vpack.c.bf16 %v2208_v33, %v2207_v8  ;;  %v2213_v33 = vld [vmem:[#allocation19 + $0x50] sm:$0xff] }
 0x73e   :  { %5503 = vmatmul.mubr.f32.vlgmr.msra.gmra.mrb[16].mxu1 %v8134_v59  ;;  %v8141_v50 = vadd.f32 %v1996_v63, %v1995_v55  ;;  %v8154_v63 = vpack.c.bf16 %v2210_v39, %v2209_v23  ;;  %v2211_v55 = vld [vmem:[#allocation19 + $0x40] sm:$0xff] }
 0x73f   :  { %6537 = vmatpush3.bf16.msra.mxu1 %v8123_v10  ;;  %5572 = vmatprep.mubr.msk.f32.mxu1 %vm7175_vm0, %v8954_v26  ;;  %8974 = vst [vmem:[#allocation32_spill] sm:$0xff] %v8150_v57  ;;  %v8159_v8 = vpack.c.bf16 %v2212_v36, %v2211_v55  ;;  %v2215_v39 = vld [vmem:[#allocation19 + $0x60] sm:$0xff]  ;;  %v2217_v36 = vld [vmem:[#allocation19 + $0x70] sm:$0xff] }
 0x740   :  { %6538 = vmatprep.subr.bf16.mxu1 %v8955_v25  ;;  %8975 = vst [vmem:[#allocation33_spill] sm:$0xff] %v8154_v63 }
 0x743   :  { %6540 = vmatpush3.bf16.msra.mxu1 %v8144_v28 }
 0x744   :  { %6541 = vmatprep.subr.bf16.mxu1 %v8955_v25 }
 0x747   :  { %6543 = vmatpush3.bf16.msra.mxu1 %v8150_v57  ;;  %v2214_v57 = vld [vmem:[#allocation19 + $0x58] sm:$0xff] }
 0x748   :  { %6544 = vmatprep.subr.bf16.mxu1 %v8955_v25  ;;  %v8163_v23 = vpack.c.bf16 %v2214_v57, %v2213_v33  ;;  %v2316_v57 = vld [vmem:[#allocation10 + $0x20] sm:$0xff] }
 0x749   :  { %5580 = vmatmul.mubr.msk.f32.vlgmr.msra.gmra.mrb[20].mxu0 %vm192_vm1, %v2316_v57 }
 0x74a   :  { %8976 = vst [vmem:[#allocation34_spill] sm:$0xff] %v8163_v23  ;;  %6588 = vmatpush3.bf16.msra.mxu0 %v7859_v22  ;;  %5649 = vmatprep.mubr.msk.f32.mxu0 %vm7175_vm0, %v8954_v26 }
 0x74b   :  { %6546 = vmatpush3.bf16.msra.mxu1 %v8154_v63  ;;  %v2216_v63 = vld [vmem:[#allocation19 + $0x68] sm:$0xff]  ;;  %6589 = vmatprep.subr.bf16.mxu0 %v8955_v25 }
 0x74c   :  { %6547 = vmatprep.subr.bf16.mxu1 %v8955_v25  ;;  %v8167_v28 = vpack.c.bf16 %v2216_v63, %v2215_v39  ;;  %v2188_v39 = vmul.f32 1.8, %v7993_v58 }
 0x74e   :  { %8977 = vst [vmem:[#allocation40_spill] sm:$0xff] %v8167_v28  ;;  %6591 = vmatpush3.bf16.msra.mxu0 %v7862_v34  ;;  %v8197_v34 = vld [vmem:[%s8880_s9] ss:$0 sm:$0xff] }
 0x74f   :  { %v2170_v0 = vpop.f32.mrb[18].mxu0  ;;  %6549 = vmatpush3.bf16.msra.mxu1 %v8159_v8  ;;  %6592 = vmatprep.subr.bf16.mxu0 %v8955_v25 }
 0x750   :  { %v5539_v12 = vpop.f32.mrb[19].mxu0  ;;  %6550 = vmatprep.subr.bf16.mxu1 %v8955_v25 }
 0x751   :  { %v2218_v12 = vld [vmem:[#allocation19 + $0x78] sm:$0xff] }
 0x752   :  { %v8171_v55 = vpack.c.bf16 %v2218_v12, %v2217_v36  ;;  %6594 = vmatpush3.bf16.msra.mxu0 %v7866_v44  ;;  %v8979_v36 = vsub.f32 %v7979_v11, %v7985_v29  ;;  %v8219_v11 = vld [vmem:[%s8885_s14] ss:$0 sm:$0xff] }
 0x753   :  { %6552 = vmatpush3.bf16.msra.mxu1 %v8163_v23  ;;  %6595 = vmatprep.subr.bf16.mxu0 %v8955_v25 }
 0x754   :  { %6553 = vmatprep.subr.bf16.mxu1 %v8955_v25  ;;  %8978 = vst [vmem:[#allocation41_spill] sm:$0xff] %v8171_v55  ;;  %v2184_v12 = vmul.f32 %v8979_v36, %v7629_v18  ;;  %v2294_v36 = vmul.f32 1.8, %v8104_v15 }
 0x756   :  { %6597 = vmatpush3.bf16.msra.mxu0 %v7870_v53 }
 0x757   :  { %6555 = vmatpush3.bf16.msra.mxu1 %v8167_v28  ;;  %6598 = vmatprep.subr.bf16.mxu0 %v8955_v25 }
 0x758   :  { %6556 = vmatprep.subr.bf16.mxu1 %v8955_v25 }
 0x75a   :  { %6600 = vmatpush3.bf16.msra.mxu0 %v8070_v32 }
 0x75b   :  { %6558 = vmatpush3.bf16.msra.mxu1 %v8171_v55  ;;  %6601 = vmatprep.subr.bf16.mxu0 %v8955_v25 }
 0x75c   :  { %6562 = vmatprep.subr.bf16.mxu1 %v8955_v25 }
 0x75e   :  { %6603 = vmatpush3.bf16.msra.mxu0 %v8074_v30 }
 0x75f   :  { %6604 = vmatprep.subr.bf16.mxu0 %v8955_v25 }
 0x762   :  { %6606 = vmatpush3.bf16.msra.mxu0 %v8078_v41  ;;  %v2189_v41 = vadd.f32 0.01, %v2188_v39 }
 0x763   :  { %6607 = vmatprep.subr.bf16.mxu0 %v8955_v25 }
 0x766   :  { %6609 = vmatpush3.bf16.msra.mxu0 %v8082_v42 }
 0x767   :  { %6634 = vmatprep.subr.bf16.mxu0 %v8955_v25 }
 0x811   :  { %v2083_v22 = vpop.f32.mrb[16].mxu1 }
 0x812   :  { %v2084_v44 = vadd.f32 %v8197_v34, %v2083_v22  ;;  %v5504_v53 = vpop.f32.mrb[17].mxu1 }
 0x814   :  { %v2174_v63 = vadd.f32 %v2170_v0, %v2084_v44  ;;  %v2197_v44 = vmul.f32 %v7993_v58, %v7788_v2 }
 0x816   :  { %v2182_v33 = vadd.f32 %v2174_v63, %v7798_v13 }
 0x818   :  { %v2185_v57 = vmul.f32 %v2182_v33, %v7632_v24  ;;  %v8270_v33 = vld [vmem:[%s8887_s16] ss:$0 sm:$0xff] }
 0x81a   :  { %v8207_v42 = vadd.f32 %v2185_v57, %v2184_v12 }
 0x81c   :  { %v2190_v30 = vsub.f32 %v8207_v42, %v2189_v41  ;;  %v2388_v58 = vpop.f32.mrb[20].mxu0 }
 0x81e   :  { %vm2191_vm12 = vcmp.ge.f32.partialorder %v2190_v30, 0.0 }
 0x81f   :  { %v4398_v22 = vsel %vm2191_vm12, 1.0, %v8954_v26 }
 0x820   :  { %v8211_v0 = vmul.f32 %v4398_v22, %v2189_v41  ;;  %v2198_v53 = vmul.f32 %v4398_v22, %v7791_v27  ;;  %v2201_v29 = vmul.f32 %v8219_v11, %v4398_v22  ;;  %v5581_v41 = vpop.f32.mrb[21].mxu0 }
 0x822   :  { %v8222_v63 = vadd.f32 %v2198_v53, %v2197_v44  ;;  %5573 = vmatmul.mubr.f32.vlgmr.msra.gmra.mrb[18].mxu1 %v2201_v29  ;;  %v2295_v53 = vadd.f32 0.01, %v2294_v36 }
 0x823   :  { %6564 = vmatpush3.bf16.msra.mxu1 %v7983_v9  ;;  %5614 = vmatprep.mubr.msk.f32.mxu1 %vm7175_vm0, %v8954_v26 }
 0x824   :  { %6565 = vmatprep.subr.bf16.mxu1 %v8955_v25 }
 0x827   :  { %6567 = vmatpush3.bf16.msra.mxu1 %v7999_v60 }
 0x828   :  { %6568 = vmatprep.subr.bf16.mxu1 %v8955_v25 }
 0x82b   :  { %6570 = vmatpush3.bf16.msra.mxu1 %v8005_v61 }
 0x82c   :  { %6571 = vmatprep.subr.bf16.mxu1 %v8955_v25 }
 0x82f   :  { %6573 = vmatpush3.bf16.msra.mxu1 %v8009_v17 }
 0x830   :  { %6574 = vmatprep.subr.bf16.mxu1 %v8955_v25 }
 0x833   :  { %6576 = vmatpush3.bf16.msra.mxu1 %v8013_v51 }
 0x834   :  { %6577 = vmatprep.subr.bf16.mxu1 %v8955_v25 }
 0x837   :  { %6579 = vmatpush3.bf16.msra.mxu1 %v8017_v7 }
 0x838   :  { %6580 = vmatprep.subr.bf16.mxu1 %v8955_v25 }
 0x83b   :  { %6582 = vmatpush3.bf16.msra.mxu1 %v8021_v47 }
 0x83c   :  { %6583 = vmatprep.subr.bf16.mxu1 %v8955_v25 }
 0x83f   :  { %6585 = vmatpush3.bf16.msra.mxu1 %v8025_v20 }
 0x840   :  { %6610 = vmatprep.subr.bf16.mxu1 %v8955_v25 }
 0x842   :  { %5615 = vmatmul.mubr.f32.vlgmr.msra.gmra.mrb[20].mxu1 %v8134_v59 }
 0x843   :  { %6612 = vmatpush3.bf16.msra.mxu1 %v8029_v37  ;;  %5684 = vmatprep.mubr.msk.f32.mxu1 %vm7175_vm0, %v8954_v26 }
 0x844   :  { %6613 = vmatprep.subr.bf16.mxu1 %v8955_v25 }
 0x847   :  { %6615 = vmatpush3.bf16.msra.mxu1 %v8034_v54 }
 0x848   :  { %6616 = vmatprep.subr.bf16.mxu1 %v8955_v25 }
 0x84b   :  { %6618 = vmatpush3.bf16.msra.mxu1 %v8040_v46 }
 0x84c   :  { %6619 = vmatprep.subr.bf16.mxu1 %v8955_v25 }
 0x84f   :  { %6621 = vmatpush3.bf16.msra.mxu1 %v8044_v43 }
 0x850   :  { %6622 = vmatprep.subr.bf16.mxu1 %v8955_v25 }
 0x853   :  { %6624 = vmatpush3.bf16.msra.mxu1 %v8048_v1 }
 0x854   :  { %6625 = vmatprep.subr.bf16.mxu1 %v8955_v25 }
 0x857   :  { %6627 = vmatpush3.bf16.msra.mxu1 %v8052_v38 }
 0x858   :  { %6628 = vmatprep.subr.bf16.mxu1 %v8955_v25 }
 0x85b   :  { %6630 = vmatpush3.bf16.msra.mxu1 %v8056_v3 }
 0x85c   :  { %6631 = vmatprep.subr.bf16.mxu1 %v8955_v25 }
 0x85f   :  { %6633 = vmatpush3.bf16.msra.mxu1 %v8060_v16 }
 0x860   :  { %6658 = vmatprep.subr.bf16.mxu1 %v8955_v25 }
 0x862   :  { %5685 = vmatmul.mubr.f32.vlgmr.msra.gmra.mrb[22].mxu1 %v2201_v29 }
 0x863   :  { %6660 = vmatpush3.bf16.msra.mxu1 %v7956_v48  ;;  %5726 = vmatprep.mubr.msk.f32.mxu1 %vm7175_vm0, %v8954_v26  ;;  %v8980_v48 = vsub.f32 %v8093_v5, %v8097_v6  ;;  %v2303_v5 = vmul.f32 %v8104_v15, %v7890_v62 }
 0x864   :  { %6685 = vmatprep.subr.bf16.mxu1 %v8955_v25 }
 0x865   :  { %v2290_v57 = vmul.f32 %v8980_v48, %v7699_v4  ;;  %v8981_v48 = vld [vmem:[#allocation30_spill] sm:$0xff] }
 0x866   :  { %v2389_v36 = vadd.f32 %v8981_v48, %v2388_v58 }
 0x8f5   :  { %v2285_v59 = vpop.f32.mrb[18].mxu1 }
 0x8f6   :  { %v2286_v39 = vadd.f32 %v8270_v33, %v2285_v59  ;;  %v5574_v12 = vpop.f32.mrb[19].mxu1 }
 0x8f8   :  { %v2291_v22 = vmul.f32 %v2286_v39, %v8962_v19  ;;  %2310 = vst [vmem:[#allocation22 + $0x18] sm:$0xff] %v2286_v39 }
 0x8fa   :  { %v8279_v44 = vadd.f32 %v2291_v22, %v2290_v57 }
 0x8fc   :  { %v2296_v29 = vsub.f32 %v8279_v44, %v2295_v53 }
 0x8fe   :  { %vm2297_vm13 = vcmp.ge.f32.partialorder %v2296_v29, 0.0 }
 0x8ff   :  { %v4399_v41 = vsel %vm2297_vm13, 1.0, %v8954_v26 }
 0x900   :  { %v8283_v59 = vmul.f32 %v4399_v41, %v2295_v53  ;;  %v2304_v12 = vmul.f32 %v4399_v41, %v7887_v56  ;;  %2308 = vst [vmem:[#allocation21 + $0x18] sm:$0xff] %v4399_v41  ;;  %v2494_v53 = vmul.f32 1.8, %v8141_v50  ;;  %v8982_v41 = vsub.f32 %v8119_v52, %v8125_v35 }
 0x901   :  { %v2503_v52 = vmul.f32 %v8141_v50, %v7731_v21  ;;  %v8985_v50 = vld [vmem:[#allocation33_spill] sm:$0xff] }
 0x902   :  { %v8290_v39 = vadd.f32 %v2304_v12, %v2303_v5  ;;  %v2490_v56 = vmul.f32 %v8982_v41, %v7531_v40  ;;  %v2495_v12 = vadd.f32 0.01, %v2494_v53 }
 0x915   :  { %v2475_v57 = vpop.f32.mrb[20].mxu1 }
 0x916   :  { %v2479_v22 = vadd.f32 %v2475_v57, %v2389_v36  ;;  %v5616_v29 = vpop.f32.mrb[21].mxu1 }
 0x917   :  { %v8984_v29 = vld [vmem:[#allocation32_spill] sm:$0xff] }
 0x918   :  { %v2488_v30 = vadd.f32 %v2479_v22, %v7739_v31 }
 0x91a   :  { %v2491_v15 = vmul.f32 %v2488_v30, %v7534_v45  ;;  %v8983_v30 = vld [vmem:[#allocation31_spill] sm:$0xff] }
 0x91c   :  { %v8300_v62 = vadd.f32 %v2491_v15, %v2490_v56  ;;  %v2824_v15 = vld [vmem:[#allocation10 + $0x28] sm:$0xff]  ;;  %v8986_v56 = vsub.f32 %v8207_v42, %v8211_v0 }
 0x91d   :  { %5727 = vmatmul.mubr.msk.f32.vlgmr.msra.gmra.mrb[24].mxu1 %vm192_vm1, %v2824_v15 }
 0x91e   :  { %v2496_v5 = vsub.f32 %v8300_v62, %v2495_v12  ;;  %5796 = vmatprep.mubr.msk.f32.mxu1 %vm7175_vm0, %v8954_v26  ;;  %v2692_v6 = vmul.f32 %v8986_v56, %v7629_v18 }
 0x920   :  { %vm2497_vm14 = vcmp.ge.f32.partialorder %v2496_v5, 0.0 }
 0x921   :  { %v4401_v58 = vsel %vm2497_vm14, 1.0, %v8954_v26 }
 0x922   :  { %v8304_v36 = vmul.f32 %v4401_v58, %v2495_v12  ;;  %v2504_v57 = vmul.f32 %v4401_v58, %v7728_v14  ;;  %v8308_v22 = vmul.f32 %v8131_v49, %v4401_v58 }
 0x924   :  { %5650 = vmatmul.mubr.f32.vlgmr.msra.gmra.mrb[22].mxu0 %v8308_v22  ;;  %v8315_v35 = vadd.f32 %v2504_v57, %v2503_v52 }
 0x925   :  { %6636 = vmatpush3.bf16.msra.mxu0 %v8123_v10  ;;  %5719 = vmatprep.mubr.msk.f32.mxu0 %vm7175_vm0, %v8954_v26 }
 0x926   :  { %6637 = vmatprep.subr.bf16.mxu0 %v8955_v25 }
 0x929   :  { %6639 = vmatpush3.bf16.msra.mxu0 %v8983_v30 }
 0x92a   :  { %6640 = vmatprep.subr.bf16.mxu0 %v8955_v25 }
 0x92d   :  { %6642 = vmatpush3.bf16.msra.mxu0 %v8984_v29 }
 0x92e   :  { %6643 = vmatprep.subr.bf16.mxu0 %v8955_v25 }
 0x931   :  { %6645 = vmatpush3.bf16.msra.mxu0 %v8985_v50 }
 0x932   :  { %6646 = vmatprep.subr.bf16.mxu0 %v8955_v25 }
 0x935   :  { %v2678_v53 = vpop.f32.mrb[22].mxu1  ;;  %6648 = vmatpush3.bf16.msra.mxu0 %v8159_v8 }
 0x936   :  { %v5686_v41 = vpop.f32.mrb[23].mxu1  ;;  %6649 = vmatprep.subr.bf16.mxu0 %v8955_v25 }
 0x937   :  { %v2696_v41 = vmul.f32 1.8, %v8222_v63 }
 0x939   :  { %6651 = vmatpush3.bf16.msra.mxu0 %v8163_v23 }
 0x93a   :  { %6652 = vmatprep.subr.bf16.mxu0 %v8955_v25 }
 0x93d   :  { %6654 = vmatpush3.bf16.msra.mxu0 %v8167_v28  ;;  %v2697_v28 = vadd.f32 0.01, %v2696_v41 }
 0x93e   :  { %6655 = vmatprep.subr.bf16.mxu0 %v8955_v25 }
 0x941   :  { %6657 = vmatpush3.bf16.msra.mxu0 %v8171_v55 }
 0x942   :  { %6661 = vmatprep.subr.bf16.mxu0 %v8955_v25 }
 0x9f7   :  { %v2591_v12 = vpop.f32.mrb[22].mxu0 }
 0x9f8   :  { %v2592_v5 = vadd.f32 %v8197_v34, %v2591_v12  ;;  %v5651_v58 = vpop.f32.mrb[23].mxu0 }
 0x9fa   :  { %v2682_v57 = vadd.f32 %v2678_v53, %v2592_v5  ;;  %v2705_v5 = vmul.f32 %v8222_v63, %v7788_v2 }
 0x9fc   :  { %v2690_v52 = vadd.f32 %v2682_v57, %v7798_v13 }
 0x9fe   :  { %v2693_v55 = vmul.f32 %v2690_v52, %v7632_v24 }
 0xa00   :  { %v8346_v15 = vadd.f32 %v2693_v55, %v2692_v6  ;;  %v2802_v6 = vmul.f32 1.8, %v8290_v39 }
 0xa02   :  { %v2698_v23 = vsub.f32 %v8346_v15, %v2697_v28  ;;  %v2803_v41 = vadd.f32 0.01, %v2802_v6 }
 0xa04   :  { %vm2699_vm15 = vcmp.ge.f32.partialorder %v2698_v23, 0.0 }
 0xa05   :  { %v4402_v12 = vsel %vm2699_vm15, 1.0, %v8954_v26 }
 0xa06   :  { %v8350_v53 = vmul.f32 %v4402_v12, %v2697_v28  ;;  %v2706_v58 = vmul.f32 %v4402_v12, %v7791_v27  ;;  %v2709_v42 = vmul.f32 %v8219_v11, %v4402_v12  ;;  %v8989_v28 = vld [vmem:[#allocation35_spill] sm:$0xff] }
 0xa08   :  { %v8356_v0 = vadd.f32 %v2706_v58, %v2705_v5  ;;  %5720 = vmatmul.mubr.f32.vlgmr.msra.gmra.mrb[24].mxu0 %v2709_v42  ;;  %v2703_v55 = vsub.f32 %v8346_v15, %v8350_v53 }
 0xa09   :  { %6663 = vmatpush3.bf16.msra.mxu0 %v7983_v9  ;;  %5761 = vmatprep.mubr.msk.f32.mxu0 %vm7175_vm0, %v8954_v26  ;;  %v3017_v9 = vld [vmem:[#allocation16] sm:$0xff] }
 0xa0a   :  { %6664 = vmatprep.subr.bf16.mxu0 %v8955_v25  ;;  %v3213_v15 = vmul.f32 %v8356_v0, %v7788_v2 }
 0xa0d   :  { %6666 = vmatpush3.bf16.msra.mxu0 %v7999_v60  ;;  %v3018_v60 = vld [vmem:[#allocation16 + $0x8] sm:$0xff] }
 0xa0e   :  { %6667 = vmatprep.subr.bf16.mxu0 %v8955_v25 }
 0xa11   :  { %6669 = vmatpush3.bf16.msra.mxu0 %v8005_v61  ;;  %v3019_v61 = vld [vmem:[#allocation16 + $0x10] sm:$0xff] }
 0xa12   :  { %6670 = vmatprep.subr.bf16.mxu0 %v8955_v25 }
 0xa15   :  { %6672 = vmatpush3.bf16.msra.mxu0 %v8009_v17  ;;  %v8399_v17 = vpack.c.bf16 %v3018_v60, %v3017_v9  ;;  %v8992_v60 = vld [vmem:[#allocation39_spill] sm:$0xff] }
 0xa16   :  { %6673 = vmatprep.subr.bf16.mxu0 %v8955_v25 }
 0xa17   :  { %6687 = vmatpush3.bf16.msra.mxu1 %v8399_v17 }
 0xa18   :  { %6688 = vmatprep.subr.bf16.mxu1 %v8955_v25 }
 0xa19   :  { %6675 = vmatpush3.bf16.msra.mxu0 %v8013_v51  ;;  %v3020_v51 = vld [vmem:[#allocation16 + $0x18] sm:$0xff] }
 0xa1a   :  { %6676 = vmatprep.subr.bf16.mxu0 %v8955_v25 }
 0xa1d   :  { %6678 = vmatpush3.bf16.msra.mxu0 %v8017_v7  ;;  %v8402_v7 = vpack.c.bf16 %v3020_v51, %v3019_v61 }
 0xa1e   :  { %6679 = vmatprep.subr.bf16.mxu0 %v8955_v25 }
 0xa1f   :  { %6690 = vmatpush3.bf16.msra.mxu1 %v8402_v7 }
 0xa20   :  { %6691 = vmatprep.subr.bf16.mxu1 %v8955_v25 }
 0xa21   :  { %6681 = vmatpush3.bf16.msra.mxu0 %v8021_v47  ;;  %v3021_v47 = vld [vmem:[#allocation16 + $0x20] sm:$0xff] }
 0xa22   :  { %6682 = vmatprep.subr.bf16.mxu0 %v8955_v25 }
 0xa25   :  { %6684 = vmatpush3.bf16.msra.mxu0 %v8025_v20  ;;  %v3022_v20 = vld [vmem:[#allocation16 + $0x28] sm:$0xff] }
 0xa26   :  { %6709 = vmatprep.subr.bf16.mxu0 %v8955_v25 }
 0xa28   :  { %5762 = vmatmul.mubr.f32.vlgmr.msra.gmra.mrb[26].mxu0 %v8308_v22  ;;  %v8990_v22 = vsub.f32 %v8279_v44, %v8283_v59  ;;  %v2811_v44 = vmul.f32 %v8290_v39, %v8992_v60 }
 0xa29   :  { %6711 = vmatpush3.bf16.msra.mxu0 %v8029_v37  ;;  %5831 = vmatprep.mubr.msk.f32.mxu0 %vm7175_vm0, %v8954_v26  ;;  %v8406_v37 = vpack.c.bf16 %v3022_v20, %v3021_v47 }
 0xa2a   :  { %6712 = vmatprep.subr.bf16.mxu0 %v8955_v25  ;;  %v2798_v56 = vmul.f32 %v8990_v22, %v7699_v4 }
 0xa2b   :  { %6693 = vmatpush3.bf16.msra.mxu1 %v8406_v37 }
 0xa2c   :  { %6694 = vmatprep.subr.bf16.mxu1 %v8955_v25 }
 0xa2d   :  { %6714 = vmatpush3.bf16.msra.mxu0 %v8034_v54  ;;  %v3023_v54 = vld [vmem:[#allocation16 + $0x30] sm:$0xff] }
 0xa2e   :  { %6715 = vmatprep.subr.bf16.mxu0 %v8955_v25 }
 0xa31   :  { %6717 = vmatpush3.bf16.msra.mxu0 %v8040_v46  ;;  %v3024_v46 = vld [vmem:[#allocation16 + $0x38] sm:$0xff] }
 0xa32   :  { %6718 = vmatprep.subr.bf16.mxu0 %v8955_v25 }
 0xa35   :  { %6720 = vmatpush3.bf16.msra.mxu0 %v8044_v43  ;;  %v8410_v43 = vpack.c.bf16 %v3024_v46, %v3023_v54 }
 0xa36   :  { %6721 = vmatprep.subr.bf16.mxu0 %v8955_v25 }
 0xa37   :  { %6696 = vmatpush3.bf16.msra.mxu1 %v8410_v43 }
 0xa38   :  { %6697 = vmatprep.subr.bf16.mxu1 %v8955_v25 }
 0xa39   :  { %6723 = vmatpush3.bf16.msra.mxu0 %v8048_v1  ;;  %v2896_v1 = vpop.f32.mrb[24].mxu1 }
 0xa3a   :  { %6724 = vmatprep.subr.bf16.mxu0 %v8955_v25  ;;  %v2897_v51 = vadd.f32 %v8981_v48, %v2896_v1 }
 0xa3b   :  { %6699 = vmatpush3.bf16.msra.mxu1 %v8070_v32 }
 0xa3c   :  { %6700 = vmatprep.subr.bf16.mxu1 %v8955_v25 }
 0xa3d   :  { %6726 = vmatpush3.bf16.msra.mxu0 %v8052_v38  ;;  %v5728_v38 = vpop.f32.mrb[25].mxu1 }
 0xa3e   :  { %6727 = vmatprep.subr.bf16.mxu0 %v8955_v25  ;;  %v3002_v38 = vmul.f32 1.8, %v8315_v35 }
 0xa41   :  { %6729 = vmatpush3.bf16.msra.mxu0 %v8056_v3  ;;  %v8987_v3 = vld [vmem:[#allocation36_spill] sm:$0xff] }
 0xa42   :  { %6730 = vmatprep.subr.bf16.mxu0 %v8955_v25  ;;  %6702 = vmatpush3.bf16.msra.mxu1 %v8987_v3  ;;  %v8993_v3 = vsub.f32 %v8300_v62, %v8304_v36  ;;  %v3011_v62 = vmul.f32 %v8315_v35, %v7731_v21 }
 0xa43   :  { %6703 = vmatprep.subr.bf16.mxu1 %v8955_v25 }
 0xa45   :  { %6732 = vmatpush3.bf16.msra.mxu0 %v8060_v16  ;;  %v8988_v16 = vld [vmem:[#allocation37_spill] sm:$0xff] }
 0xa46   :  { %6757 = vmatprep.subr.bf16.mxu0 %v8955_v25  ;;  %6705 = vmatpush3.bf16.msra.mxu1 %v8988_v16  ;;  %v2998_v16 = vmul.f32 %v8993_v3, %v7531_v40 }
 0xa47   :  { %6706 = vmatprep.subr.bf16.mxu1 %v8955_v25 }
 0xa48   :  { %5832 = vmatmul.mubr.f32.vlgmr.msra.gmra.mrb[28].mxu0 %v2709_v42  ;;  %v8991_v42 = vld [vmem:[#allocation38_spill] sm:$0xff] }
 0xa49   :  { %5873 = vmatprep.mubr.msk.f32.mxu0 %vm7175_vm0, %v8954_v26 }
 0xa4a   :  { %6708 = vmatpush3.bf16.msra.mxu1 %v8989_v28 }
 0xa4b   :  { %6733 = vmatprep.subr.bf16.mxu1 %v8955_v25 }
 0xadb   :  { %v2793_v23 = vpop.f32.mrb[24].mxu0 }
 0xadc   :  { %v2794_v63 = vadd.f32 %v8270_v33, %v2793_v23  ;;  %v5721_v32 = vpop.f32.mrb[25].mxu0  ;;  %v3003_v23 = vadd.f32 0.01, %v3002_v38 }
 0xade   :  { %v2799_v57 = vmul.f32 %v2794_v63, %v8962_v19  ;;  %2818 = vst [vmem:[#allocation22 + $0x20] sm:$0xff] %v2794_v63 }
 0xae0   :  { %v8430_v52 = vadd.f32 %v2799_v57, %v2798_v56  ;;  %v8994_v57 = vld [vmem:[#allocation34_spill] sm:$0xff] }
 0xae2   :  { %v2804_v12 = vsub.f32 %v8430_v52, %v2803_v41 }
 0xae4   :  { %vm2805_vm2 = vcmp.ge.f32.partialorder %v2804_v12, 0.0 }
 0xae5   :  { %v4403_v5 = vsel %vm2805_vm2, 1.0, %v8954_v26 }
 0xae6   :  { %v8434_v58 = vmul.f32 %v4403_v5, %v2803_v41  ;;  %v2812_v9 = vmul.f32 %v4403_v5, %v8991_v42  ;;  %2816 = vst [vmem:[#allocation21 + $0x20] sm:$0xff] %v4403_v5  ;;  %v3334_v41 = vld [vmem:[#allocation13 + $0x8] sm:$0xff] }
 0xae8   :  { %v2809_v59 = vsub.f32 %v8430_v52, %v8434_v58  ;;  %v8441_v61 = vadd.f32 %v2812_v9, %v2811_v44 }
 0xaea   :  { %v3319_v52 = vmul.f32 %v8441_v61, %v8992_v60 }
 0xafb   :  { %v2983_v47 = vpop.f32.mrb[26].mxu0 }
 0xafc   :  { %v2987_v20 = vadd.f32 %v2983_v47, %v2897_v51  ;;  %v5763_v54 = vpop.f32.mrb[27].mxu0 }
 0xafd   :  { %v3200_v54 = vmul.f32 %v2703_v55, %v7629_v18 }
 0xafe   :  { %v2996_v46 = vadd.f32 %v2987_v20, %v7739_v31  ;;  %v3204_v20 = vmul.f32 1.8, %v8356_v0  ;;  %v3413_v0 = vld [vmem:[#allocation15 + $0x20] sm:$0xff] }
 0xb00   :  { %v2999_v39 = vmul.f32 %v2996_v46, %v7534_v45  ;;  %v3205_v3 = vadd.f32 0.01, %v3204_v20  ;;  %v3420_v20 = vld [vmem:[#allocation15 + $0x58] sm:$0xff] }
 0xb02   :  { %v8451_v28 = vadd.f32 %v2999_v39, %v2998_v16  ;;  %v3409_v39 = vld [vmem:[#allocation15] sm:$0xff] }
 0xb04   :  { %v3004_v63 = vsub.f32 %v8451_v28, %v3003_v23 }
 0xb06   :  { %vm3005_vm3 = vcmp.ge.f32.partialorder %v3004_v63, 0.0 }
 0xb07   :  { %v4405_v1 = vsel %vm3005_vm3, 1.0, %v8954_v26 }
 0xb08   :  { %v8455_v6 = vmul.f32 %v4405_v1, %v3003_v23  ;;  %v3012_v32 = vmul.f32 %v4405_v1, %v7728_v14  ;;  %v8459_v22 = vmul.f32 %v8131_v49, %v4405_v1  ;;  %v3410_v23 = vld [vmem:[#allocation15 + $0x8] sm:$0xff] }
 0xb09   :  { %v8513_v1 = vpack.c.bf16 %v3410_v23, %v3409_v39  ;;  %v3423_v39 = vld [vmem:[#allocation15 + $0x70] sm:$0xff]  ;;  %v3424_v23 = vld [vmem:[#allocation15 + $0x78] sm:$0xff] }
 0xb0a   :  { %5797 = vmatmul.mubr.f32.vlgmr.msra.gmra.mrb[26].mxu1 %v8459_v22  ;;  %v8466_v56 = vadd.f32 %v3012_v32, %v3011_v62  ;;  %v3411_v62 = vld [vmem:[#allocation15 + $0x10] sm:$0xff] }
 0xb0b   :  { %6735 = vmatpush3.bf16.msra.mxu1 %v8123_v10  ;;  %5866 = vmatprep.mubr.msk.f32.mxu1 %vm7175_vm0, %v8954_v26 }
 0xb0c   :  { %6736 = vmatprep.subr.bf16.mxu1 %v8955_v25 }
 0xb0f   :  { %6738 = vmatpush3.bf16.msra.mxu1 %v8983_v30  ;;  %v8995_v30 = vld [vmem:[#allocation40_spill] sm:$0xff] }
 0xb10   :  { %6739 = vmatprep.subr.bf16.mxu1 %v8955_v25 }
 0xb13   :  { %6741 = vmatpush3.bf16.msra.mxu1 %v8984_v29  ;;  %v8996_v29 = vld [vmem:[#allocation41_spill] sm:$0xff] }
 0xb14   :  { %6742 = vmatprep.subr.bf16.mxu1 %v8955_v25 }
 0xb17   :  { %6744 = vmatpush3.bf16.msra.mxu1 %v8985_v50  ;;  %v3333_v50 = vld [vmem:[#allocation13] sm:$0xff] }
 0xb18   :  { %6745 = vmatprep.subr.bf16.mxu1 %v8955_v25  ;;  %v8486_v12 = vpack.c.bf16 %v3334_v41, %v3333_v50  ;;  %v3415_v41 = vld [vmem:[#allocation15 + $0x30] sm:$0xff] }
 0xb1a   :  { %6759 = vmatpush3.bf16.msra.mxu0 %v8486_v12 }
 0xb1b   :  { %v3186_v35 = vpop.f32.mrb[28].mxu0  ;;  %6747 = vmatpush3.bf16.msra.mxu1 %v8159_v8  ;;  %v3332_v8 = vld [vmem:[#allocation10 + $0x30] sm:$0xff]  ;;  %6784 = vmatprep.subr.bf16.mxu0 %v8955_v25 }
 0xb1c   :  { %v5833_v10 = vpop.f32.mrb[29].mxu0  ;;  %6748 = vmatprep.subr.bf16.mxu1 %v8955_v25 }
 0xb1d   :  { %5874 = vmatmul.mubr.msk.f32.vlgmr.msra.gmra.mrb[30].mxu0 %vm192_vm1, %v3332_v8  ;;  %v3416_v8 = vld [vmem:[#allocation15 + $0x38] sm:$0xff] }
 0xb1e   :  { %6786 = vmatpush3.bf16.msra.mxu0 %v8399_v17  ;;  %5943 = vmatprep.mubr.msk.f32.mxu0 %vm7175_vm0, %v8954_v26 }
 0xb1f   :  { %6750 = vmatpush3.bf16.msra.mxu1 %v8994_v57  ;;  %6787 = vmatprep.subr.bf16.mxu0 %v8955_v25  ;;  %v3310_v57 = vmul.f32 1.8, %v8441_v61 }
 0xb20   :  { %6751 = vmatprep.subr.bf16.mxu1 %v8955_v25 }
 0xb22   :  { %6789 = vmatpush3.bf16.msra.mxu0 %v8402_v7 }
 0xb23   :  { %6753 = vmatpush3.bf16.msra.mxu1 %v8995_v30  ;;  %6790 = vmatprep.subr.bf16.mxu0 %v8955_v25 }
 0xb24   :  { %6754 = vmatprep.subr.bf16.mxu1 %v8955_v25 }
 0xb26   :  { %6792 = vmatpush3.bf16.msra.mxu0 %v8406_v37 }
 0xb27   :  { %6756 = vmatpush3.bf16.msra.mxu1 %v8996_v29  ;;  %6793 = vmatprep.subr.bf16.mxu0 %v8955_v25  ;;  %v3414_v29 = vld [vmem:[#allocation15 + $0x28] sm:$0xff] }
 0xb28   :  { %6760 = vmatprep.subr.bf16.mxu1 %v8955_v25  ;;  %v8535_v50 = vpack.c.bf16 %v3414_v29, %v3413_v0  ;;  %v3615_v0 = vld [vmem:[#allocation18 + $0x18] sm:$0xff] }
 0xb2a   :  { %6795 = vmatpush3.bf16.msra.mxu0 %v8410_v43 }
 0xb2b   :  { %6796 = vmatprep.subr.bf16.mxu0 %v8955_v25 }
 0xbdd   :  { %v3099_v5 = vpop.f32.mrb[26].mxu1 }
 0xbde   :  { %v3100_v9 = vadd.f32 %v8197_v34, %v3099_v5  ;;  %v5798_v44 = vpop.f32.mrb[27].mxu1  ;;  %v8539_v5 = vpack.c.bf16 %v3416_v8, %v3415_v41  ;;  %v3616_v41 = vld [vmem:[#allocation18 + $0x20] sm:$0xff]  ;;  %v3617_v8 = vld [vmem:[#allocation18 + $0x28] sm:$0xff] }
 0xbdf   :  { %v3418_v44 = vld [vmem:[#allocation15 + $0x48] sm:$0xff] }
 0xbe0   :  { %v3190_v51 = vadd.f32 %v3186_v35, %v3100_v9  ;;  %v3412_v35 = vld [vmem:[#allocation15 + $0x18] sm:$0xff]  ;;  %v3417_v9 = vld [vmem:[#allocation15 + $0x40] sm:$0xff] }
 0xbe1   :  { %v8529_v30 = vpack.c.bf16 %v3412_v35, %v3411_v62  ;;  %v3614_v35 = vld [vmem:[#allocation18 + $0x10] sm:$0xff] }
 0xbe2   :  { %v3198_v47 = vadd.f32 %v3190_v51, %v7798_v13  ;;  %v8543_v51 = vpack.c.bf16 %v3418_v44, %v3417_v9  ;;  %v8564_v29 = vpack.c.bf16 %v3615_v0, %v3614_v35  ;;  %v8570_v9 = vpack.c.bf16 %v3617_v8, %v3616_v41  ;;  %v3618_v44 = vld [vmem:[#allocation18 + $0x30] sm:$0xff]  ;;  %v3625_v35 = vld [vmem:[#allocation18 + $0x68] sm:$0xff]  ;;  %v3627_v8 = vld [vmem:[#allocation18 + $0x78] sm:$0xff] }
 0xbe3   :  { %v3626_v41 = vld [vmem:[#allocation18 + $0x70] sm:$0xff] }
 0xbe4   :  { %v3201_v46 = vmul.f32 %v3198_v47, %v7632_v24  ;;  %v3419_v47 = vld [vmem:[#allocation15 + $0x50] sm:$0xff] }
 0xbe6   :  { %v8509_v38 = vadd.f32 %v3201_v46, %v3200_v54  ;;  %v8547_v54 = vpack.c.bf16 %v3420_v20, %v3419_v47  ;;  %v3421_v46 = vld [vmem:[#allocation15 + $0x60] sm:$0xff]  ;;  %v3619_v47 = vld [vmem:[#allocation18 + $0x38] sm:$0xff] }
 0xbe7   :  { %v3620_v20 = vld [vmem:[#allocation18 + $0x40] sm:$0xff] }
 0xbe8   :  { %v3206_v16 = vsub.f32 %v8509_v38, %v3205_v3 }
 0xbea   :  { %vm3207_vm4 = vcmp.ge.f32.partialorder %v3206_v16, 0.0 }
 0xbeb   :  { %v4406_v63 = vsel %vm3207_vm4, 1.0, %v8954_v26 }
 0xbec   :  { %v8515_v32 = vmul.f32 %v4406_v63, %v3205_v3  ;;  %v3214_v53 = vmul.f32 %v4406_v63, %v7791_v27  ;;  %v8521_v55 = vmul.f32 %v8219_v11, %v4406_v63  ;;  %v3422_v3 = vld [vmem:[#allocation15 + $0x68] sm:$0xff]  ;;  %v8555_v63 = vpack.c.bf16 %v3424_v23, %v3423_v39  ;;  %v3622_v39 = vld [vmem:[#allocation18 + $0x50] sm:$0xff]  ;;  %v3623_v23 = vld [vmem:[#allocation18 + $0x58] sm:$0xff] }
 0xbed   :  { %v8551_v16 = vpack.c.bf16 %v3422_v3, %v3421_v46  ;;  %v3621_v46 = vld [vmem:[#allocation18 + $0x48] sm:$0xff] }
 0xbee   :  { %v8523_v10 = vadd.f32 %v3214_v53, %v3213_v15  ;;  %5867 = vmatmul.mubr.f32.vlgmr.msra.gmra.mrb[28].mxu1 %v8521_v55  ;;  %v3612_v15 = vld [vmem:[#allocation18] sm:$0xff]  ;;  %v3613_v53 = vld [vmem:[#allocation18 + $0x8] sm:$0xff]  ;;  %v8578_v3 = vpack.c.bf16 %v3621_v46, %v3620_v20 }
 0xbef   :  { %6762 = vmatpush3.bf16.msra.mxu1 %v8513_v1  ;;  %5908 = vmatprep.mubr.msk.f32.mxu1 %vm7175_vm0, %v8954_v26  ;;  %v8559_v62 = vpack.c.bf16 %v3613_v53, %v3612_v15  ;;  %v8582_v15 = vpack.c.bf16 %v3623_v23, %v3622_v39  ;;  %v3624_v53 = vld [vmem:[#allocation18 + $0x60] sm:$0xff]  ;;  %v3534_v46 = vld [vmem:[#allocation16 + $0x48] sm:$0xff] }
 0xbf0   :  { %6763 = vmatprep.subr.bf16.mxu1 %v8955_v25  ;;  %v8586_v0 = vpack.c.bf16 %v3625_v35, %v3624_v53  ;;  %v3533_v20 = vld [vmem:[#allocation16 + $0x40] sm:$0xff]  ;;  %v3535_v53 = vld [vmem:[#allocation16 + $0x50] sm:$0xff]  ;;  %v3536_v35 = vld [vmem:[#allocation16 + $0x58] sm:$0xff] }
 0xbf1   :  { %v8600_v23 = vpack.c.bf16 %v3534_v46, %v3533_v20  ;;  %v3539_v20 = vld [vmem:[#allocation16 + $0x70] sm:$0xff]  ;;  %v3540_v46 = vld [vmem:[#allocation16 + $0x78] sm:$0xff] }
 0xbf2   :  { %8997 = vst [vmem:[#allocation30_spill] sm:$0xff] %v8586_v0 }
 0xbf3   :  { %6765 = vmatpush3.bf16.msra.mxu1 %v8529_v30  ;;  %6798 = vmatpush3.bf16.msra.mxu0 %v8600_v23 }
 0xbf4   :  { %6766 = vmatprep.subr.bf16.mxu1 %v8955_v25  ;;  %6799 = vmatprep.subr.bf16.mxu0 %v8955_v25 }
 0xbf7   :  { %6768 = vmatpush3.bf16.msra.mxu1 %v8535_v50 }
 0xbf8   :  { %6769 = vmatprep.subr.bf16.mxu1 %v8955_v25 }
 0xbfb   :  { %6771 = vmatpush3.bf16.msra.mxu1 %v8539_v5 }
 0xbfc   :  { %6772 = vmatprep.subr.bf16.mxu1 %v8955_v25 }
 0xbff   :  { %6774 = vmatpush3.bf16.msra.mxu1 %v8543_v51 }
 0xc00   :  { %6775 = vmatprep.subr.bf16.mxu1 %v8955_v25 }
 0xc03   :  { %6777 = vmatpush3.bf16.msra.mxu1 %v8547_v54 }
 0xc04   :  { %6778 = vmatprep.subr.bf16.mxu1 %v8955_v25 }
 0xc07   :  { %6780 = vmatpush3.bf16.msra.mxu1 %v8551_v16 }
 0xc08   :  { %6781 = vmatprep.subr.bf16.mxu1 %v8955_v25 }
 0xc0b   :  { %6783 = vmatpush3.bf16.msra.mxu1 %v8555_v63 }
 0xc0c   :  { %6808 = vmatprep.subr.bf16.mxu1 %v8955_v25 }
 0xc0e   :  { %5909 = vmatmul.mubr.f32.vlgmr.msra.gmra.mrb[30].mxu1 %v8459_v22  ;;  %v8574_v22 = vpack.c.bf16 %v3619_v47, %v3618_v44  ;;  %v8590_v44 = vpack.c.bf16 %v3627_v8, %v3626_v41  ;;  %v3404_v47 = vpop.f32.mrb[30].mxu0  ;;  %v3538_v41 = vld [vmem:[#allocation16 + $0x68] sm:$0xff] }
 0xc0f   :  { %6810 = vmatpush3.bf16.msra.mxu1 %v8559_v62  ;;  %5978 = vmatprep.mubr.msk.f32.mxu1 %vm7175_vm0, %v8954_v26  ;;  %v5875_v39 = vpop.f32.mrb[31].mxu0 }
 0xc10   :  { %6811 = vmatprep.subr.bf16.mxu1 %v8955_v25  ;;  %8998 = vst [vmem:[#allocation31_spill] sm:$0xff] %v8590_v44  ;;  %v8612_v39 = vpack.c.bf16 %v3540_v46, %v3539_v20  ;;  %v3311_v46 = vadd.f32 0.01, %v3310_v57  ;;  %v3405_v57 = vadd.f32 %v8981_v48, %v3404_v47  ;;  %v3727_v48 = vld [vmem:[#allocation19] sm:$0xff]  ;;  %v3728_v47 = vld [vmem:[#allocation19 + $0x8] sm:$0xff] }
 0xc13   :  { %6813 = vmatpush3.bf16.msra.mxu1 %v8564_v29 }
 0xc14   :  { %6814 = vmatprep.subr.bf16.mxu1 %v8955_v25 }
 0xc17   :  { %6816 = vmatpush3.bf16.msra.mxu1 %v8570_v9 }
 0xc18   :  { %6817 = vmatprep.subr.bf16.mxu1 %v8955_v25 }
 0xc1b   :  { %6819 = vmatpush3.bf16.msra.mxu1 %v8574_v22 }
 0xc1c   :  { %6820 = vmatprep.subr.bf16.mxu1 %v8955_v25 }
 0xc1f   :  { %6822 = vmatpush3.bf16.msra.mxu1 %v8578_v3 }
 0xc20   :  { %6823 = vmatprep.subr.bf16.mxu1 %v8955_v25 }
 0xc23   :  { %6825 = vmatpush3.bf16.msra.mxu1 %v8582_v15 }
 0xc24   :  { %6826 = vmatprep.subr.bf16.mxu1 %v8955_v25 }
 0xc27   :  { %6828 = vmatpush3.bf16.msra.mxu1 %v8586_v0 }
 0xc28   :  { %6829 = vmatprep.subr.bf16.mxu1 %v8955_v25 }
 0xc2b   :  { %6831 = vmatpush3.bf16.msra.mxu1 %v8590_v44 }
 0xc2c   :  { %6856 = vmatprep.subr.bf16.mxu1 %v8955_v25 }
 0xc2e   :  { %5979 = vmatmul.mubr.f32.vlgmr.msra.gmra.mrb[32].mxu1 %v8521_v55  ;;  %v8604_v55 = vpack.c.bf16 %v3536_v35, %v3535_v53 }
 0xc2f   :  { %6858 = vmatpush3.bf16.msra.mxu1 %v8486_v12  ;;  %6020 = vmatprep.mubr.msk.f32.mxu1 %vm7175_vm0, %v8954_v26  ;;  %v3537_v12 = vld [vmem:[#allocation16 + $0x60] sm:$0xff] }
 0xc30   :  { %6883 = vmatprep.subr.bf16.mxu1 %v8955_v25  ;;  %6801 = vmatpush3.bf16.msra.mxu0 %v8604_v55  ;;  %v8608_v8 = vpack.c.bf16 %v3538_v41, %v3537_v12  ;;  %v3306_v12 = vmul.f32 %v2809_v59, %v7699_v4 }
 0xc31   :  { %6802 = vmatprep.subr.bf16.mxu0 %v8955_v25 }
 0xc34   :  { %6804 = vmatpush3.bf16.msra.mxu0 %v8608_v8 }
 0xc35   :  { %6805 = vmatprep.subr.bf16.mxu0 %v8955_v25 }
 0xc38   :  { %6807 = vmatpush3.bf16.msra.mxu0 %v8612_v39 }
 0xc39   :  { %6832 = vmatprep.subr.bf16.mxu0 %v8955_v25 }
 0xcc1   :  { %v3301_v53 = vpop.f32.mrb[28].mxu1 }
 0xcc2   :  { %v3302_v35 = vadd.f32 %v8270_v33, %v3301_v53  ;;  %v5868_v36 = vpop.f32.mrb[29].mxu1 }
 0xcc4   :  { %v3307_v41 = vmul.f32 %v3302_v35, %v8962_v19  ;;  %3326 = vst [vmem:[#allocation22 + $0x28] sm:$0xff] %v3302_v35 }
 0xcc6   :  { %v8623_v20 = vadd.f32 %v3307_v41, %v3306_v12 }
 0xcc8   :  { %v3312_v44 = vsub.f32 %v8623_v20, %v3311_v46 }
 0xcca   :  { %vm3313_vm5 = vcmp.ge.f32.partialorder %v3312_v44, 0.0 }
 0xccb   :  { %v4407_v0 = vsel %vm3313_vm5, 1.0, %v8954_v26 }
 0xccc   :  { %v8627_v53 = vmul.f32 %v4407_v0, %v3311_v46  ;;  %v3320_v36 = vmul.f32 %v4407_v0, %v8991_v42  ;;  %3324 = vst [vmem:[#allocation21 + $0x28] sm:$0xff] %v4407_v0  ;;  %v3510_v46 = vmul.f32 1.8, %v8466_v56  ;;  %v8999_v0 = vsub.f32 %v8451_v28, %v8455_v6  ;;  %v3729_v6 = vld [vmem:[#allocation19 + $0x10] sm:$0xff] }
 0xcce   :  { %v3317_v58 = vsub.f32 %v8623_v20, %v8627_v53  ;;  %v8634_v59 = vadd.f32 %v3320_v36, %v3319_v52  ;;  %v3506_v42 = vmul.f32 %v8999_v0, %v7531_v40  ;;  %v3511_v36 = vadd.f32 0.01, %v3510_v46 }
 0xce1   :  { %v3491_v35 = vpop.f32.mrb[30].mxu1 }
 0xce2   :  { %v3495_v12 = vadd.f32 %v3491_v35, %v3405_v57  ;;  %v5910_v44 = vpop.f32.mrb[31].mxu1  ;;  %v8648_v35 = vpack.c.bf16 %v3728_v47, %v3727_v48 }
 0xce4   :  { %v3504_v41 = vadd.f32 %v3495_v12, %v7739_v31 }
 0xce6   :  { %v3507_v61 = vmul.f32 %v3504_v41, %v7534_v45  ;;  %v3519_v41 = vmul.f32 %v8466_v56, %v7731_v21  ;;  %v3733_v56 = vld [vmem:[#allocation19 + $0x30] sm:$0xff] }
 0xce8   :  { %v8644_v60 = vadd.f32 %v3507_v61, %v3506_v42  ;;  %v3730_v42 = vld [vmem:[#allocation19 + $0x18] sm:$0xff] }
 0xce9   :  { %v8664_v61 = vpack.c.bf16 %v3730_v42, %v3729_v6  ;;  %v3737_v42 = vld [vmem:[#allocation19 + $0x50] sm:$0xff] }
 0xcea   :  { %v3512_v52 = vsub.f32 %v8644_v60, %v3511_v36 }
 0xcec   :  { %vm3513_vm6 = vcmp.ge.f32.partialorder %v3512_v52, 0.0 }
 0xced   :  { %v4409_v57 = vsel %vm3513_vm6, 1.0, %v8954_v26 }
 0xcee   :  { %v8650_v12 = vmul.f32 %v4409_v57, %v3511_v36  ;;  %v3520_v44 = vmul.f32 %v4409_v57, %v7728_v14  ;;  %v8654_v28 = vmul.f32 %v8131_v49, %v4409_v57  ;;  %v3731_v14 = vld [vmem:[#allocation19 + $0x20] sm:$0xff]  ;;  %v3732_v49 = vld [vmem:[#allocation19 + $0x28] sm:$0xff]  ;;  %v3734_v36 = vld [vmem:[#allocation19 + $0x38] sm:$0xff] }
 0xcef   :  { %v8670_v21 = vpack.c.bf16 %v3732_v49, %v3731_v14  ;;  %v8674_v52 = vpack.c.bf16 %v3734_v36, %v3733_v56  ;;  %v3735_v57 = vld [vmem:[#allocation19 + $0x40] sm:$0xff]  ;;  %v3740_v56 = vld [vmem:[#allocation19 + $0x68] sm:$0xff] }
 0xcf0   :  { %v3517_v46 = vsub.f32 %v8644_v60, %v8650_v12  ;;  %5944 = vmatmul.mubr.f32.vlgmr.msra.gmra.mrb[32].mxu0 %v8654_v28  ;;  %v8661_v0 = vadd.f32 %v3520_v44, %v3519_v41  ;;  %v3736_v44 = vld [vmem:[#allocation19 + $0x48] sm:$0xff]  ;;  %v3738_v41 = vld [vmem:[#allocation19 + $0x58] sm:$0xff]  ;;  %v3739_v49 = vld [vmem:[#allocation19 + $0x60] sm:$0xff] }
 0xcf1   :  { %6834 = vmatpush3.bf16.msra.mxu0 %v8648_v35  ;;  %6013 = vmatprep.mubr.msk.f32.mxu0 %vm7175_vm0, %v8954_v26  ;;  %v8679_v6 = vpack.c.bf16 %v3736_v44, %v3735_v57  ;;  %v8683_v14 = vpack.c.bf16 %v3738_v41, %v3737_v42  ;;  %v8687_v36 = vpack.c.bf16 %v3740_v56, %v3739_v49  ;;  %v3742_v57 = vld [vmem:[#allocation19 + $0x78] sm:$0xff]  ;;  %v3840_v42 = vld [vmem:[#allocation10 + $0x38] sm:$0xff]  ;;  %v3712_v41 = vmul.f32 1.8, %v8523_v10 }
 0xcf2   :  { %6835 = vmatprep.subr.bf16.mxu0 %v8955_v25  ;;  %6021 = vmatmul.mubr.msk.f32.vlgmr.msra.gmra.mrb[34].mxu1 %vm192_vm1, %v3840_v42 }
 0xcf3   :  { %6885 = vmatpush3.bf16.msra.mxu1 %v8399_v17  ;;  %6090 = vmatprep.mubr.msk.f32.mxu1 %vm7175_vm0, %v8954_v26 }
 0xcf4   :  { %6886 = vmatprep.subr.bf16.mxu1 %v8955_v25 }
 0xcf5   :  { %6837 = vmatpush3.bf16.msra.mxu0 %v8664_v61 }
 0xcf6   :  { %6838 = vmatprep.subr.bf16.mxu0 %v8955_v25 }
 0xcf7   :  { %6888 = vmatpush3.bf16.msra.mxu1 %v8402_v7 }
 0xcf8   :  { %6889 = vmatprep.subr.bf16.mxu1 %v8955_v25 }
 0xcf9   :  { %6840 = vmatpush3.bf16.msra.mxu0 %v8670_v21 }
 0xcfa   :  { %6841 = vmatprep.subr.bf16.mxu0 %v8955_v25 }
 0xcfb   :  { %6891 = vmatpush3.bf16.msra.mxu1 %v8406_v37 }
 0xcfc   :  { %6892 = vmatprep.subr.bf16.mxu1 %v8955_v25 }
 0xcfd   :  { %6843 = vmatpush3.bf16.msra.mxu0 %v8674_v52 }
 0xcfe   :  { %6844 = vmatprep.subr.bf16.mxu0 %v8955_v25 }
 0xcff   :  { %6894 = vmatpush3.bf16.msra.mxu1 %v8410_v43 }
 0xd00   :  { %6895 = vmatprep.subr.bf16.mxu1 %v8955_v25 }
 0xd01   :  { %v3694_v48 = vpop.f32.mrb[32].mxu1  ;;  %6846 = vmatpush3.bf16.msra.mxu0 %v8679_v6 }
 0xd02   :  { %v5980_v47 = vpop.f32.mrb[33].mxu1  ;;  %6847 = vmatprep.subr.bf16.mxu0 %v8955_v25 }
 0xd03   :  { %v3741_v47 = vld [vmem:[#allocation19 + $0x70] sm:$0xff]  ;;  %6897 = vmatpush3.bf16.msra.mxu1 %v8600_v23 }
 0xd04   :  { %v8691_v44 = vpack.c.bf16 %v3742_v57, %v3741_v47  ;;  %6898 = vmatprep.subr.bf16.mxu1 %v8955_v25 }
 0xd05   :  { %6849 = vmatpush3.bf16.msra.mxu0 %v8683_v14 }
 0xd06   :  { %6850 = vmatprep.subr.bf16.mxu0 %v8955_v25 }
 0xd07   :  { %6900 = vmatpush3.bf16.msra.mxu1 %v8604_v55  ;;  %v9000_v55 = vsub.f32 %v8509_v38, %v8515_v32  ;;  %v3721_v38 = vmul.f32 %v8523_v10, %v7788_v2  ;;  %v9001_v2 = vld [vmem:[#allocation30_spill] sm:$0xff] }
 0xd08   :  { %6901 = vmatprep.subr.bf16.mxu1 %v8955_v25 }
 0xd09   :  { %6852 = vmatpush3.bf16.msra.mxu0 %v8687_v36 }
 0xd0a   :  { %6853 = vmatprep.subr.bf16.mxu0 %v8955_v25 }
 0xd0b   :  { %6903 = vmatpush3.bf16.msra.mxu1 %v8608_v8  ;;  %v3708_v8 = vmul.f32 %v9000_v55, %v7629_v18 }
 0xd0c   :  { %6904 = vmatprep.subr.bf16.mxu1 %v8955_v25 }
 0xd0d   :  { %6855 = vmatpush3.bf16.msra.mxu0 %v8691_v44 }
 0xd0e   :  { %6859 = vmatprep.subr.bf16.mxu0 %v8955_v25 }
 0xd0f   :  { %6906 = vmatpush3.bf16.msra.mxu1 %v8612_v39  ;;  %v3713_v39 = vadd.f32 0.01, %v3712_v41  ;;  %v4018_v41 = vmul.f32 1.8, %v8661_v0 }
 0xd10   :  { %6931 = vmatprep.subr.bf16.mxu1 %v8955_v25 }
 0xdc3   :  { %v3607_v17 = vpop.f32.mrb[32].mxu0 }
 0xdc4   :  { %v3608_v7 = vadd.f32 %v8197_v34, %v3607_v17  ;;  %v5945_v37 = vpop.f32.mrb[33].mxu0 }
 0xdc6   :  { %v3698_v43 = vadd.f32 %v3694_v48, %v3608_v7 }
 0xdc8   :  { %v3706_v23 = vadd.f32 %v3698_v43, %v7798_v13 }
 0xdca   :  { %v3709_v49 = vmul.f32 %v3706_v23, %v7632_v24 }
 0xdcc   :  { %v8722_v56 = vadd.f32 %v3709_v49, %v3708_v8  ;;  %v4019_v49 = vadd.f32 0.01, %v4018_v41 }
 0xdce   :  { %v3714_v47 = vsub.f32 %v8722_v56, %v3713_v39 }
 0xdd0   :  { %vm3715_vm1 = vcmp.ge.f32.partialorder %v3714_v47, 0.0 }
 0xdd1   :  { %v4410_v34 = vsel %vm3715_vm1, 1.0, %v8954_v26 }
 0xdd2   :  { %v8726_v48 = vmul.f32 %v4410_v34, %v3713_v39  ;;  %v3722_v57 = vmul.f32 %v4410_v34, %v7791_v27  ;;  %v3725_v42 = vmul.f32 %v8219_v11, %v4410_v34  ;;  %v9002_v27 = vld [vmem:[#allocation31_spill] sm:$0xff]  ;;  %v3912_v11 = vpop.f32.mrb[34].mxu1  ;;  %v6974_v34 = vld [vmem:[%s8878_s7] ss:$0 sm:$0xff] }
 0xdd4   :  { %6014 = vmatmul.mubr.f32.vlgmr.msra.gmra.mrb[34].mxu0 %v3725_v42  ;;  %v3719_v32 = vsub.f32 %v8722_v56, %v8726_v48  ;;  %v8734_v17 = vadd.f32 %v3722_v57, %v3721_v38  ;;  %v6976_v57 = vld [vmem:[%s8885_s14] ss:$0 sm:$0xff] }
 0xdd5   :  { %6861 = vmatpush3.bf16.msra.mxu0 %v8513_v1  ;;  %6055 = vmatprep.mubr.msk.f32.mxu0 %vm7175_vm0, %v8954_v26  ;;  %v6022_v1 = vpop.f32.mrb[35].mxu1 }
 0xdd6   :  { %6862 = vmatprep.subr.bf16.mxu0 %v8955_v25 }
 0xdd9   :  { %6864 = vmatpush3.bf16.msra.mxu0 %v8529_v30 }
 0xdda   :  { %6865 = vmatprep.subr.bf16.mxu0 %v8955_v25 }
 0xddd   :  { %6867 = vmatpush3.bf16.msra.mxu0 %v8535_v50  ;;  %v3818_v50 = vmul.f32 1.8, %v8634_v59 }
 0xdde   :  { %6868 = vmatprep.subr.bf16.mxu0 %v8955_v25 }
 0xde1   :  { %6870 = vmatpush3.bf16.msra.mxu0 %v8539_v5 }
 0xde2   :  { %6871 = vmatprep.subr.bf16.mxu0 %v8955_v25 }
 0xde5   :  { %6873 = vmatpush3.bf16.msra.mxu0 %v8543_v51  ;;  %v3814_v51 = vmul.f32 %v3317_v58, %v7699_v4  ;;  %v6973_v58 = vld [vmem:[%s8944_s25] ss:$0 sm:$0xff] }
 0xde6   :  { %6874 = vmatprep.subr.bf16.mxu0 %v8955_v25 }
 0xde9   :  { %6876 = vmatpush3.bf16.msra.mxu0 %v8547_v54 }
 0xdea   :  { %6877 = vmatprep.subr.bf16.mxu0 %v8955_v25 }
 0xded   :  { %6879 = vmatpush3.bf16.msra.mxu0 %v8551_v16 }
 0xdee   :  { %6880 = vmatprep.subr.bf16.mxu0 %v8955_v25 }
 0xdf1   :  { %6882 = vmatpush3.bf16.msra.mxu0 %v8555_v63  ;;  %v3819_v63 = vadd.f32 0.01, %v3818_v50 }
 0xdf2   :  { %6907 = vmatprep.subr.bf16.mxu0 %v8955_v25 }
 0xdf4   :  { %6056 = vmatmul.mubr.f32.vlgmr.msra.gmra.mrb[36].mxu0 %v8654_v28  ;;  %v3913_v28 = vadd.f32 %v6973_v58, %v3912_v11 }
 0xdf5   :  { %6909 = vmatpush3.bf16.msra.mxu0 %v8559_v62  ;;  %6125 = vmatprep.mubr.msk.f32.mxu0 %vm7175_vm0, %v8954_v26 }
 0xdf6   :  { %6910 = vmatprep.subr.bf16.mxu0 %v8955_v25 }
 0xdf9   :  { %6912 = vmatpush3.bf16.msra.mxu0 %v8564_v29 }
 0xdfa   :  { %6913 = vmatprep.subr.bf16.mxu0 %v8955_v25 }
 0xdfd   :  { %6915 = vmatpush3.bf16.msra.mxu0 %v8570_v9  ;;  %v9003_v9 = vld [vmem:[#allocation38_spill] sm:$0xff] }
 0xdfe   :  { %6916 = vmatprep.subr.bf16.mxu0 %v8955_v25 }
 0xe01   :  { %6918 = vmatpush3.bf16.msra.mxu0 %v8574_v22 }
 0xe02   :  { %6919 = vmatprep.subr.bf16.mxu0 %v8955_v25 }
 0xe05   :  { %6921 = vmatpush3.bf16.msra.mxu0 %v8578_v3  ;;  %v9004_v3 = vld [vmem:[#allocation39_spill] sm:$0xff] }
 0xe06   :  { %6922 = vmatprep.subr.bf16.mxu0 %v8955_v25 }
 0xe09   :  { %6924 = vmatpush3.bf16.msra.mxu0 %v8582_v15  ;;  %v3827_v15 = vmul.f32 %v8634_v59, %v9004_v3  ;;  %v4014_v59 = vmul.f32 %v3517_v46, %v7531_v40 }
 0xe0a   :  { %6925 = vmatprep.subr.bf16.mxu0 %v8955_v25 }
 0xe0d   :  { %6927 = vmatpush3.bf16.msra.mxu0 %v9001_v2 }
 0xe0e   :  { %6928 = vmatprep.subr.bf16.mxu0 %v8955_v25 }
 0xe11   :  { %6930 = vmatpush3.bf16.msra.mxu0 %v9002_v27 }
 0xe14   :  { %6126 = vmatmul.mubr.f32.vlgmr.msra.gmra.mrb[38].mxu0 %v3725_v42 }
 0xea7   :  { %v3809_v10 = vpop.f32.mrb[34].mxu0 }
 0xea8   :  { %v3810_v30 = vadd.f32 %v8270_v33, %v3809_v10  ;;  %v6015_v5 = vpop.f32.mrb[35].mxu0 }
 0xeaa   :  { %v3815_v54 = vmul.f32 %v3810_v30, %v8962_v19  ;;  %3834 = vst [vmem:[#allocation22 + $0x30] sm:$0xff] %v3810_v30 }
 0xeac   :  { %v8779_v16 = vadd.f32 %v3815_v54, %v3814_v51 }
 0xeae   :  { %v3820_v62 = vsub.f32 %v8779_v16, %v3819_v63 }
 0xeb0   :  { %vm3821_vm7 = vcmp.ge.f32.partialorder %v3820_v62, 0.0 }
 0xeb1   :  { %v4411_v29 = vsel %vm3821_vm7, 1.0, %v8954_v26 }
 0xeb2   :  { %v8783_v33 = vmul.f32 %v4411_v29, %v3819_v63  ;;  %v3828_v22 = vmul.f32 %v4411_v29, %v9003_v9  ;;  %3832 = vst [vmem:[#allocation21 + $0x30] sm:$0xff] %v4411_v29 }
 0xeb4   :  { %v3825_v20 = vsub.f32 %v8779_v16, %v8783_v33  ;;  %v3829_v53 = vadd.f32 %v3828_v22, %v3827_v15 }
 0xeb6   :  { %v4326_v56 = vmul.f32 1.8, %v3829_v53  ;;  %v4322_v38 = vmul.f32 %v3825_v20, %v7699_v4 }
 0xec7   :  { %v3999_v7 = vpop.f32.mrb[36].mxu0 }
 0xec8   :  { %v4003_v37 = vadd.f32 %v3999_v7, %v3913_v28  ;;  %v6057_v43 = vpop.f32.mrb[37].mxu0 }
 0xeca   :  { %v4012_v23 = vadd.f32 %v4003_v37, %v7739_v31 }
 0xecc   :  { %v4015_v55 = vmul.f32 %v4012_v23, %v7534_v45 }
 0xece   :  { %v4016_v8 = vadd.f32 %v4015_v55, %v4014_v59 }
 0xed0   :  { %v4020_v39 = vsub.f32 %v4016_v8, %v4019_v49 }
 0xed2   :  { %vm4021_vm8 = vcmp.ge.f32.partialorder %v4020_v39, 0.0 }
 0xed3   :  { %v4413_v47 = vsel %vm4021_vm8, 1.0, %v8954_v26 }
 0xed4   :  { %v4031_v31 = vmul.f32 %v6974_v34, %v4413_v47 }
 0xed6   :  { %6091 = vmatmul.mubr.f32.vlgmr.msra.gmra.mrb[36].mxu1 %v4031_v31 }
 0xed7   :  { %6933 = vmatpush3.bf16.msra.mxu1 %v8648_v35  ;;  %6160 = vmatprep.mubr.msk.f32.mxu1 %vm7175_vm0, %v8954_v26  ;;  %v6975_v35 = vld [vmem:[%s8880_s9] ss:$0 sm:$0xff] }
 0xed8   :  { %6934 = vmatprep.subr.bf16.mxu1 %v8955_v25 }
 0xedb   :  { %6936 = vmatpush3.bf16.msra.mxu1 %v8664_v61 }
 0xedc   :  { %6937 = vmatprep.subr.bf16.mxu1 %v8955_v25 }
 0xedf   :  { %6939 = vmatpush3.bf16.msra.mxu1 %v8670_v21  ;;  %v4220_v21 = vmul.f32 1.8, %v8734_v17 }
 0xee0   :  { %6940 = vmatprep.subr.bf16.mxu1 %v8955_v25 }
 0xee3   :  { %6942 = vmatpush3.bf16.msra.mxu1 %v8674_v52  ;;  %v4216_v52 = vmul.f32 %v3719_v32, %v7629_v18  ;;  %v6977_v18 = vld [vmem:[%s8887_s16] ss:$0 sm:$0xff] }
 0xee4   :  { %6943 = vmatprep.subr.bf16.mxu1 %v8955_v25 }
 0xee7   :  { %v4202_v40 = vpop.f32.mrb[38].mxu0  ;;  %6945 = vmatpush3.bf16.msra.mxu1 %v8679_v6 }
 0xee8   :  { %v6127_v45 = vpop.f32.mrb[39].mxu0  ;;  %6946 = vmatprep.subr.bf16.mxu1 %v8955_v25 }
 0xeeb   :  { %6948 = vmatpush3.bf16.msra.mxu1 %v8683_v14  ;;  %v4221_v14 = vadd.f32 0.01, %v4220_v21 }
 0xeec   :  { %6949 = vmatprep.subr.bf16.mxu1 %v8955_v25 }
 0xeef   :  { %6951 = vmatpush3.bf16.msra.mxu1 %v8687_v36 }
 0xef0   :  { %6952 = vmatprep.subr.bf16.mxu1 %v8955_v25 }
 0xef3   :  { %6954 = vmatpush3.bf16.msra.mxu1 %v8691_v44 }
 0xfa9   :  { %v4115_v60 = vpop.f32.mrb[36].mxu1 }
 0xfaa   :  { %v4116_v12 = vadd.f32 %v6975_v35, %v4115_v60  ;;  %v6092_v46 = vpop.f32.mrb[37].mxu1 }
 0xfac   :  { %v4206_v0 = vadd.f32 %v4202_v40, %v4116_v12 }
 0xfae   :  { %v4214_v61 = vadd.f32 %v4206_v0, %v7798_v13 }
 0xfb0   :  { %v4217_v25 = vmul.f32 %v4214_v61, %v7632_v24 }
 0xfb2   :  { %v4218_v6 = vadd.f32 %v4217_v25, %v4216_v52 }
 0xfb4   :  { %v4222_v36 = vsub.f32 %v4218_v6, %v4221_v14 }
 0xfb6   :  { %vm4223_vm0 = vcmp.ge.f32.partialorder %v4222_v36, 0.0 }
 0xfb7   :  { %v4414_v44 = vsel %vm4223_vm0, 1.0, %v8954_v26 }
 0xfb8   :  { %v4233_v13 = vmul.f32 %v6976_v57, %v4414_v44 }
 0xfba   :  { %6161 = vmatmul.mubr.f32.vlgmr.msra.gmra.mrb[38].mxu1 %v4233_v13 }
0x108d   :  { %v4317_v42 = vpop.f32.mrb[38].mxu1 }
0x108e   :  { %v4318_v24 = vadd.f32 %v6977_v18, %v4317_v42  ;;  %v6162_v48 = vpop.f32.mrb[39].mxu1 }
0x1090   :  { %v4323_v32 = vmul.f32 %v4318_v24, %v8962_v19  ;;  %4342 = vst [vmem:[#allocation22 + $0x38] sm:$0xff] %v4318_v24 }
0x1091   :  { %7121 = shalt.err (!%p7118_p10)
}
0x1092   :  { %s9005_s26 = sld [smem:[#allocation48_spill]] }
0x1098   :  { %s7122_s16 = scalar_lea.hbm %s9005_s26, 1024 }
0x1099   :  { %p7123_p11 = scmp.ne.s32.totalorder %s9005_s26, %s7122_s16  ;;  %p7126_p12 = scmp.lt.u32.totalorder %s7122_s16, %s9005_s26 }
0x109b   :  { %p7128_p13 = pnand %p7126_p12, %p7123_p11 }
0x109d   :  { %7131 = shalt.err (!%p7128_p13)
}
0x109e   :  { %4366 = dma.vmem_to_hbm [thread:$0]  %s4361_s8, 1024, %s9005_s26, [#allocation23], %s7168_s0, %s7168_s0, %s7169_s21   ;;  %v4324_v4 = vadd.f32 %v4323_v32, %v4322_v38  ;;  %v4327_v19 = vadd.f32 0.01, %v4326_v56 }
0x109f   :  { %s7178_s5 = smov [#allocation21]  }
0x10a0   :  { %s4348_s23 = sshll.u32 %s7178_s5, 4  ;;  %v4328_v17 = vsub.f32 %v4324_v4, %v4327_v19  ;;  %s4349_s23 = int_to_ptr.vmem [resolvable:$true] %s4348_s23 }
0x10a1   :  { %s7132_s28 = scalar_lea.vmem %s4349_s23, 1024  ;;  %p7137_p1 = scmp.lt.s32.totalorder %s4349_s23, %s4349_s23 }
0x10a2   :  { %vm4329_vm9 = vcmp.ge.f32.partialorder %v4328_v17, 0.0  ;;  %p7133_p0 = scmp.ne.s32.totalorder %s4349_s23, %s7132_s28  ;;  %p7138_p2 = scmp.lt.s32.totalorder %s7132_s28, %s7132_s28 }
0x10a3   :  { %v4415_v2 = vsel %vm4329_vm9, 1.0, %v8954_v26 }
0x10a4   :  { %4340 = vst [vmem:[#allocation21 + $0x38] sm:$0xff] %v4415_v2  ;;  %p7139_p3 = por %p7138_p2, %p7137_p1 }
0x10a6   :  { %p7140_p4 = pnand %p7139_p3, %p7133_p0 }
0x10a8   :  { %7143 = shalt.err (!%p7140_p4)
}
0x10a9   :  { %s9006_s3 = sld [smem:[#allocation47_spill]] }
0x10af   :  { %s7144_s1 = scalar_lea.hbm %s9006_s3, 1024 }
0x10b0   :  { %p7145_p5 = scmp.ne.s32.totalorder %s9006_s3, %s7144_s1  ;;  %p7148_p6 = scmp.lt.u32.totalorder %s7144_s1, %s9006_s3 }
0x10b2   :  { %p7150_p7 = pnand %p7148_p6, %p7145_p5 }
0x10b4   :  { %7153 = shalt.err (!%p7150_p7)
}
0x10b5   :  { %4354 = dma.vmem_to_hbm [thread:$0]  %s4349_s23, 1024, %s9006_s3, [#allocation12], %s7168_s0, %s7168_s0, %s7169_s21  }
0x10b6   :  { %7162 = dma.done.wait [#allocation12], 1024  }
0x10b7   :  { %7163 = vsyncadd [#allocation12], 4294966272 }
0x10b8   :  { %7164 = dma.done.wait [#allocation23], 1024  }
0x10b9   :  { %7165 = vsyncadd [#allocation23], 4294966272 }
0x10ba   :  { %4373 = vsyncpa [#allocation11], 1 }
0x10bb   :  { %4374 = vsyncpa [#allocation14], 1 }
0x10bc   :  { %4375 = vsyncpa [#allocation17], 1 }
0x10bd   :  { %4376 = vsyncpa [#allocation20], 1 }
0x10be   :  { %4377 = vsyncpa [#allocation12], 1 }
0x10bf   :  { %4378 = vsyncpa [#allocation23], 1 }

</bundles_post_ra>
